<compile_context>
chip_gen: v6e
topology: v6e:2x2x1
jax: 0.10.0
libtpu: 0.0.40
codegen_flags: <defaults>
</compile_context>

<pallas_src>
import math

import jax
import jax.numpy as jnp
from jax.experimental import pallas as pl
from jax.experimental.pallas import tpu as pltpu


# ----------------------------- activations ---------------------------------

_SELU_ALPHA = 1.6732632423543772848170429916717
_SELU_SCALE = 1.0507009873554804934193349852946


def _relu(x):
    return jnp.maximum(x, 0.0)


def _selu(x):
    # scale * (max(0,x) + alpha*(exp(min(0,x)) - 1))  == torch SELU exactly
    return _SELU_SCALE * (
        jnp.maximum(x, 0.0) + _SELU_ALPHA * (jnp.exp(jnp.minimum(x, 0.0)) - 1.0)
    )


def _ceil_to(x, m):
    return ((x + m - 1) // m) * m


# ----------------------------- weight packing -------------------------------


def _pack_weight_slab(entries):
    """Pack a list of (name, 2-D f32 array) into one 8-row-aligned slab."""
    width = max(int(a.shape[1]) for _, a in entries)
    parts, layout, off = [], {}, 0
    for name, a in entries:
        a = jnp.asarray(a, jnp.float32)
        r, c = int(a.shape[0]), int(a.shape[1])
        rp = _ceil_to(r, 8)
        buf = jnp.zeros((rp, width), jnp.float32).at[:r, :c].set(a)
        parts.append(buf)
        layout[name] = (off, r, c)
        off += rp
    return jnp.concatenate(parts, axis=0), layout


# ----------------------------- relation matrices -----------------------------


def make_relation_matrices(N):
    pairs = [(r, s) for r in range(N) for s in range(N) if r != s]
    recv = jnp.array([r for r, _ in pairs], dtype=jnp.int32)
    send = jnp.array([s for _, s in pairs], dtype=jnp.int32)
    eye = jnp.arange(N, dtype=jnp.int32)[:, None]
    Rr = (eye == recv[None, :]).astype(jnp.float32)   # (N, Nr)
    Rs = (eye == send[None, :]).astype(jnp.float32)   # (N, Nr)
    return Rr, Rs


# ----------------------------- params ---------------------------------------


def init_linear(key, in_f, out_f):
    # Deterministic PyTorch-style init: U(-1/sqrt(fan_in), 1/sqrt(fan_in)).
    kw, kb = jax.random.split(key)
    bound = 1.0 / math.sqrt(in_f)
    W = jax.random.uniform(kw, (out_f, in_f), jnp.float32, -bound, bound)
    b = jax.random.uniform(kb, (out_f,), jnp.float32, -bound, bound)
    return W, b


def init_jedinet_params(key, P=3, N=30, hidden=50, De=12, Do=6, n_targets=5):
    H2 = hidden // 2
    keys = jax.random.split(key, 9)
    p = {}
    p["fr1"] = init_linear(keys[0], 2 * P, hidden)
    p["fr2"] = init_linear(keys[1], hidden, H2)
    p["fr3"] = init_linear(keys[2], H2, De)
    p["fo1"] = init_linear(keys[3], P + De, hidden)
    p["fo2"] = init_linear(keys[4], hidden, H2)
    p["fo3"] = init_linear(keys[5], H2, Do)
    p["fc1"] = init_linear(keys[6], Do * N, hidden)
    p["fc2"] = init_linear(keys[7], hidden, H2)
    p["fc3"] = init_linear(keys[8], H2, n_targets)
    return p


# ----------------------------- fused Pallas forward --------------------------


def jedinet_forward_pallas(x, params, Rr, Rs, *, batch_block=2):
    """x: (B, P, N) float32 — same layout as the PyTorch module."""
    B, P, N = x.shape
    Nr = N * (N - 1)
    hidden = params["fr1"][0].shape[0]
    H2 = params["fr2"][0].shape[0]
    De = params["fr3"][0].shape[0]
    Do = params["fo3"][0].shape[0]
    T = params["fc3"][0].shape[0]

    # ---- batch blocking ------------------------------------------------------
    TB = batch_block if B >= batch_block else B
    Bp = _ceil_to(B, TB)
    G = Bp // TB

    send_off = _ceil_to(N, 8)
    KS = 2 * send_off

    # Host-side "block diagonal" staging: xblk[b, :P, :N] = x_b and
    # xblk[b, P:, send_off:send_off+N] = x_b, so that ONE (2P, KS) @ (KS, Nr)
    # matmul against the stacked [Rr; 0; Rs; 0] one-hot performs both edge
    # gathers (receiver and sender features) at once, already transposed.
    xblk = jnp.zeros((Bp, 2 * P, KS), jnp.float32)
    xblk = xblk.at[:B, :P, :N].set(x)
    xblk = xblk.at[:B, P:, send_off:send_off + N].set(x)

    # One-hot relation constants, stored bf16 (0/1 values are exact in bf16).
    rrs = jnp.zeros((KS, Nr), jnp.float32)
    rrs = rrs.at[:N, :].set(Rr).at[send_off:send_off + N, :].set(Rs)
    rrs_bf = rrs.astype(jnp.bfloat16)                          # (KS, Nr)
    rrt_bf = jnp.asarray(Rr, jnp.float32).T.astype(jnp.bfloat16)  # (Nr, N)

    W1, b1 = params["fr1"]
    W2, b2 = params["fr2"]
    W3, b3 = params["fr3"]
    Wo1, bo1 = params["fo1"]
    Wo2, bo2 = params["fo2"]
    Wo3, bo3 = params["fo3"]
    Wc1, bc1 = params["fc1"]
    Wc2, bc2 = params["fc2"]
    Wc3, bc3 = params["fc3"]

    col = lambda v: jnp.reshape(v, (-1, 1))
    row = lambda v: jnp.reshape(v, (1, -1))

    entries = [
        ("w1", W1), ("b1c", col(b1)),            # fr weights (PyTorch layout:
        ("w2", W2), ("b2c", col(b2)),            #  they left-multiply in the
        ("w3", W3), ("b3c", col(b3)),            #  transposed formulation)
        ("wo1x", Wo1[:, :P]), ("wo1e", Wo1[:, P:]), ("bo1c", col(bo1)),
        ("wo2", Wo2), ("bo2c", col(bo2)),
        ("wo3", Wo3), ("bo3c", col(bo3)),
        ("bc1r", row(bc1)),
        ("wc2t", Wc2.T), ("bc2r", row(bc2)),
        ("wc3t", Wc3.T), ("bc3r", row(bc3)),
    ]
    # fc1 folded over the transposed (Do, N) object output: for each output
    # feature d, wc1_d[n, h] = Wc1[h, n*Do + d], so that
    #   n1 = sum_d oT[d, :] @ wc1_d
    # reproduces the row-major flatten O.view(-1, Do*N) @ Wc1.T exactly.
    for d in range(Do):
        entries.append(("wc1p%d" % d, Wc1[:, d::Do].T))        # (N, hidden)
    wslab, layout = _pack_weight_slab(entries)

    bf16 = jnp.bfloat16
    f32 = jnp.float32

    # ---- fused kernel --------------------------------------------------------
    def kernel(xblk_ref, rrs_ref, rrt_ref, wslab_ref, out_ref, n1_scr):
        def wget(name):
            off, r, c = layout[name]
            return wslab_ref[pl.ds(off, r), pl.ds(0, c)]

        # fr-chain weights in bf16 (MXU-native); cast once per grid step.
        w1_bf = wget("w1").astype(bf16)            # (H,  2P)
        w2_bf = wget("w2").astype(bf16)            # (H2, H)
        w3_bf = wget("w3").astype(bf16)            # (De, H2)
        b1c, b2c, b3c = wget("b1c"), wget("b2c"), wget("b3c")
        wo1x, wo1e, bo1c = wget("wo1x"), wget("wo1e"), wget("bo1c")
        wo2_, bo2c = wget("wo2"), wget("bo2c")
        wo3_, bo3c = wget("wo3"), wget("bo3c")
        bc1r = wget("bc1r")
        wc2t, bc2r = wget("wc2t"), wget("bc2r")
        wc3t, bc3r = wget("wc3t"), wget("bc3r")
        wc1p = [wget("wc1p%d" % d) for d in range(Do)]

        rrs_m = rrs_ref[...]                       # (KS, Nr) bf16, invariant
        rrt_m = rrt_ref[...]                       # (Nr, N)  bf16, invariant

        for b in range(TB):                        # small static unroll (TB=2)
            xblk_b = xblk_ref[b]                   # (2P, KS) f32
            xT_b = xblk_b[:P, :N]                  # (P, N)   f32

            # ---- fr edge MLP: the Nr edge axis lives on lanes ---------------
            g = jnp.dot(xblk_b.astype(bf16), rrs_m,
                        preferred_element_type=f32)                  # (2P, Nr)
            h = _relu(jnp.dot(w1_bf, g.astype(bf16),
                              preferred_element_type=f32) + b1c)     # (H,  Nr)
            h = _relu(jnp.dot(w2_bf, h.astype(bf16),
                              preferred_element_type=f32) + b2c)     # (H2, Nr)
            e = _relu(jnp.dot(w3_bf, h.astype(bf16),
                              preferred_element_type=f32) + b3c)     # (De, Nr)
            # scatter edge effects back onto receiver nodes (K = Nr reduction)
            ebarT = jnp.dot(e.astype(bf16), rrt_m,
                            preferred_element_type=f32)              # (De, N)

            # ---- fo node MLP (transposed, f32, tiny) ------------------------
            g1 = _selu(jnp.dot(wo1x, xT_b, preferred_element_type=f32)
                       + jnp.dot(wo1e, ebarT, preferred_element_type=f32)
                       + bo1c)                                       # (H,  N)
            g2 = _selu(jnp.dot(wo2_, g1, preferred_element_type=f32)
                       + bo2c)                                       # (H2, N)
            oT = _selu(jnp.dot(wo3_, g2, preferred_element_type=f32)
                       + bo3c)                                       # (Do, N)

            # ---- fc1 folded over oT (no (N,Do)->(N*Do) flatten needed) ------
            n1p = jnp.dot(oT[0:1, :], wc1p[0], preferred_element_type=f32)
            for d in range(1, Do):
                n1p = n1p + jnp.dot(oT[d:d + 1, :], wc1p[d],
                                    preferred_element_type=f32)
            n1_scr[pl.ds(b, 1), :] = n1p                             # (1, H)

        # ---- fc classifier, batched over the TB rows of this step -----------
        n1 = _selu(n1_scr[...] + bc1r)                               # (TB, H)
        n2 = _selu(jnp.dot(n1, wc2t, preferred_element_type=f32) + bc2r)
        out_ref[0] = jnp.dot(n2, wc3t, preferred_element_type=f32) + bc3r

    # ---- cost estimate -------------------------------------------------------
    flops_per_elem = 2 * (
        (2 * P) * KS * Nr                      # stacked edge gather
        + hidden * (2 * P) * Nr                # fr1
        + H2 * hidden * Nr                     # fr2
        + De * H2 * Nr                         # fr3
        + De * Nr * N                          # Ebar scatter
        + hidden * (P + De) * N                # fo1 (split)
        + H2 * hidden * N                      # fo2
        + Do * H2 * N                          # fo3
        + Do * N * hidden                      # fc1 fold
        + hidden * H2 + H2 * T)                # fc2, fc3
    transc_per_elem = N * (hidden + H2 + Do) + hidden + H2
    cost = pl.CostEstimate(
        flops=int(Bp * flops_per_elem),
        transcendentals=int(Bp * transc_per_elem),
        bytes_accessed=int(4 * (xblk.size + wslab.size + Bp * T)
                           + 2 * (rrs_bf.size + rrt_bf.size)),
    )

    out3 = pl.pallas_call(
        kernel,
        grid=(G,),
        in_specs=[
            pl.BlockSpec((TB, 2 * P, KS), lambda i: (i, 0, 0)),  # batch block
            pl.BlockSpec(rrs_bf.shape, lambda i: (0, 0)),        # [Rr;Rs] bf16
            pl.BlockSpec(rrt_bf.shape, lambda i: (0, 0)),        # Rr^T   bf16
            pl.BlockSpec(wslab.shape, lambda i: (0, 0)),         # packed weights
        ],
        out_specs=pl.BlockSpec((1, TB, T), lambda i: (i, 0, 0)),
        out_shape=jax.ShapeDtypeStruct((G, TB, T), jnp.float32),
        scratch_shapes=[pltpu.VMEM((TB, hidden), jnp.float32)],  # fc1 rows
        compiler_params=pltpu.CompilerParams(
            dimension_semantics=("parallel",)),
        cost_estimate=cost,
    )(xblk, rrs_bf, rrt_bf, wslab)

    return out3.reshape(Bp, T)[:B]


# ----------------------------- pure-JAX reference ---------------------------


def jedinet_forward_reference(x, params, Rr, Rs):
    B, P, N = x.shape
    Nr = N * (N - 1)
    De = params["fr3"][0].shape[0]
    Do = params["fo3"][0].shape[0]

    Orr = jnp.einsum("bpn,nr->bpr", x, Rr)
    Ors = jnp.einsum("bpn,nr->bpr", x, Rs)
    Bc = jnp.concatenate([Orr, Ors], axis=1)              # (B, 2P, Nr)
    Bt = jnp.transpose(Bc, (0, 2, 1)).reshape(-1, 2 * P)

    W1, b1 = params["fr1"]; W2, b2 = params["fr2"]; W3, b3 = params["fr3"]
    h = _relu(Bt @ W1.T + b1)
    h = _relu(h @ W2.T + b2)
    E = _relu(h @ W3.T + b3).reshape(B, Nr, De)
    E = jnp.transpose(E, (0, 2, 1))                       # (B, De, Nr)
    Ebar = jnp.einsum("ber,rn->ben", E, Rr.T)             # (B, De, N)
    C = jnp.concatenate([x, Ebar], axis=1)                # (B, P+De, N)
    Ct = jnp.transpose(C, (0, 2, 1)).reshape(-1, P + De)

    Wo1, bo1 = params["fo1"]; Wo2, bo2 = params["fo2"]; Wo3, bo3 = params["fo3"]
    g = _selu(Ct @ Wo1.T + bo1)
    g = _selu(g @ Wo2.T + bo2)
    O = _selu(g @ Wo3.T + bo3).reshape(B, N, Do)

    Wc1, bc1 = params["fc1"]; Wc2, bc2 = params["fc2"]; Wc3, bc3 = params["fc3"]
    n1 = _selu(O.reshape(B, N * Do) @ Wc1.T + bc1)
    n1 = _selu(n1 @ Wc2.T + bc2)
    return n1 @ Wc3.T + bc3


# ----------------------------- main ------------------------------------------

if __name__ == "__main__":
    # Module defaults: N=30, P=3, hidden=50, De=12, Do=6, T=5.
    # B=12 with batch_block=2 gives 6 grid steps (balances across the 2 TCs on
    # v7x) and exercises the multi-element batch block.
    Bsz, P, N = 12, 3, 30
    hidden, De, Do, n_targets = 50, 12, 6, 5

    key = jax.random.PRNGKey(0)
    kx, kp = jax.random.split(key)
    x = jax.random.normal(kx, (Bsz, P, N), dtype=jnp.float32)
    params = init_jedinet_params(kp, P=P, N=N, hidden=hidden, De=De, Do=Do,
                                 n_targets=n_targets)
    Rr, Rs = make_relation_matrices(N)

    out = jedinet_forward_pallas(x, params, Rr, Rs, batch_block=2)
    out = jax.block_until_ready(out)

    ref = jedinet_forward_reference(x, params, Rr, Rs)
    ref = jax.block_until_ready(ref)

    assert out.shape == (Bsz, n_targets)
    # The fr edge chain runs with bf16 MXU operands (f32 accumulation), so the
    # parity check is scale-relative rather than the old 2e-3 absolute bound.
    err = float(jnp.max(jnp.abs(out - ref)))
    scale = float(jnp.max(jnp.abs(ref)))
    assert err < 0.05 * max(1.0, scale), (
        "Pallas output mismatch vs reference: err=%g scale=%g" % (err, scale))

    print("KERNEL_OK")
</pallas_src>

<mosaic_0001>
module attributes {stable_mosaic.version = 11 : i64} {
  func.func @kernel(%arg0: i32, %arg1: memref<2x6x64xf32, #tpu.memory_space<vmem>>, %arg2: memref<64x870xbf16, #tpu.memory_space<vmem>>, %arg3: memref<870x30xbf16, #tpu.memory_space<vmem>>, %arg4: memref<760x50xf32, #tpu.memory_space<vmem>>, %arg5: memref<1x2x5xf32, #tpu.memory_space<vmem>>, %arg6: memref<2x50xf32, #tpu.memory_space<vmem>>) attributes {dimension_semantics = [#tpu.dimension_semantics<parallel>], iteration_bounds = array<i64: 6>, scalar_prefetch = 0 : i64, scratch_operands = 1 : i64, tpu.core_type = #tpu.core_type<tc>, window_params = [{transform_indices = @transform_0, window_bounds = array<i64: 2, 6, 64>}, {pipeline_mode = #tpu.pipeline_mode<synchronous>, transform_indices = @transform_1, window_bounds = array<i64: 64, 870>}, {pipeline_mode = #tpu.pipeline_mode<synchronous>, transform_indices = @transform_2, window_bounds = array<i64: 870, 30>}, {pipeline_mode = #tpu.pipeline_mode<synchronous>, transform_indices = @transform_3, window_bounds = array<i64: 760, 50>}, {transform_indices = @transform_4, window_bounds = array<i64: 1, 2, 5>}]} {
    %c0 = arith.constant 0 : index
    %c0_0 = arith.constant 0 : index
    %0 = vector.load %arg4[%c0, %c0_0] : memref<760x50xf32, #tpu.memory_space<vmem>>, vector<50x6xf32>
    %1 = arith.truncf %0 : vector<50x6xf32> to vector<50x6xbf16>
    %c112 = arith.constant 112 : index
    %c0_1 = arith.constant 0 : index
    %2 = vector.load %arg4[%c112, %c0_1] : memref<760x50xf32, #tpu.memory_space<vmem>>, vector<25x50xf32>
    %3 = arith.truncf %2 : vector<25x50xf32> to vector<25x50xbf16>
    %c176 = arith.constant 176 : index
    %c0_2 = arith.constant 0 : index
    %4 = vector.load %arg4[%c176, %c0_2] : memref<760x50xf32, #tpu.memory_space<vmem>>, vector<12x25xf32>
    %5 = arith.truncf %4 : vector<12x25xf32> to vector<12x25xbf16>
    %c56 = arith.constant 56 : index
    %c0_3 = arith.constant 0 : index
    %6 = vector.load %arg4[%c56, %c0_3] : memref<760x50xf32, #tpu.memory_space<vmem>>, vector<50x1xf32>
    %c144 = arith.constant 144 : index
    %c0_4 = arith.constant 0 : index
    %7 = vector.load %arg4[%c144, %c0_4] : memref<760x50xf32, #tpu.memory_space<vmem>>, vector<25x1xf32>
    %c192 = arith.constant 192 : index
    %c0_5 = arith.constant 0 : index
    %8 = vector.load %arg4[%c192, %c0_5] : memref<760x50xf32, #tpu.memory_space<vmem>>, vector<12x1xf32>
    %c208 = arith.constant 208 : index
    %c0_6 = arith.constant 0 : index
    %9 = vector.load %arg4[%c208, %c0_6] : memref<760x50xf32, #tpu.memory_space<vmem>>, vector<50x3xf32>
    %c264 = arith.constant 264 : index
    %c0_7 = arith.constant 0 : index
    %10 = vector.load %arg4[%c264, %c0_7] : memref<760x50xf32, #tpu.memory_space<vmem>>, vector<50x12xf32>
    %c320 = arith.constant 320 : index
    %c0_8 = arith.constant 0 : index
    %11 = vector.load %arg4[%c320, %c0_8] : memref<760x50xf32, #tpu.memory_space<vmem>>, vector<50x1xf32>
    %c376 = arith.constant 376 : index
    %c0_9 = arith.constant 0 : index
    %12 = vector.load %arg4[%c376, %c0_9] : memref<760x50xf32, #tpu.memory_space<vmem>>, vector<25x50xf32>
    %c408 = arith.constant 408 : index
    %c0_10 = arith.constant 0 : index
    %13 = vector.load %arg4[%c408, %c0_10] : memref<760x50xf32, #tpu.memory_space<vmem>>, vector<25x1xf32>
    %c440 = arith.constant 440 : index
    %c0_11 = arith.constant 0 : index
    %14 = vector.load %arg4[%c440, %c0_11] : memref<760x50xf32, #tpu.memory_space<vmem>>, vector<6x25xf32>
    %c448 = arith.constant 448 : index
    %c0_12 = arith.constant 0 : index
    %15 = vector.load %arg4[%c448, %c0_12] : memref<760x50xf32, #tpu.memory_space<vmem>>, vector<6x1xf32>
    %c456 = arith.constant 456 : index
    %c0_13 = arith.constant 0 : index
    %16 = vector.load %arg4[%c456, %c0_13] : memref<760x50xf32, #tpu.memory_space<vmem>>, vector<1x50xf32>
    %c464 = arith.constant 464 : index
    %c0_14 = arith.constant 0 : index
    %17 = vector.load %arg4[%c464, %c0_14] : memref<760x50xf32, #tpu.memory_space<vmem>>, vector<50x25xf32>
    %c520 = arith.constant 520 : index
    %c0_15 = arith.constant 0 : index
    %18 = vector.load %arg4[%c520, %c0_15] : memref<760x50xf32, #tpu.memory_space<vmem>>, vector<1x25xf32>
    %c528 = arith.constant 528 : index
    %c0_16 = arith.constant 0 : index
    %19 = vector.load %arg4[%c528, %c0_16] : memref<760x50xf32, #tpu.memory_space<vmem>>, vector<25x5xf32>
    %c560 = arith.constant 560 : index
    %c0_17 = arith.constant 0 : index
    %20 = vector.load %arg4[%c560, %c0_17] : memref<760x50xf32, #tpu.memory_space<vmem>>, vector<1x5xf32>
    %c568 = arith.constant 568 : index
    %c0_18 = arith.constant 0 : index
    %21 = vector.load %arg4[%c568, %c0_18] : memref<760x50xf32, #tpu.memory_space<vmem>>, vector<30x50xf32>
    %c600 = arith.constant 600 : index
    %c0_19 = arith.constant 0 : index
    %22 = vector.load %arg4[%c600, %c0_19] : memref<760x50xf32, #tpu.memory_space<vmem>>, vector<30x50xf32>
    %c632 = arith.constant 632 : index
    %c0_20 = arith.constant 0 : index
    %23 = vector.load %arg4[%c632, %c0_20] : memref<760x50xf32, #tpu.memory_space<vmem>>, vector<30x50xf32>
    %c664 = arith.constant 664 : index
    %c0_21 = arith.constant 0 : index
    %24 = vector.load %arg4[%c664, %c0_21] : memref<760x50xf32, #tpu.memory_space<vmem>>, vector<30x50xf32>
    %c696 = arith.constant 696 : index
    %c0_22 = arith.constant 0 : index
    %25 = vector.load %arg4[%c696, %c0_22] : memref<760x50xf32, #tpu.memory_space<vmem>>, vector<30x50xf32>
    %c728 = arith.constant 728 : index
    %c0_23 = arith.constant 0 : index
    %26 = vector.load %arg4[%c728, %c0_23] : memref<760x50xf32, #tpu.memory_space<vmem>>, vector<30x50xf32>
    %c0_24 = arith.constant 0 : index
    %c0_25 = arith.constant 0 : index
    %27 = vector.load %arg2[%c0_24, %c0_25] : memref<64x870xbf16, #tpu.memory_space<vmem>>, vector<64x870xbf16>
    %c0_26 = arith.constant 0 : index
    %c0_27 = arith.constant 0 : index
    %28 = vector.load %arg3[%c0_26, %c0_27] : memref<870x30xbf16, #tpu.memory_space<vmem>>, vector<870x30xbf16>
    %c0_28 = arith.constant 0 : index
    %c0_29 = arith.constant 0 : index
    %c0_30 = arith.constant 0 : index
    %29 = vector.load %arg1[%c0_28, %c0_29, %c0_30] : memref<2x6x64xf32, #tpu.memory_space<vmem>>, vector<1x6x64xf32>
    %30 = vector.shape_cast %29 : vector<1x6x64xf32> to vector<6x64xf32>
    %31 = vector.extract_strided_slice %30 {offsets = [0, 0], sizes = [3, 30], strides = [1, 1]} : vector<6x64xf32> to vector<3x30xf32>
    %32 = arith.truncf %30 : vector<6x64xf32> to vector<6x64xbf16>
    %cst = arith.constant dense<0.000000e+00> : vector<6x870xf32>
    %33 = tpu.matmul %32, %27, %cst {dimension_numbers = #tpu.dot_dimension_numbers<[1], [0], [0], [1], [0, 0, 1, 1], [], []>} : vector<6x64xbf16>, vector<64x870xbf16>, vector<6x870xf32> -> vector<6x870xf32>
    %34 = arith.truncf %33 : vector<6x870xf32> to vector<6x870xbf16>
    %cst_31 = arith.constant dense<0.000000e+00> : vector<50x870xf32>
    %35 = tpu.matmul %1, %34, %cst_31 {dimension_numbers = #tpu.dot_dimension_numbers<[1], [0], [0], [1], [0, 0, 1, 1], [], []>} : vector<50x6xbf16>, vector<6x870xbf16>, vector<50x870xf32> -> vector<50x870xf32>
    %36 = vector.broadcast %6 : vector<50x1xf32> to vector<50x870xf32>
    %37 = arith.addf %35, %36 : vector<50x870xf32>
    %cst_32 = arith.constant 0.000000e+00 : f32
    %38 = vector.broadcast %cst_32 : f32 to vector<50x870xf32>
    %39 = arith.maximumf %37, %38 : vector<50x870xf32>
    %40 = arith.truncf %39 : vector<50x870xf32> to vector<50x870xbf16>
    %cst_33 = arith.constant dense<0.000000e+00> : vector<25x870xf32>
    %41 = tpu.matmul %3, %40, %cst_33 {dimension_numbers = #tpu.dot_dimension_numbers<[1], [0], [0], [1], [0, 0, 1, 1], [], []>} : vector<25x50xbf16>, vector<50x870xbf16>, vector<25x870xf32> -> vector<25x870xf32>
    %42 = vector.broadcast %7 : vector<25x1xf32> to vector<25x870xf32>
    %43 = arith.addf %41, %42 : vector<25x870xf32>
    %cst_34 = arith.constant 0.000000e+00 : f32
    %44 = vector.broadcast %cst_34 : f32 to vector<25x870xf32>
    %45 = arith.maximumf %43, %44 : vector<25x870xf32>
    %46 = arith.truncf %45 : vector<25x870xf32> to vector<25x870xbf16>
    %cst_35 = arith.constant dense<0.000000e+00> : vector<12x870xf32>
    %47 = tpu.matmul %5, %46, %cst_35 {dimension_numbers = #tpu.dot_dimension_numbers<[1], [0], [0], [1], [0, 0, 1, 1], [], []>} : vector<12x25xbf16>, vector<25x870xbf16>, vector<12x870xf32> -> vector<12x870xf32>
    %48 = vector.broadcast %8 : vector<12x1xf32> to vector<12x870xf32>
    %49 = arith.addf %47, %48 : vector<12x870xf32>
    %cst_36 = arith.constant 0.000000e+00 : f32
    %50 = vector.broadcast %cst_36 : f32 to vector<12x870xf32>
    %51 = arith.maximumf %49, %50 : vector<12x870xf32>
    %52 = arith.truncf %51 : vector<12x870xf32> to vector<12x870xbf16>
    %cst_37 = arith.constant dense<0.000000e+00> : vector<12x30xf32>
    %53 = tpu.matmul %52, %28, %cst_37 {dimension_numbers = #tpu.dot_dimension_numbers<[1], [0], [0], [1], [0, 0, 1, 1], [], []>} : vector<12x870xbf16>, vector<870x30xbf16>, vector<12x30xf32> -> vector<12x30xf32>
    %cst_38 = arith.constant dense<0.000000e+00> : vector<50x30xf32>
    %54 = tpu.matmul %9, %31, %cst_38 {dimension_numbers = #tpu.dot_dimension_numbers<[1], [0], [0], [1], [0, 0, 1, 1], [], []>} : vector<50x3xf32>, vector<3x30xf32>, vector<50x30xf32> -> vector<50x30xf32>
    %cst_39 = arith.constant dense<0.000000e+00> : vector<50x30xf32>
    %55 = tpu.matmul %10, %53, %cst_39 {dimension_numbers = #tpu.dot_dimension_numbers<[1], [0], [0], [1], [0, 0, 1, 1], [], []>} : vector<50x12xf32>, vector<12x30xf32>, vector<50x30xf32> -> vector<50x30xf32>
    %56 = arith.addf %54, %55 : vector<50x30xf32>
    %57 = vector.broadcast %11 : vector<50x1xf32> to vector<50x30xf32>
    %58 = arith.addf %56, %57 : vector<50x30xf32>
    %cst_40 = arith.constant 0.000000e+00 : f32
    %59 = vector.broadcast %cst_40 : f32 to vector<50x30xf32>
    %60 = arith.maximumf %58, %59 : vector<50x30xf32>
    %cst_41 = arith.constant 0.000000e+00 : f32
    %61 = vector.broadcast %cst_41 : f32 to vector<50x30xf32>
    %62 = arith.minimumf %58, %61 : vector<50x30xf32>
    %63 = math.exp %62 : vector<50x30xf32>
    %cst_42 = arith.constant 1.000000e+00 : f32
    %64 = vector.broadcast %cst_42 : f32 to vector<50x30xf32>
    %65 = arith.subf %63, %64 : vector<50x30xf32>
    %cst_43 = arith.constant 1.67326319 : f32
    %66 = vector.broadcast %cst_43 : f32 to vector<50x30xf32>
    %67 = arith.mulf %66, %65 : vector<50x30xf32>
    %68 = arith.addf %60, %67 : vector<50x30xf32>
    %cst_44 = arith.constant 1.05070102 : f32
    %69 = vector.broadcast %cst_44 : f32 to vector<50x30xf32>
    %70 = arith.mulf %69, %68 : vector<50x30xf32>
    %cst_45 = arith.constant dense<0.000000e+00> : vector<25x30xf32>
    %71 = tpu.matmul %12, %70, %cst_45 {dimension_numbers = #tpu.dot_dimension_numbers<[1], [0], [0], [1], [0, 0, 1, 1], [], []>} : vector<25x50xf32>, vector<50x30xf32>, vector<25x30xf32> -> vector<25x30xf32>
    %72 = vector.broadcast %13 : vector<25x1xf32> to vector<25x30xf32>
    %73 = arith.addf %71, %72 : vector<25x30xf32>
    %cst_46 = arith.constant 0.000000e+00 : f32
    %74 = vector.broadcast %cst_46 : f32 to vector<25x30xf32>
    %75 = arith.maximumf %73, %74 : vector<25x30xf32>
    %cst_47 = arith.constant 0.000000e+00 : f32
    %76 = vector.broadcast %cst_47 : f32 to vector<25x30xf32>
    %77 = arith.minimumf %73, %76 : vector<25x30xf32>
    %78 = math.exp %77 : vector<25x30xf32>
    %cst_48 = arith.constant 1.000000e+00 : f32
    %79 = vector.broadcast %cst_48 : f32 to vector<25x30xf32>
    %80 = arith.subf %78, %79 : vector<25x30xf32>
    %cst_49 = arith.constant 1.67326319 : f32
    %81 = vector.broadcast %cst_49 : f32 to vector<25x30xf32>
    %82 = arith.mulf %81, %80 : vector<25x30xf32>
    %83 = arith.addf %75, %82 : vector<25x30xf32>
    %cst_50 = arith.constant 1.05070102 : f32
    %84 = vector.broadcast %cst_50 : f32 to vector<25x30xf32>
    %85 = arith.mulf %84, %83 : vector<25x30xf32>
    %cst_51 = arith.constant dense<0.000000e+00> : vector<6x30xf32>
    %86 = tpu.matmul %14, %85, %cst_51 {dimension_numbers = #tpu.dot_dimension_numbers<[1], [0], [0], [1], [0, 0, 1, 1], [], []>} : vector<6x25xf32>, vector<25x30xf32>, vector<6x30xf32> -> vector<6x30xf32>
    %87 = vector.broadcast %15 : vector<6x1xf32> to vector<6x30xf32>
    %88 = arith.addf %86, %87 : vector<6x30xf32>
    %cst_52 = arith.constant 0.000000e+00 : f32
    %89 = vector.broadcast %cst_52 : f32 to vector<6x30xf32>
    %90 = arith.maximumf %88, %89 : vector<6x30xf32>
    %cst_53 = arith.constant 0.000000e+00 : f32
    %91 = vector.broadcast %cst_53 : f32 to vector<6x30xf32>
    %92 = arith.minimumf %88, %91 : vector<6x30xf32>
    %93 = math.exp %92 : vector<6x30xf32>
    %cst_54 = arith.constant 1.000000e+00 : f32
    %94 = vector.broadcast %cst_54 : f32 to vector<6x30xf32>
    %95 = arith.subf %93, %94 : vector<6x30xf32>
    %cst_55 = arith.constant 1.67326319 : f32
    %96 = vector.broadcast %cst_55 : f32 to vector<6x30xf32>
    %97 = arith.mulf %96, %95 : vector<6x30xf32>
    %98 = arith.addf %90, %97 : vector<6x30xf32>
    %cst_56 = arith.constant 1.05070102 : f32
    %99 = vector.broadcast %cst_56 : f32 to vector<6x30xf32>
    %100 = arith.mulf %99, %98 : vector<6x30xf32>
    %101 = vector.extract_strided_slice %100 {offsets = [0, 0], sizes = [1, 30], strides = [1, 1]} : vector<6x30xf32> to vector<1x30xf32>
    %cst_57 = arith.constant dense<0.000000e+00> : vector<1x50xf32>
    %102 = tpu.matmul %101, %21, %cst_57 {dimension_numbers = #tpu.dot_dimension_numbers<[1], [0], [0], [1], [0, 0, 1, 1], [], []>} : vector<1x30xf32>, vector<30x50xf32>, vector<1x50xf32> -> vector<1x50xf32>
    %103 = vector.extract_strided_slice %100 {offsets = [1, 0], sizes = [1, 30], strides = [1, 1]} : vector<6x30xf32> to vector<1x30xf32>
    %cst_58 = arith.constant dense<0.000000e+00> : vector<1x50xf32>
    %104 = tpu.matmul %103, %22, %cst_58 {dimension_numbers = #tpu.dot_dimension_numbers<[1], [0], [0], [1], [0, 0, 1, 1], [], []>} : vector<1x30xf32>, vector<30x50xf32>, vector<1x50xf32> -> vector<1x50xf32>
    %105 = arith.addf %102, %104 : vector<1x50xf32>
    %106 = vector.extract_strided_slice %100 {offsets = [2, 0], sizes = [1, 30], strides = [1, 1]} : vector<6x30xf32> to vector<1x30xf32>
    %cst_59 = arith.constant dense<0.000000e+00> : vector<1x50xf32>
    %107 = tpu.matmul %106, %23, %cst_59 {dimension_numbers = #tpu.dot_dimension_numbers<[1], [0], [0], [1], [0, 0, 1, 1], [], []>} : vector<1x30xf32>, vector<30x50xf32>, vector<1x50xf32> -> vector<1x50xf32>
    %108 = arith.addf %105, %107 : vector<1x50xf32>
    %109 = vector.extract_strided_slice %100 {offsets = [3, 0], sizes = [1, 30], strides = [1, 1]} : vector<6x30xf32> to vector<1x30xf32>
    %cst_60 = arith.constant dense<0.000000e+00> : vector<1x50xf32>
    %110 = tpu.matmul %109, %24, %cst_60 {dimension_numbers = #tpu.dot_dimension_numbers<[1], [0], [0], [1], [0, 0, 1, 1], [], []>} : vector<1x30xf32>, vector<30x50xf32>, vector<1x50xf32> -> vector<1x50xf32>
    %111 = arith.addf %108, %110 : vector<1x50xf32>
    %112 = vector.extract_strided_slice %100 {offsets = [4, 0], sizes = [1, 30], strides = [1, 1]} : vector<6x30xf32> to vector<1x30xf32>
    %cst_61 = arith.constant dense<0.000000e+00> : vector<1x50xf32>
    %113 = tpu.matmul %112, %25, %cst_61 {dimension_numbers = #tpu.dot_dimension_numbers<[1], [0], [0], [1], [0, 0, 1, 1], [], []>} : vector<1x30xf32>, vector<30x50xf32>, vector<1x50xf32> -> vector<1x50xf32>
    %114 = arith.addf %111, %113 : vector<1x50xf32>
    %115 = vector.extract_strided_slice %100 {offsets = [5, 0], sizes = [1, 30], strides = [1, 1]} : vector<6x30xf32> to vector<1x30xf32>
    %cst_62 = arith.constant dense<0.000000e+00> : vector<1x50xf32>
    %116 = tpu.matmul %115, %26, %cst_62 {dimension_numbers = #tpu.dot_dimension_numbers<[1], [0], [0], [1], [0, 0, 1, 1], [], []>} : vector<1x30xf32>, vector<30x50xf32>, vector<1x50xf32> -> vector<1x50xf32>
    %117 = arith.addf %114, %116 : vector<1x50xf32>
    %c0_63 = arith.constant 0 : index
    %c0_64 = arith.constant 0 : index
    %118 = vector.load %arg6[%c0_63, %c0_64] : memref<2x50xf32, #tpu.memory_space<vmem>>, vector<1x50xf32>
    tpu.vector_store %arg6[%c0_63, %c0_64], %117 {strides = array<i32>} : memref<2x50xf32, #tpu.memory_space<vmem>>, vector<1x50xf32>,
    %c1 = arith.constant 1 : index
    %c0_65 = arith.constant 0 : index
    %c0_66 = arith.constant 0 : index
    %119 = vector.load %arg1[%c1, %c0_65, %c0_66] : memref<2x6x64xf32, #tpu.memory_space<vmem>>, vector<1x6x64xf32>
    %120 = vector.shape_cast %119 : vector<1x6x64xf32> to vector<6x64xf32>
    %121 = vector.extract_strided_slice %120 {offsets = [0, 0], sizes = [3, 30], strides = [1, 1]} : vector<6x64xf32> to vector<3x30xf32>
    %122 = arith.truncf %120 : vector<6x64xf32> to vector<6x64xbf16>
    %cst_67 = arith.constant dense<0.000000e+00> : vector<6x870xf32>
    %123 = tpu.matmul %122, %27, %cst_67 {dimension_numbers = #tpu.dot_dimension_numbers<[1], [0], [0], [1], [0, 0, 1, 1], [], []>} : vector<6x64xbf16>, vector<64x870xbf16>, vector<6x870xf32> -> vector<6x870xf32>
    %124 = arith.truncf %123 : vector<6x870xf32> to vector<6x870xbf16>
    %cst_68 = arith.constant dense<0.000000e+00> : vector<50x870xf32>
    %125 = tpu.matmul %1, %124, %cst_68 {dimension_numbers = #tpu.dot_dimension_numbers<[1], [0], [0], [1], [0, 0, 1, 1], [], []>} : vector<50x6xbf16>, vector<6x870xbf16>, vector<50x870xf32> -> vector<50x870xf32>
    %126 = vector.broadcast %6 : vector<50x1xf32> to vector<50x870xf32>
    %127 = arith.addf %125, %126 : vector<50x870xf32>
    %cst_69 = arith.constant 0.000000e+00 : f32
    %128 = vector.broadcast %cst_69 : f32 to vector<50x870xf32>
    %129 = arith.maximumf %127, %128 : vector<50x870xf32>
    %130 = arith.truncf %129 : vector<50x870xf32> to vector<50x870xbf16>
    %cst_70 = arith.constant dense<0.000000e+00> : vector<25x870xf32>
    %131 = tpu.matmul %3, %130, %cst_70 {dimension_numbers = #tpu.dot_dimension_numbers<[1], [0], [0], [1], [0, 0, 1, 1], [], []>} : vector<25x50xbf16>, vector<50x870xbf16>, vector<25x870xf32> -> vector<25x870xf32>
    %132 = vector.broadcast %7 : vector<25x1xf32> to vector<25x870xf32>
    %133 = arith.addf %131, %132 : vector<25x870xf32>
    %cst_71 = arith.constant 0.000000e+00 : f32
    %134 = vector.broadcast %cst_71 : f32 to vector<25x870xf32>
    %135 = arith.maximumf %133, %134 : vector<25x870xf32>
    %136 = arith.truncf %135 : vector<25x870xf32> to vector<25x870xbf16>
    %cst_72 = arith.constant dense<0.000000e+00> : vector<12x870xf32>
    %137 = tpu.matmul %5, %136, %cst_72 {dimension_numbers = #tpu.dot_dimension_numbers<[1], [0], [0], [1], [0, 0, 1, 1], [], []>} : vector<12x25xbf16>, vector<25x870xbf16>, vector<12x870xf32> -> vector<12x870xf32>
    %138 = vector.broadcast %8 : vector<12x1xf32> to vector<12x870xf32>
    %139 = arith.addf %137, %138 : vector<12x870xf32>
    %cst_73 = arith.constant 0.000000e+00 : f32
    %140 = vector.broadcast %cst_73 : f32 to vector<12x870xf32>
    %141 = arith.maximumf %139, %140 : vector<12x870xf32>
    %142 = arith.truncf %141 : vector<12x870xf32> to vector<12x870xbf16>
    %cst_74 = arith.constant dense<0.000000e+00> : vector<12x30xf32>
    %143 = tpu.matmul %142, %28, %cst_74 {dimension_numbers = #tpu.dot_dimension_numbers<[1], [0], [0], [1], [0, 0, 1, 1], [], []>} : vector<12x870xbf16>, vector<870x30xbf16>, vector<12x30xf32> -> vector<12x30xf32>
    %cst_75 = arith.constant dense<0.000000e+00> : vector<50x30xf32>
    %144 = tpu.matmul %9, %121, %cst_75 {dimension_numbers = #tpu.dot_dimension_numbers<[1], [0], [0], [1], [0, 0, 1, 1], [], []>} : vector<50x3xf32>, vector<3x30xf32>, vector<50x30xf32> -> vector<50x30xf32>
    %cst_76 = arith.constant dense<0.000000e+00> : vector<50x30xf32>
    %145 = tpu.matmul %10, %143, %cst_76 {dimension_numbers = #tpu.dot_dimension_numbers<[1], [0], [0], [1], [0, 0, 1, 1], [], []>} : vector<50x12xf32>, vector<12x30xf32>, vector<50x30xf32> -> vector<50x30xf32>
    %146 = arith.addf %144, %145 : vector<50x30xf32>
    %147 = vector.broadcast %11 : vector<50x1xf32> to vector<50x30xf32>
    %148 = arith.addf %146, %147 : vector<50x30xf32>
    %cst_77 = arith.constant 0.000000e+00 : f32
    %149 = vector.broadcast %cst_77 : f32 to vector<50x30xf32>
    %150 = arith.maximumf %148, %149 : vector<50x30xf32>
    %cst_78 = arith.constant 0.000000e+00 : f32
    %151 = vector.broadcast %cst_78 : f32 to vector<50x30xf32>
    %152 = arith.minimumf %148, %151 : vector<50x30xf32>
    %153 = math.exp %152 : vector<50x30xf32>
    %cst_79 = arith.constant 1.000000e+00 : f32
    %154 = vector.broadcast %cst_79 : f32 to vector<50x30xf32>
    %155 = arith.subf %153, %154 : vector<50x30xf32>
    %cst_80 = arith.constant 1.67326319 : f32
    %156 = vector.broadcast %cst_80 : f32 to vector<50x30xf32>
    %157 = arith.mulf %156, %155 : vector<50x30xf32>
    %158 = arith.addf %150, %157 : vector<50x30xf32>
    %cst_81 = arith.constant 1.05070102 : f32
    %159 = vector.broadcast %cst_81 : f32 to vector<50x30xf32>
    %160 = arith.mulf %159, %158 : vector<50x30xf32>
    %cst_82 = arith.constant dense<0.000000e+00> : vector<25x30xf32>
    %161 = tpu.matmul %12, %160, %cst_82 {dimension_numbers = #tpu.dot_dimension_numbers<[1], [0], [0], [1], [0, 0, 1, 1], [], []>} : vector<25x50xf32>, vector<50x30xf32>, vector<25x30xf32> -> vector<25x30xf32>
    %162 = vector.broadcast %13 : vector<25x1xf32> to vector<25x30xf32>
    %163 = arith.addf %161, %162 : vector<25x30xf32>
    %cst_83 = arith.constant 0.000000e+00 : f32
    %164 = vector.broadcast %cst_83 : f32 to vector<25x30xf32>
    %165 = arith.maximumf %163, %164 : vector<25x30xf32>
    %cst_84 = arith.constant 0.000000e+00 : f32
    %166 = vector.broadcast %cst_84 : f32 to vector<25x30xf32>
    %167 = arith.minimumf %163, %166 : vector<25x30xf32>
    %168 = math.exp %167 : vector<25x30xf32>
    %cst_85 = arith.constant 1.000000e+00 : f32
    %169 = vector.broadcast %cst_85 : f32 to vector<25x30xf32>
    %170 = arith.subf %168, %169 : vector<25x30xf32>
    %cst_86 = arith.constant 1.67326319 : f32
    %171 = vector.broadcast %cst_86 : f32 to vector<25x30xf32>
    %172 = arith.mulf %171, %170 : vector<25x30xf32>
    %173 = arith.addf %165, %172 : vector<25x30xf32>
    %cst_87 = arith.constant 1.05070102 : f32
    %174 = vector.broadcast %cst_87 : f32 to vector<25x30xf32>
    %175 = arith.mulf %174, %173 : vector<25x30xf32>
    %cst_88 = arith.constant dense<0.000000e+00> : vector<6x30xf32>
    %176 = tpu.matmul %14, %175, %cst_88 {dimension_numbers = #tpu.dot_dimension_numbers<[1], [0], [0], [1], [0, 0, 1, 1], [], []>} : vector<6x25xf32>, vector<25x30xf32>, vector<6x30xf32> -> vector<6x30xf32>
    %177 = vector.broadcast %15 : vector<6x1xf32> to vector<6x30xf32>
    %178 = arith.addf %176, %177 : vector<6x30xf32>
    %cst_89 = arith.constant 0.000000e+00 : f32
    %179 = vector.broadcast %cst_89 : f32 to vector<6x30xf32>
    %180 = arith.maximumf %178, %179 : vector<6x30xf32>
    %cst_90 = arith.constant 0.000000e+00 : f32
    %181 = vector.broadcast %cst_90 : f32 to vector<6x30xf32>
    %182 = arith.minimumf %178, %181 : vector<6x30xf32>
    %183 = math.exp %182 : vector<6x30xf32>
    %cst_91 = arith.constant 1.000000e+00 : f32
    %184 = vector.broadcast %cst_91 : f32 to vector<6x30xf32>
    %185 = arith.subf %183, %184 : vector<6x30xf32>
    %cst_92 = arith.constant 1.67326319 : f32
    %186 = vector.broadcast %cst_92 : f32 to vector<6x30xf32>
    %187 = arith.mulf %186, %185 : vector<6x30xf32>
    %188 = arith.addf %180, %187 : vector<6x30xf32>
    %cst_93 = arith.constant 1.05070102 : f32
    %189 = vector.broadcast %cst_93 : f32 to vector<6x30xf32>
    %190 = arith.mulf %189, %188 : vector<6x30xf32>
    %191 = vector.extract_strided_slice %190 {offsets = [0, 0], sizes = [1, 30], strides = [1, 1]} : vector<6x30xf32> to vector<1x30xf32>
    %cst_94 = arith.constant dense<0.000000e+00> : vector<1x50xf32>
    %192 = tpu.matmul %191, %21, %cst_94 {dimension_numbers = #tpu.dot_dimension_numbers<[1], [0], [0], [1], [0, 0, 1, 1], [], []>} : vector<1x30xf32>, vector<30x50xf32>, vector<1x50xf32> -> vector<1x50xf32>
    %193 = vector.extract_strided_slice %190 {offsets = [1, 0], sizes = [1, 30], strides = [1, 1]} : vector<6x30xf32> to vector<1x30xf32>
    %cst_95 = arith.constant dense<0.000000e+00> : vector<1x50xf32>
    %194 = tpu.matmul %193, %22, %cst_95 {dimension_numbers = #tpu.dot_dimension_numbers<[1], [0], [0], [1], [0, 0, 1, 1], [], []>} : vector<1x30xf32>, vector<30x50xf32>, vector<1x50xf32> -> vector<1x50xf32>
    %195 = arith.addf %192, %194 : vector<1x50xf32>
    %196 = vector.extract_strided_slice %190 {offsets = [2, 0], sizes = [1, 30], strides = [1, 1]} : vector<6x30xf32> to vector<1x30xf32>
    %cst_96 = arith.constant dense<0.000000e+00> : vector<1x50xf32>
    %197 = tpu.matmul %196, %23, %cst_96 {dimension_numbers = #tpu.dot_dimension_numbers<[1], [0], [0], [1], [0, 0, 1, 1], [], []>} : vector<1x30xf32>, vector<30x50xf32>, vector<1x50xf32> -> vector<1x50xf32>
    %198 = arith.addf %195, %197 : vector<1x50xf32>
    %199 = vector.extract_strided_slice %190 {offsets = [3, 0], sizes = [1, 30], strides = [1, 1]} : vector<6x30xf32> to vector<1x30xf32>
    %cst_97 = arith.constant dense<0.000000e+00> : vector<1x50xf32>
    %200 = tpu.matmul %199, %24, %cst_97 {dimension_numbers = #tpu.dot_dimension_numbers<[1], [0], [0], [1], [0, 0, 1, 1], [], []>} : vector<1x30xf32>, vector<30x50xf32>, vector<1x50xf32> -> vector<1x50xf32>
    %201 = arith.addf %198, %200 : vector<1x50xf32>
    %202 = vector.extract_strided_slice %190 {offsets = [4, 0], sizes = [1, 30], strides = [1, 1]} : vector<6x30xf32> to vector<1x30xf32>
    %cst_98 = arith.constant dense<0.000000e+00> : vector<1x50xf32>
    %203 = tpu.matmul %202, %25, %cst_98 {dimension_numbers = #tpu.dot_dimension_numbers<[1], [0], [0], [1], [0, 0, 1, 1], [], []>} : vector<1x30xf32>, vector<30x50xf32>, vector<1x50xf32> -> vector<1x50xf32>
    %204 = arith.addf %201, %203 : vector<1x50xf32>
    %205 = vector.extract_strided_slice %190 {offsets = [5, 0], sizes = [1, 30], strides = [1, 1]} : vector<6x30xf32> to vector<1x30xf32>
    %cst_99 = arith.constant dense<0.000000e+00> : vector<1x50xf32>
    %206 = tpu.matmul %205, %26, %cst_99 {dimension_numbers = #tpu.dot_dimension_numbers<[1], [0], [0], [1], [0, 0, 1, 1], [], []>} : vector<1x30xf32>, vector<30x50xf32>, vector<1x50xf32> -> vector<1x50xf32>
    %207 = arith.addf %204, %206 : vector<1x50xf32>
    %c1_100 = arith.constant 1 : index
    %c0_101 = arith.constant 0 : index
    %208 = vector.load %arg6[%c1_100, %c0_101] : memref<2x50xf32, #tpu.memory_space<vmem>>, vector<1x50xf32>
    tpu.vector_store %arg6[%c1_100, %c0_101], %207 {strides = array<i32>} : memref<2x50xf32, #tpu.memory_space<vmem>>, vector<1x50xf32>,
    %c0_102 = arith.constant 0 : index
    %c0_103 = arith.constant 0 : index
    %209 = vector.load %arg6[%c0_102, %c0_103] : memref<2x50xf32, #tpu.memory_space<vmem>>, vector<2x50xf32>
    %210 = vector.broadcast %16 : vector<1x50xf32> to vector<2x50xf32>
    %211 = arith.addf %209, %210 : vector<2x50xf32>
    %cst_104 = arith.constant 0.000000e+00 : f32
    %212 = vector.broadcast %cst_104 : f32 to vector<2x50xf32>
    %213 = arith.maximumf %211, %212 : vector<2x50xf32>
    %cst_105 = arith.constant 0.000000e+00 : f32
    %214 = vector.broadcast %cst_105 : f32 to vector<2x50xf32>
    %215 = arith.minimumf %211, %214 : vector<2x50xf32>
    %216 = math.exp %215 : vector<2x50xf32>
    %cst_106 = arith.constant 1.000000e+00 : f32
    %217 = vector.broadcast %cst_106 : f32 to vector<2x50xf32>
    %218 = arith.subf %216, %217 : vector<2x50xf32>
    %cst_107 = arith.constant 1.67326319 : f32
    %219 = vector.broadcast %cst_107 : f32 to vector<2x50xf32>
    %220 = arith.mulf %219, %218 : vector<2x50xf32>
    %221 = arith.addf %213, %220 : vector<2x50xf32>
    %cst_108 = arith.constant 1.05070102 : f32
    %222 = vector.broadcast %cst_108 : f32 to vector<2x50xf32>
    %223 = arith.mulf %222, %221 : vector<2x50xf32>
    %cst_109 = arith.constant dense<0.000000e+00> : vector<2x25xf32>
    %224 = tpu.matmul %223, %17, %cst_109 {dimension_numbers = #tpu.dot_dimension_numbers<[1], [0], [0], [1], [0, 0, 1, 1], [], []>} : vector<2x50xf32>, vector<50x25xf32>, vector<2x25xf32> -> vector<2x25xf32>
    %225 = vector.broadcast %18 : vector<1x25xf32> to vector<2x25xf32>
    %226 = arith.addf %224, %225 : vector<2x25xf32>
    %cst_110 = arith.constant 0.000000e+00 : f32
    %227 = vector.broadcast %cst_110 : f32 to vector<2x25xf32>
    %228 = arith.maximumf %226, %227 : vector<2x25xf32>
    %cst_111 = arith.constant 0.000000e+00 : f32
    %229 = vector.broadcast %cst_111 : f32 to vector<2x25xf32>
    %230 = arith.minimumf %226, %229 : vector<2x25xf32>
    %231 = math.exp %230 : vector<2x25xf32>
    %cst_112 = arith.constant 1.000000e+00 : f32
    %232 = vector.broadcast %cst_112 : f32 to vector<2x25xf32>
    %233 = arith.subf %231, %232 : vector<2x25xf32>
    %cst_113 = arith.constant 1.67326319 : f32
    %234 = vector.broadcast %cst_113 : f32 to vector<2x25xf32>
    %235 = arith.mulf %234, %233 : vector<2x25xf32>
    %236 = arith.addf %228, %235 : vector<2x25xf32>
    %cst_114 = arith.constant 1.05070102 : f32
    %237 = vector.broadcast %cst_114 : f32 to vector<2x25xf32>
    %238 = arith.mulf %237, %236 : vector<2x25xf32>
    %cst_115 = arith.constant dense<0.000000e+00> : vector<2x5xf32>
    %239 = tpu.matmul %238, %19, %cst_115 {dimension_numbers = #tpu.dot_dimension_numbers<[1], [0], [0], [1], [0, 0, 1, 1], [], []>} : vector<2x25xf32>, vector<25x5xf32>, vector<2x5xf32> -> vector<2x5xf32>
    %240 = vector.broadcast %20 : vector<1x5xf32> to vector<2x5xf32>
    %241 = arith.addf %239, %240 : vector<2x5xf32>
    %c0_116 = arith.constant 0 : index
    %c0_117 = arith.constant 0 : index
    %c0_118 = arith.constant 0 : index
    %242 = vector.load %arg5[%c0_116, %c0_117, %c0_118] : memref<1x2x5xf32, #tpu.memory_space<vmem>>, vector<1x2x5xf32>
    %243 = vector.shape_cast %242 : vector<1x2x5xf32> to vector<2x5xf32>
    %244 = vector.shape_cast %241 : vector<2x5xf32> to vector<1x2x5xf32>
    tpu.vector_store %arg5[%c0_116, %c0_117, %c0_118], %244 {strides = array<i32>} : memref<1x2x5xf32, #tpu.memory_space<vmem>>, vector<1x2x5xf32>,
    return
  }
  func.func @transform_0(%arg0: i32) -> (i32, i32, i32) {
    %c0_i32 = arith.constant 0 : i32
    %c0_i32_0 = arith.constant 0 : i32
    %c0_i32_1 = arith.constant 0 : i32
    return %arg0, %c0_i32, %c0_i32_0 : i32, i32, i32
  }
  func.func @transform_1(%arg0: i32) -> (i32, i32) {
    %c0_i32 = arith.constant 0 : i32
    %c0_i32_0 = arith.constant 0 : i32
    %c0_i32_1 = arith.constant 0 : i32
    return %c0_i32, %c0_i32_0 : i32, i32
  }
  func.func @transform_2(%arg0: i32) -> (i32, i32) {
    %c0_i32 = arith.constant 0 : i32
    %c0_i32_0 = arith.constant 0 : i32
    %c0_i32_1 = arith.constant 0 : i32
    return %c0_i32, %c0_i32_0 : i32, i32
  }
  func.func @transform_3(%arg0: i32) -> (i32, i32) {
    %c0_i32 = arith.constant 0 : i32
    %c0_i32_0 = arith.constant 0 : i32
    %c0_i32_1 = arith.constant 0 : i32
    return %c0_i32, %c0_i32_0 : i32, i32
  }
  func.func @transform_4(%arg0: i32) -> (i32, i32, i32) {
    %c0_i32 = arith.constant 0 : i32
    %c0_i32_0 = arith.constant 0 : i32
    %c0_i32_1 = arith.constant 0 : i32
    return %arg0, %c0_i32, %c0_i32_0 : i32, i32, i32
  }
}

</mosaic_0001>

<bundles_post_ra>
// kernel: tpu_custom_call.1
= control target key start
LH: loop header
LB: loop body
LE: loop exit
PB: predicated region body
PF: predicated region fallthrough
CT: control target
= control target key end

     0   :  { %s6985_s15 = smov 0   ;;  %s8872_s0 = inlined_call_operand.vmem [shape: f32[12,6,64], index: 0, kind: input, shape index: {}]   ;;  %s8873_s1 = inlined_call_operand.vmem [shape: bf16[64,870], index: 1, kind: input, shape index: {}]   ;;  %s8874_s2 = inlined_call_operand.vmem [shape: bf16[870,30], index: 2, kind: input, shape index: {}]   ;;  %s8875_s3 = inlined_call_operand.vmem [shape: f32[760,50], index: 3, kind: input, shape index: {}]   ;;  %s8876_s4 = inlined_call_operand.vmem [shape: f32[6,2,5], index: 4, kind: output, shape index: {}]  }
   0x1 LB: > { %s6991_s16 = sadd.s32 4294967295, %s6954_s15   ;;  %p5622_p0 = scmp.ge.s32.totalorder %s6954_s15, 1  ;;  %s6954_s15 = sphi %s6985_s15, %s14_s15  }
   0x2   : > { %p163_p1 = scmp.lt.s32.totalorder %s6954_s15, 7 }
   0x4   : > { %p164_p2 = pnand %p5622_p0, %p163_p1 }
   0x6   : > { %167 = sbr.rel (%p164_p2) target bundleno = 4387 (0x1123), region = 36 }
   0xb   : > { %v6674_v0 = vld [vmem:[%s8873_s1 + $0xac] ss:$28 sps:$4 sm:$0xff]   ;;  %s5623_s19 = sshll.u32 %s6991_s16, 1  ;;  %v6676_v1 = vld [vmem:[%s8873_s1 + $0xb4] ss:$28 sps:$4 sm:$0xff]   ;;  %v8879_v2 = vmov 0  }
   0xc   : > { %624 = vmatprep.mubr.bf16.mxu0 %v8879_v2  ;;  %665 = vmatprep.mubr.bf16.mxu1 %v8879_v2  ;;  %p189_p3 = scmp.lt.s32.totalorder %s5623_s19, 11  ;;  %v6678_v3 = vld [vmem:[%s8873_s1 + $0xa8] ss:$28 sps:$4 sm:$0xff]   ;;  %v6679_v4 = vld [vmem:[%s8873_s1 + $0xb0] ss:$28 sps:$4 sm:$0xff]   ;;  %vm588_vm0 = vcmask 523264  }
   0xd   : > { %600 = vmatprep.subr.bf16.mxu0 %v6674_v0  ;;  %6672 = vset.pattern.permute.xlu0 %v8879_v2  ;;  %v6680_v5 = vld [vmem:[%s8873_s1 + $0x74] ss:$28 sps:$4 sm:$0xff]   ;;  %v6682_v6 = vld [vmem:[%s8873_s1 + $0x7c] ss:$28 sps:$4 sm:$0xff]   ;;  %v6688_v10 = vld [vmem:[%s8873_s1 + $0x44] ss:$28 sps:$4 sm:$0xff]  }
   0xe   : > { %641 = vmatprep.subr.bf16.mxu1 %v6676_v1  ;;  %s8914_s19 = smov (!%p189_p3, %s5623_s19), 11  ;;  %6673 = vset.pattern.permute.xlu1 %v8879_v2  ;;  %v6684_v7 = vld [vmem:[%s8873_s1 + $0x70] ss:$28 sps:$4 sm:$0xff]   ;;  %v6685_v8 = vld [vmem:[%s8873_s1 + $0x78] ss:$28 sps:$4 sm:$0xff]   ;;  %v8877_v22 = vmov 0.0  }
   0xf   : > { %601 = vmatpush1.bf16.msra.mxu0 %v6678_v3  ;;  %642 = vmatpush1.bf16.msra.mxu1 %v6679_v4  ;;  %v6686_v9 = vld [vmem:[%s8873_s1 + $0x3c] ss:$28 sps:$4 sm:$0xff]   ;;  %s5624_s10 = sshll.u32 %s8914_s19, 3  ;;  %v6692_v13 = vld [vmem:[%s8873_s1 + $0x4] ss:$28 sps:$4 sm:$0xff]   ;;  %vm6958_vm1 = vmmov 0  }
  0x10   : > { %602 = vmatprep.subr.bf16.mxu0 %v6680_v5  ;;  %643 = vmatprep.subr.bf16.mxu1 %v6682_v6  ;;  %v6690_v11 = vld [vmem:[%s8873_s1 + $0x38] ss:$28 sps:$4 sm:$0xff]   ;;  %v6691_v12 = vld [vmem:[%s8873_s1 + $0x40] ss:$28 sps:$4 sm:$0xff]   ;;  %v6694_v14 = vld [vmem:[%s8873_s1 + $0xc] ss:$28 sps:$4 sm:$0xff]   ;;  %s7045_s25 = scalar_lea.vmem %s8872_s0, %s5624_s10 }
  0x11   : > { %v6696_v15 = vld [vmem:[%s8873_s1] ss:$28 sps:$4 sm:$0xff]   ;;  %v6697_v16 = vld [vmem:[%s8873_s1 + $0x8] ss:$28 sps:$4 sm:$0xff]   ;;  %v6698_v20 = vld [vmem:[%s8873_s1 + $0xb8] ss:$28 sps:$4 sm:$0xff]  }
  0x12   : > { %v442_v17 = vld [vmem:[%s7045_s25] sm:$0x3f]  ;;  %v6700_v18 = vld [vmem:[%s8873_s1 + $0xbc] ss:$28 sps:$4 sm:$0xff]   ;;  %v6706_v25 = vld [vmem:[%s8873_s1 + $0x4c] ss:$28 sps:$4 sm:$0xff]  }
  0x13   : > { %603 = vmatpush1.bf16.msra.mxu0 %v6684_v7  ;;  %644 = vmatpush1.bf16.msra.mxu1 %v6685_v8  ;;  %v443_v19 = vpack.c.bf16 %v442_v17, %v442_v17  ;;  %v6703_v21 = vld [vmem:[%s8873_s1 + $0x84] ss:$28 sps:$4 sm:$0xff]   ;;  %v6709_v28 = vld [vmem:[%s8873_s1 + $0x14] ss:$28 sps:$4 sm:$0xff]   ;;  %v225_v32 = vld [vmem:[%s8875_s3 + $0x68] sm:$0x3] }
  0x14   : > { %604 = vmatprep.subr.bf16.mxu0 %v6686_v9  ;;  %645 = vmatprep.subr.bf16.mxu1 %v6688_v10  ;;  %v6710_v23 = vld [vmem:[%s8873_s1 + $0xc0] ss:$28 sps:$4 sm:$0xff]   ;;  %v6711_v26 = vld [vmem:[%s8873_s1 + $0x88] ss:$28 sps:$4 sm:$0xff]   ;;  %v6712_v29 = vld [vmem:[%s8873_s1 + $0x50] ss:$28 sps:$4 sm:$0xff]  }
  0x15   : > { %v6701_v24 = vld [vmem:[%s8873_s1 + $0x80] ss:$28 sps:$4 sm:$0xff]   ;;  %v6704_v27 = vld [vmem:[%s8873_s1 + $0x48] ss:$28 sps:$4 sm:$0xff]   ;;  %v6707_v30 = vld [vmem:[%s8873_s1 + $0x10] ss:$28 sps:$4 sm:$0xff]   ;;  %794 = vperm.xlu0 %6672, %v225_v32  }
  0x16   : > { %v6713_v31 = vld [vmem:[%s8873_s1 + $0x18] ss:$28 sps:$4 sm:$0xff]   ;;  %v224_v34 = vld [vmem:[%s8875_s3 + $0x60] sm:$0xff]  ;;  %v221_v36 = vld [vmem:[%s8875_s3 + $0x48] sm:$0xff]  ;;  %vm810_vm2 = vcmask 1042432   ;;  %vm797_vm3 = vcmask 48128  }
  0x17   : > { %605 = vmatpush1.bf16.msra.mxu0 %v6690_v11  ;;  %646 = vmatpush1.bf16.msra.mxu1 %v6691_v12  ;;  %v223_v33 = vld [vmem:[%s8875_s3 + $0x58] sm:$0xff]  ;;  %v222_v35 = vld [vmem:[%s8875_s3 + $0x50] sm:$0xff]  ;;  %v220_v37 = vld [vmem:[%s8875_s3 + $0x40] sm:$0xff]  ;;  %vm1213_vm4 = vcmask 1040384   ;;  %vm1206_vm5 = vcmask 408576   ;;  %vm1499_vm6 = vcmask 1043456  }
  0x18   : > { %606 = vmatprep.subr.bf16.mxu0 %v6692_v13  ;;  %647 = vmatprep.subr.bf16.mxu1 %v6694_v14  ;;  %v229_v38 = vld [vmem:[%s8875_s3 + $0xa8] sm:$0x1]  ;;  %v219_v39 = vld [vmem:[%s8875_s3 + $0x38] sm:$0xff]  ;;  %v228_v41 = vld [vmem:[%s8875_s3 + $0xa0] sm:$0xff]  ;;  %vm1500_vm7 = vcmask 1044480   ;;  %vm1495_vm8 = vcmask 203776  }
  0x19   : > { %784 = vperm.xlu0 %6672, %v223_v33   ;;  %789 = vperm.xlu1 %6673, %v224_v34   ;;  %v227_v40 = vld [vmem:[%s8875_s3 + $0x98] sm:$0xff]  ;;  %v231_v42 = vld [vmem:[%s8875_s3 + $0xc8] sm:$0xf]  ;;  %v226_v43 = vld [vmem:[%s8875_s3 + $0x90] sm:$0xff]  ;;  %vm2042_vm9 = vcmask 834560   ;;  %vm2338_vm10 = vcmask 23552  }
  0x1a   : > { %v251_v44 = vld [vmem:[%s8875_s3 + $0x168] sm:$0xff]  ;;  %v230_v45 = vld [vmem:[%s8875_s3 + $0xc0] sm:$0xff]  ;;  %v249_v46 = vld [vmem:[%s8875_s3 + $0x158] sm:$0xff]  ;;  %vm2213_vm11 = vcmask 97280   ;;  %vm2593_vm12 = vcmask 1041408   ;;  %vm2808_vm13 = vcmask 1045504  }
  0x1b   : > { %607 = vmatpush1.bf16.msra.mxu0 %v6696_v15  ;;  %648 = vmatpush1.bf16.msra.mxu1 %v6697_v16  ;;  %v252_v47 = vld [vmem:[%s8875_s3 + $0x170] sm:$0x3]  ;;  %v247_v48 = vld [vmem:[%s8875_s3 + $0x148] sm:$0xff]  ;;  %v250_v49 = vld [vmem:[%s8875_s3 + $0x160] sm:$0xff]  ;;  %vm2805_vm14 = vcmask 244736   ;;  %vm3265_vm15 = vcmask 401408  }
  0x1c   : > { %682 = vmatprep.subr.bf16.mxu0 %v6700_v18  ;;  %6218 = vmatprep.subr.bf16.mxu1 %v8877_v22  ;;  %v260_v50 = vld [vmem:[%s8875_s3 + $0x1b0] sm:$0x1]  ;;  %v258_v52 = vld [vmem:[%s8875_s3 + $0x1a0] sm:$0xff]  ;;  %v259_v55 = vld [vmem:[%s8875_s3 + $0x1a8] sm:$0xff]  ;;  %p194_p4 = scmp.lt.s32.totalorder %s6991_s16, 5 }
  0x1d   : > { %779 = vperm.xlu0 %6672, %v222_v35   ;;  %774 = vperm.xlu1 %6673, %v221_v36   ;;  %v248_v51 = vld [vmem:[%s8875_s3 + $0x150] sm:$0xff]  ;;  %v246_v53 = vld [vmem:[%s8875_s3 + $0x140] sm:$0xff]  ;;  %v257_v56 = vld [vmem:[%s8875_s3 + $0x198] sm:$0xff] }
  0x1e   : > { %5654 = vmatmul.mubr.msk.bf16.vlgmr.msra.gmra.mxu0 %vm588_vm0, %v443_v19  ;;  %5655 = vmatmul.mubr.msk.bf16.vlgmr.msra.gmra.mxu1 %vm588_vm0, %v443_v19  ;;  %v262_v54 = vld [vmem:[%s8875_s3 + $0x1c0] sm:$0x3f]  ;;  %v200_v0 = vld [vmem:[%s8875_s3 + $0x8] sm:$0xff]  ;;  %v201_v11 = vld [vmem:[%s8875_s3 + $0x10] sm:$0xff]  ;;  %s8916_s16 = smov (!%p194_p4, %s6991_s16), 5 }
  0x1f   : > { %683 = vmatpush1.bf16.msra.mxu0 %v6698_v20  ;;  %706 = vmatprep.mubr.bf16.mxu0 %v8879_v2  ;;  %v199_v63 = vld [vmem:[%s8875_s3] sm:$0xff]  ;;  %v202_v12 = vld [vmem:[%s8875_s3 + $0x18] sm:$0xff]  ;;  %s5625_s19 = sshll.u32 %s8916_s16, 1 }
  0x20   : > { %684 = vmatprep.subr.bf16.mxu0 %v6703_v21  ;;  %6219 = vmatpush3.bf16.msra.mxu1 %v6710_v23  ;;  %v7188_v8 = vpack.c.bf16 %v200_v0, %v199_v63  ;;  %v7202_v13 = vpack.c.bf16 %v202_v12, %v201_v11  ;;  %v203_v18 = vld [vmem:[%s8875_s3 + $0x20] sm:$0xff]  ;;  %s197_s27 = scalar_lea.vmem %s8876_s4, %s5625_s19 }
  0x21   : > { %6220 = vmatprep.subr.bf16.mxu1 %v8877_v22  ;;  %6226 = vmatprep.mubr.msk.bf16.mxu1 %vm6958_vm1, %v8877_v22 }
  0x22   : > { %769 = vperm.xlu0 %6672, %v220_v37   ;;  %764 = vperm.xlu1 %6673, %v219_v39  }
  0x23   : > { %685 = vmatpush1.bf16.msra.mxu0 %v6701_v24 }
  0x24   : > { %686 = vmatprep.subr.bf16.mxu0 %v6706_v25  ;;  %6221 = vmatpush3.bf16.msra.mxu1 %v6711_v26 }
  0x25   : > { %6222 = vmatprep.subr.bf16.mxu1 %v8877_v22 }
  0x26   : > { %1203 = vperm.xlu0 %6672, %v229_v38   ;;  %1198 = vperm.xlu1 %6673, %v228_v41  }
  0x27   : > { %687 = vmatpush1.bf16.msra.mxu0 %v6704_v27 }
  0x28   : > { %688 = vmatprep.subr.bf16.mxu0 %v6709_v28  ;;  %6223 = vmatpush3.bf16.msra.mxu1 %v6712_v29 }
  0x29   : > { %6224 = vmatprep.subr.bf16.mxu1 %v8877_v22 }
  0x2a   : > { %1193 = vperm.xlu0 %6672, %v227_v40   ;;  %1188 = vperm.xlu1 %6673, %v226_v43  }
  0x2b   : > { %689 = vmatpush1.bf16.msra.mxu0 %v6707_v30 }
  0x2c   : > { %6225 = vmatpush3.bf16.msra.mxu1 %v6713_v31  ;;  %v205_v31 = vld [vmem:[%s8875_s3 + $0x30] sm:$0x3] }
  0x2d   : > { %v7231_v32 = vpack.c.bf16 %v205_v31, %v205_v31 }
  0x2e   : > { %5656 = vmatmul.mubr.msk.bf16.vlgmr.msra.gmra.mxu0 %vm588_vm0, %v443_v19  ;;  %1492 = vperm.xlu0 %6672, %v231_v42  }
  0x2f   : > { %6227 = vmatmul.mubr.msk.bf16.vlgmr.msra.gmra.mxu1 %vm588_vm0, %v443_v19  ;;  %864 = vmatprep.mubr.bf16.mxu0 %v8879_v2  ;;  %v204_v19 = vld [vmem:[%s8875_s3 + $0x28] sm:$0xff] }
  0x30   : > { %935 = vmatprep.mubr.bf16.mxu1 %v8879_v2  ;;  %1487 = vperm.xlu1 %6673, %v230_v45   ;;  %v7219_v27 = vpack.c.bf16 %v204_v19, %v203_v18 }
  0x32   : > { %2490 = vperm.xlu0 %6672, %v251_v44  }
  0x34   : > { %2495 = vperm.xlu1 %6673, %v252_v47  }
  0x36   : > { %2480 = vperm.xlu0 %6672, %v249_v46  }
  0x38   : > { %2485 = vperm.xlu1 %6673, %v250_v49  }
  0x3a   : > { %2470 = vperm.xlu0 %6672, %v247_v48  }
  0x3c   : > { %2475 = vperm.xlu1 %6673, %v248_v51  }
  0x3e   : > { %2578 = vperm.xlu0 %6672, %v260_v50  }
  0x40   : > { %2465 = vperm.xlu1 %6673, %v246_v53  }
  0x42   : > { %2568 = vperm.xlu0 %6672, %v258_v52  }
  0x44   : > { %2573 = vperm.xlu1 %6673, %v259_v55  }
  0x46   : > { %2716 = vperm.xlu0 %6672, %v262_v54  }
  0x48   : > { %2563 = vperm.xlu1 %6673, %v257_v56  }
  0x90   : > { %v7267_v39 = vpop.permute.xlu0 %794 }
  0x94   : > { %v7271_v44 = vpop.permute.xlu1 %789  ;;  %v7273_v47 = vpop.permute.xlu0 %784 }
  0x98   : > { %v7275_v52 = vpop.permute.xlu1 %774  ;;  %v7277_v55 = vpop.permute.xlu0 %779 }
  0x9d   : > { %v7284_v0 = vpop.permute.xlu0 %769 }
  0xde   : > { %v626_v57 = vpop.f32.mrf.mxu0  ;;  %v667_v58 = vpop.f32.mrf.mxu1 }
  0xdf   : > { %v755_v59 = vpack.c.bf16 %v626_v57, %v626_v57  ;;  %v757_v60 = vpack.c.bf16 %v667_v58, %v667_v58 }
  0xe0   : > { %v628_v61 = vpop.f32.mrf.mxu0  ;;  %v669_v62 = vpop.f32.mrf.mxu1 }
  0xe1   : > { %v818_v1 = vsel %vm810_vm2, %v757_v60, 0  ;;  %v756_v3 = vpack.c.bf16 %v628_v61, %v628_v61  ;;  %v758_v4 = vpack.c.bf16 %v669_v62, %v669_v62  ;;  %v812_v7 = vsel %vm810_vm2, %v755_v59, 0  ;;  %v7279_v60 = vpop.permute.xlu1 %764 }
  0xe2   : > { %v630_v5 = vpop.f32.mrf.mxu0  ;;  %v671_v6 = vpop.f32.mrf.mxu1 }
  0xe3   : > { %5658 = vmatprep.subr.msk.bf16.mxu0 %vm810_vm2, %v756_v3  ;;  %5663 = vmatprep.subr.msk.bf16.mxu1 %vm810_vm2, %v758_v4 }
  0xe4   : > { %v631_v9 = vpop.f32.mrf.mxu0  ;;  %847 = vmatpush1.bf16.msra.mxu0 %v812_v7  ;;  %918 = vmatpush1.bf16.msra.mxu1 %v818_v1  ;;  %v672_v10 = vpop.f32.mrf.mxu1 }
  0xe7   : > { %5659 = vmatmul.mubr.msk.bf16.vlgmr.msra.gmra.mxu0 %vm797_vm3, %v7188_v8  ;;  %5664 = vmatmul.mubr.msk.bf16.vlgmr.msra.gmra.mxu1 %vm797_vm3, %v7188_v8 }
  0xe8   : > { %874 = vmatprep.mubr.bf16.mxu0 %v8879_v2  ;;  %945 = vmatprep.mubr.bf16.mxu1 %v8879_v2 }
  0xee   : > { %v708_v14 = vpop.f32.mrf.mxu0 }
  0xef   : > { %5660 = vmatmul.mubr.msk.bf16.gmra.mxu0 %vm797_vm3, %v7202_v13  ;;  %5665 = vmatmul.mubr.msk.bf16.gmra.mxu1 %vm797_vm3, %v7202_v13  ;;  %v759_v15 = vpack.c.bf16 %v708_v14, %v708_v14  ;;  %v749_v16 = vpop.f32.mrf.mxu1 }
  0xf0   : > { %v710_v17 = vpop.f32.mrf.mxu0  ;;  %884 = vmatprep.mubr.bf16.mxu0 %v8879_v2  ;;  %955 = vmatprep.mubr.bf16.mxu1 %v8879_v2  ;;  %v761_v20 = vpack.c.bf16 %v749_v16, %v749_v16 }
  0xf1   : > { %v824_v21 = vsel %vm810_vm2, %v759_v15, 0  ;;  %v760_v23 = vpack.c.bf16 %v710_v17, %v710_v17  ;;  %v6228_v24 = vpop.f32.mrf.mxu1 }
  0xf2   : > { %v712_v25 = vpop.f32.mrf.mxu0  ;;  %v830_v26 = vsel %vm810_vm2, %v761_v20, 0  ;;  %6656 = vmatprep.subr.msk.bf16.mxu1 %vm810_vm2, %v761_v20 }
  0xf3   : > { %5668 = vmatprep.subr.msk.bf16.mxu0 %vm810_vm2, %v760_v23  ;;  %6231 = vmatpush3.bf16.msra.mxu1 %v830_v26  ;;  %v752_v28 = vpop.f32.mrf.mxu1 }
  0xf4   : > { %v713_v29 = vpop.f32.mrf.mxu0  ;;  %989 = vmatpush1.bf16.msra.mxu0 %v824_v21 }
  0xf5   : > { %v6229_v30 = vpop.f32.mrf.mxu1 }
  0xf7   : > { %5661 = vmatmul.mubr.msk.bf16.gmra.mxu0 %vm797_vm3, %v7219_v27  ;;  %5666 = vmatmul.mubr.msk.bf16.gmra.mxu1 %vm797_vm3, %v7219_v27 }
  0xf8   : > { %894 = vmatprep.mubr.bf16.mxu0 %v8879_v2  ;;  %965 = vmatprep.mubr.bf16.mxu1 %v8879_v2 }
  0xff   : > { %5662 = vmatmul.mubr.msk.bf16.gmra.mxu0 %vm797_vm3, %v7231_v32  ;;  %5667 = vmatmul.mubr.msk.bf16.gmra.mxu1 %vm797_vm3, %v7231_v32 }
 0x100   : > { %1006 = vmatprep.mubr.bf16.mxu0 %v8879_v2  ;;  %6232 = vmatprep.mubr.msk.bf16.mxu1 %vm797_vm3, %v7188_v8 }
 0x107   : > { %5669 = vmatmul.mubr.msk.bf16.vlgmr.msra.gmra.mxu0 %vm797_vm3, %v7188_v8  ;;  %6233 = vmatmul.mubr.msk.bf16.vlgmr.msra.gmra.mxu1 %vm797_vm3, %v7202_v13 }
 0x108   : > { %1016 = vmatprep.mubr.bf16.mxu0 %v8879_v2  ;;  %6236 = vmatprep.mubr.msk.bf16.mxu1 %vm797_vm3, %v7219_v27 }
 0x10f   : > { %5670 = vmatmul.mubr.msk.bf16.gmra.mxu0 %vm797_vm3, %v7202_v13  ;;  %6237 = vmatmul.mubr.msk.bf16.gmra.mxu1 %vm797_vm3, %v7231_v32 }
 0x110   : > { %1026 = vmatprep.mubr.bf16.mxu0 %v8879_v2  ;;  %1267 = vmatprep.mubr.bf16.mxu1 %v8879_v2 }
 0x117   : > { %5671 = vmatmul.mubr.msk.bf16.gmra.mxu0 %vm797_vm3, %v7219_v27 }
 0x118   : > { %1036 = vmatprep.mubr.bf16.mxu0 %v8879_v2 }
 0x11f   : > { %5672 = vmatmul.mubr.msk.bf16.gmra.mxu0 %vm797_vm3, %v7231_v32 }
 0x120   : > { %1320 = vmatprep.mubr.bf16.mxu0 %v8879_v2 }
 0x1a7   : > { %v7259_v33 = vpop.f32.mrf.mxu0  ;;  %v937_v34 = vpop.f32.mrf.mxu1 }
 0x1a8   : > { %v7287_v1 = vadd.f32 %v937_v34, %v7279_v60 }
 0x1a9   : > { %v7261_v35 = vpop.f32.mrf.mxu0  ;;  %v939_v36 = vpop.f32.mrf.mxu1 }
 0x1aa   : > { %v7290_v3 = vadd.f32 %v939_v36, %v7279_v60 }
 0x1ab   : > { %v7263_v37 = vpop.f32.mrf.mxu0  ;;  %v7265_v38 = vpop.f32.mrf.mxu1 }
 0x1ad   : > { %v872_v40 = vpop.f32.mrf.mxu0  ;;  %v943_v41 = vpop.f32.mrf.mxu1 }
 0x1ae   : > { %v7295_v6 = vadd.f32 %v872_v40, %v7284_v0  ;;  %v7298_v7 = vadd.f32 %v943_v41, %v7284_v0 }
 0x1af   : > { %v7269_v42 = vpop.f32.mrf.mxu0  ;;  %v947_v43 = vpop.f32.mrf.mxu1 }
 0x1b0   : > { %v7301_v9 = vadd.f32 %v947_v43, %v7275_v52 }
 0x1b1   : > { %v878_v45 = vpop.f32.mrf.mxu0  ;;  %v949_v46 = vpop.f32.mrf.mxu1 }
 0x1b2   : > { %v7282_v61 = vadd.f32 %v949_v46, %v7275_v52  ;;  %v7304_v10 = vadd.f32 %v878_v45, %v7275_v52 }
 0x1b3   : > { %v880_v48 = vpop.f32.mrf.mxu0  ;;  %v951_v49 = vpop.f32.mrf.mxu1 }
 0x1b4   : > { %v1126_v14 = vmax.f32 %v7282_v61, 0.0  ;;  %v7308_v15 = vadd.f32 %v880_v48, %v7277_v55 }
 0x1b5   : > { %v882_v50 = vpop.f32.mrf.mxu0  ;;  %v953_v51 = vpop.f32.mrf.mxu1 }
 0x1b6   : > { %v7311_v16 = vadd.f32 %v882_v50, %v7277_v55  ;;  %v954_v43 = vadd.f32 %v953_v51, %v7277_v55  ;;  %v952_v50 = vadd.f32 %v951_v49, %v7277_v55 }
 0x1b7   : > { %v886_v53 = vpop.f32.mrf.mxu0  ;;  %v957_v54 = vpop.f32.mrf.mxu1 }
 0x1b8   : > { %v958_v18 = vadd.f32 %v957_v54, %v7273_v47  ;;  %v887_v54 = vadd.f32 %v886_v53, %v7273_v47  ;;  %v1131_v49 = vmax.f32 %v7311_v16, 0.0  ;;  %v1133_v53 = vmax.f32 %v954_v43, 0.0 }
 0x1b9   : > { %v888_v56 = vpop.f32.mrf.mxu0  ;;  %v959_v57 = vpop.f32.mrf.mxu1  ;;  %v1117_v43 = vmax.f32 %v7295_v6, 0.0 }
 0x1ba   : > { %v960_v4 = vadd.f32 %v959_v57, %v7273_v47  ;;  %v889_v19 = vadd.f32 %v888_v56, %v7273_v47 }
 0x1bb   : > { %v890_v58 = vpop.f32.mrf.mxu0  ;;  %v961_v59 = vpop.f32.mrf.mxu1 }
 0x1bc   : > { %v1140_v25 = vmax.f32 %v960_v4, 0.0  ;;  %v891_v30 = vadd.f32 %v890_v58, %v7271_v44  ;;  %v962_v31 = vadd.f32 %v961_v59, %v7271_v44  ;;  %v1138_v58 = vmax.f32 %v889_v19, 0.0 }
 0x1bd   : > { %v892_v62 = vpop.f32.mrf.mxu0  ;;  %v963_v63 = vpop.f32.mrf.mxu1 }
 0x1be   : > { %v964_v5 = vadd.f32 %v963_v63, %v7271_v44  ;;  %v893_v17 = vadd.f32 %v892_v62, %v7271_v44 }
 0x1bf   : > { %v896_v11 = vpop.f32.mrf.mxu0  ;;  %v967_v12 = vpop.f32.mrf.mxu1 }
 0x1c0   : > { %v897_v20 = vadd.f32 %v896_v11, %v7267_v39  ;;  %v968_v21 = vadd.f32 %v967_v12, %v7267_v39  ;;  %v1147_v26 = vmax.f32 %v964_v5, 0.0  ;;  %v1145_v45 = vmax.f32 %v893_v17, 0.0 }
 0x1c1   : > { %v898_v23 = vpop.f32.mrf.mxu0  ;;  %v969_v24 = vpop.f32.mrf.mxu1  ;;  %v1139_v11 = vmax.f32 %v958_v18, 0.0  ;;  %v1144_v12 = vmax.f32 %v891_v30, 0.0  ;;  %v869_v18 = vadd.f32 %v7261_v35, %v7279_v60  ;;  %v942_v30 = vadd.f32 %v7265_v38, %v7284_v0 }
 0x1c2   : > { %v899_v28 = vadd.f32 %v898_v23, %v7267_v39  ;;  %v970_v29 = vadd.f32 %v969_v24, %v7267_v39  ;;  %v1151_v34 = vmax.f32 %v897_v20, 0.0  ;;  %v1153_v36 = vmax.f32 %v968_v21, 0.0 }
 0x1c3   : > { %v900_v40 = vpop.f32.mrf.mxu0  ;;  %v971_v41 = vpop.f32.mrf.mxu1  ;;  %v1175_v5 = vpack.c.bf16 %v1147_v26, %v1140_v25  ;;  %v1146_v20 = vmax.f32 %v962_v31, 0.0  ;;  %v1173_v23 = vpack.c.bf16 %v1145_v45, %v1138_v58  ;;  %v1112_v24 = vmax.f32 %v7290_v3, 0.0 }
 0x1c4   : > { %v1152_v46 = vmax.f32 %v899_v28, 0.0  ;;  %v1154_v48 = vmax.f32 %v970_v29, 0.0  ;;  %v1179_v56 = vpack.c.bf16 %v1151_v34, %v1151_v34  ;;  %v1181_v57 = vpack.c.bf16 %v1153_v36, %v1153_v36 }
 0x1c5   : > { %v901_v62 = vpop.f32.mrf.mxu0  ;;  %v972_v63 = vpop.f32.mrf.mxu1  ;;  %v877_v25 = vadd.f32 %v7269_v42, %v7275_v52  ;;  %v1137_v26 = vmax.f32 %v887_v54, 0.0  ;;  %v871_v29 = vadd.f32 %v7263_v37, %v7284_v0  ;;  %v1125_v35 = vmax.f32 %v7301_v9, 0.0 }
 0x1c6   : > { %v1180_v4 = vpack.c.bf16 %v1152_v46, %v1152_v46  ;;  %v1182_v59 = vpack.c.bf16 %v1154_v48, %v1154_v48  ;;  %v1221_v17 = vsel %vm1213_vm4, %v1181_v57, 0  ;;  %v1215_v19 = vsel %vm1213_vm4, %v1179_v56, 0 }
 0x1c7   : > { %v7325_v21 = vpop.f32.mrf.mxu0  ;;  %v7327_v51 = vpop.f32.mrf.mxu1  ;;  %v1124_v3 = vmax.f32 %v7304_v10, 0.0  ;;  %v1130_v42 = vmax.f32 %v7308_v15, 0.0  ;;  %v1132_v31 = vmax.f32 %v952_v50, 0.0  ;;  %v1172_v34 = vpack.c.bf16 %v1144_v12, %v1137_v26 }
 0x1c8   : > { %5677 = vmatprep.subr.msk.bf16.mxu1 %vm1213_vm4, %v1180_v4  ;;  %5680 = vmatprep.subr.msk.bf16.mxu0 %vm1213_vm4, %v1182_v59  ;;  %v1174_v36 = vpack.c.bf16 %v1146_v20, %v1139_v11  ;;  %v1119_v37 = vmax.f32 %v7298_v7, 0.0  ;;  %v1168_v38 = vpack.c.bf16 %v1133_v53, %v1126_v14  ;;  %v867_v9 = vadd.f32 %v7259_v33, %v7279_v60  ;;  %v211_v59 = vld [vmem:[%s8875_s3 + $0x78] sm:$0xff] }
 0x1c9   : > { %v7339_v28 = vpop.f32.mrf.mxu0  ;;  %v7341_v16 = vpop.f32.mrf.mxu1  ;;  %1244 = vmatpush1.bf16.msra.mxu1 %v1215_v19  ;;  %1297 = vmatpush1.bf16.msra.mxu0 %v1221_v17  ;;  %v1166_v45 = vpack.c.bf16 %v1131_v49, %v1124_v3  ;;  %v1123_v10 = vmax.f32 %v877_v25, 0.0  ;;  %v1111_v48 = vmax.f32 %v7287_v1, 0.0  ;;  %v1110_v50 = vmax.f32 %v869_v18, 0.0  ;;  %v210_v1 = vld [vmem:[%s8875_s3 + $0x70] sm:$0xff] }
 0x1ca   : > { %1245 = vmatprep.subr.bf16.mxu1 %v1173_v23  ;;  %1298 = vmatprep.subr.bf16.mxu0 %v1175_v5  ;;  %v1116_v6 = vmax.f32 %v871_v29, 0.0  ;;  %v1118_v7 = vmax.f32 %v942_v30, 0.0  ;;  %v1167_v56 = vpack.c.bf16 %v1132_v31, %v1125_v35  ;;  %v1161_v33 = vpack.c.bf16 %v1119_v37, %v1112_v24 }
 0x1cb   : > { %v7350_v40 = vpop.f32.mrf.mxu0  ;;  %v6235_v41 = vpop.f32.mrf.mxu1  ;;  %v1165_v54 = vpack.c.bf16 %v1130_v42, %v1123_v10  ;;  %v1159_v57 = vpack.c.bf16 %v1117_v43, %v1110_v50  ;;  %v1109_v62 = vmax.f32 %v867_v9, 0.0  ;;  %v7376_v23 = vpack.c.bf16 %v211_v59, %v210_v1 }
 0x1cc   : > { %v1160_v11 = vpack.c.bf16 %v1118_v7, %v1111_v48  ;;  %v1091_v12 = vadd.f32 %v6235_v41, %v7277_v55  ;;  %v1088_v25 = vadd.f32 %v7327_v51, %v7275_v52  ;;  %v212_v51 = vld [vmem:[%s8875_s3 + $0x80] sm:$0xff]  ;;  %v1080_v43 = vadd.f32 %v7341_v16, %v7279_v60 }
 0x1cd   : > { %v7358_v46 = vpop.f32.mrf.mxu0  ;;  %v1082_v15 = vpop.f32.mrf.mxu1  ;;  %1246 = vmatpush1.bf16.msra.mxu1 %v1172_v34  ;;  %1299 = vmatpush1.bf16.msra.mxu0 %v1174_v36  ;;  %v1158_v5 = vpack.c.bf16 %v1116_v6, %v1109_v62  ;;  %v213_v36 = vld [vmem:[%s8875_s3 + $0x88] sm:$0x1] }
 0x1ce   : > { %1247 = vmatprep.subr.bf16.mxu1 %v1166_v45  ;;  %1300 = vmatprep.subr.bf16.mxu0 %v1168_v38  ;;  %v1136_v29 = vmax.f32 %v1091_v12, 0.0  ;;  %v1083_v35 = vadd.f32 %v1082_v15, %v7284_v0  ;;  %v1129_v41 = vmax.f32 %v1088_v25, 0.0  ;;  %v7398_v10 = vpack.c.bf16 %v213_v36, %v212_v51 }
 0x1cf   : > { %v7361_v61 = vpop.f32.mrf.mxu0  ;;  %v6238_v14 = vpop.f32.mrf.mxu1  ;;  %v1115_v48 = vmax.f32 %v1080_v43, 0.0 }
 0x1d0   : > { %v1104_v63 = vadd.f32 %v6238_v14, %v7267_v39  ;;  %v1171_v38 = vpack.c.bf16 %v1136_v29, %v1129_v41  ;;  %v1122_v9 = vmax.f32 %v1083_v35, 0.0 }
 0x1d1   : > { %v7364_v58 = vpop.f32.mrf.mxu0  ;;  %v1095_v4 = vpop.f32.mrf.mxu1  ;;  %1248 = vmatpush1.bf16.msra.mxu1 %v1165_v54  ;;  %1301 = vmatpush1.bf16.msra.mxu0 %v1167_v56 }
 0x1d2   : > { %1249 = vmatprep.subr.bf16.mxu1 %v1159_v57  ;;  %1302 = vmatprep.subr.bf16.mxu0 %v1161_v33  ;;  %v1157_v20 = vmax.f32 %v1104_v63, 0.0  ;;  %v1096_v53 = vadd.f32 %v1095_v4, %v7273_v47  ;;  %v1164_v16 = vpack.c.bf16 %v1122_v9, %v1115_v48  ;;  %v1021_v12 = vadd.f32 %v7364_v58, %v7275_v52 }
 0x1d3   : > { %v7373_v17 = vpop.f32.mrf.mxu0  ;;  %v6239_v49 = vpop.f32.mrf.mxu1  ;;  %v1019_v58 = vadd.f32 %v7361_v61, %v7275_v52 }
 0x1d4   : > { %v1185_v19 = vpack.c.bf16 %v1157_v20, %v1157_v20  ;;  %v1143_v3 = vmax.f32 %v1096_v53, 0.0  ;;  %v1023_v53 = vadd.f32 %v7373_v17, %v7277_v55  ;;  %v1011_v17 = vadd.f32 %v7339_v28, %v7279_v60 }
 0x1d5   : > { %v1024_v18 = vpop.f32.mrf.mxu0  ;;  %v1098_v24 = vpop.f32.mrf.mxu1  ;;  %1250 = vmatpush1.bf16.msra.mxu1 %v1158_v5  ;;  %1303 = vmatpush1.bf16.msra.mxu0 %v1160_v11  ;;  %v1127_v61 = vmax.f32 %v1019_v58, 0.0 }
 0x1d6   : > { %v1099_v26 = vadd.f32 %v1098_v24, %v7271_v44  ;;  %6657 = vmatprep.subr.msk.bf16.mxu0 %vm1213_vm4, %v1185_v19  ;;  %v1233_v31 = vsel %vm1213_vm4, %v1185_v19, 0  ;;  %v1025_v63 = vadd.f32 %v1024_v18, %v7277_v55  ;;  %v1015_v24 = vadd.f32 %v7358_v46, %v7284_v0 }
 0x1d7   : > { %v1028_v30 = vpop.f32.mrf.mxu0  ;;  %v1128_v46 = vmax.f32 %v1021_v12, 0.0  ;;  %v1134_v35 = vmax.f32 %v1023_v53, 0.0  ;;  %v1114_v51 = vmax.f32 %v1011_v17, 0.0 }
 0x1d8   : > { %v1150_v42 = vmax.f32 %v1099_v26, 0.0  ;;  %5678 = vmatmul.mubr.msk.bf16.vlgmr.msra.gmra.mxu1 %vm1206_vm5, %v7376_v23  ;;  %5681 = vmatmul.mubr.msk.bf16.vlgmr.msra.gmra.mxu0 %vm1206_vm5, %v7376_v23  ;;  %v1029_v5 = vadd.f32 %v1028_v30, %v7273_v47  ;;  %v1135_v18 = vmax.f32 %v1025_v63, 0.0  ;;  %v1013_v30 = vadd.f32 %v7350_v40, %v7284_v0 }
 0x1d9   : > { %v1030_v34 = vpop.f32.mrf.mxu0  ;;  %6241 = vmatpush3.bf16.msra.mxu0 %v1233_v31  ;;  %1277 = vmatprep.mubr.bf16.mxu1 %v8879_v2  ;;  %v1169_v41 = vpack.c.bf16 %v1134_v35, %v1127_v61 }
 0x1da   : > { %v1178_v37 = vpack.c.bf16 %v1150_v42, %v1143_v3  ;;  %1330 = vmatprep.mubr.bf16.mxu0 %v8879_v2  ;;  %v1031_v56 = vadd.f32 %v1030_v34, %v7273_v47  ;;  %v1141_v29 = vmax.f32 %v1029_v5, 0.0  ;;  %v1121_v42 = vmax.f32 %v1015_v24, 0.0 }
 0x1db   : > { %v1032_v45 = vpop.f32.mrf.mxu0  ;;  %v1170_v31 = vpack.c.bf16 %v1135_v18, %v1128_v46  ;;  %v1009_v34 = vadd.f32 %v7325_v21, %v7279_v60  ;;  %v1120_v36 = vmax.f32 %v1013_v30, 0.0 }
 0x1dc   : > { %6242 = vmatprep.subr.bf16.mxu0 %v1178_v37  ;;  %v1033_v33 = vadd.f32 %v1032_v45, %v7271_v44  ;;  %v1142_v20 = vmax.f32 %v1031_v56, 0.0  ;;  %v1163_v43 = vpack.c.bf16 %v1121_v42, %v1114_v51 }
 0x1dd   : > { %v1034_v15 = vpop.f32.mrf.mxu0  ;;  %6243 = vmatpush3.bf16.msra.mxu0 %v1178_v37  ;;  %v1113_v28 = vmax.f32 %v1009_v34, 0.0 }
 0x1de   : > { %6244 = vmatprep.subr.bf16.mxu0 %v1171_v38  ;;  %v1035_v6 = vadd.f32 %v1034_v15, %v7271_v44  ;;  %v1148_v19 = vmax.f32 %v1033_v33, 0.0 }
 0x1df   : > { %v1038_v50 = vpop.f32.mrf.mxu0  ;;  %v1162_v37 = vpack.c.bf16 %v1120_v36, %v1113_v28 }
 0x1e0   : > { %v1039_v7 = vadd.f32 %v1038_v50, %v7267_v39  ;;  %5679 = vmatmul.mubr.msk.bf16.gmra.mxu1 %vm1206_vm5, %v7398_v10  ;;  %5682 = vmatmul.mubr.msk.bf16.gmra.mxu0 %vm1206_vm5, %v7398_v10  ;;  %v1149_v4 = vmax.f32 %v1035_v6, 0.0  ;;  %v1176_v3 = vpack.c.bf16 %v1148_v19, %v1141_v29  ;;  %v7439_v6 = vpop.permute.xlu0 %1203 }
 0x1e1   : > { %v1040_v54 = vpop.f32.mrf.mxu0  ;;  %6245 = vmatpush3.bf16.msra.mxu0 %v1171_v38  ;;  %6248 = vmatprep.mubr.msk.bf16.mxu0 %vm1206_vm5, %v7376_v23 }
 0x1e2   : > { %v1155_v14 = vmax.f32 %v1039_v7, 0.0  ;;  %v1041_v57 = vadd.f32 %v1040_v54, %v7267_v39  ;;  %6246 = vmatprep.subr.bf16.mxu0 %v1164_v16  ;;  %1373 = vmatprep.mubr.bf16.mxu1 %v8879_v2  ;;  %v1177_v25 = vpack.c.bf16 %v1149_v4, %v1142_v20  ;;  %v7441_v54 = vpop.permute.xlu1 %1198 }
 0x1e3   : > { %v1042_v62 = vpop.f32.mrf.mxu0 }
 0x1e4   : > { %v1183_v1 = vpack.c.bf16 %v1155_v14, %v1155_v14  ;;  %v1156_v59 = vmax.f32 %v1041_v57, 0.0  ;;  %v6959_v57 = vmov 65535  }
 0x1e5   : > { %v1043_v11 = vpop.f32.mrf.mxu0  ;;  %6247 = vmatpush3.bf16.msra.mxu0 %v1164_v16  ;;  %v1501_v33 = vsel %vm1499_vm6, 4294967295, %v6959_v57 }
 0x1e6   : > { %v1184_v49 = vpack.c.bf16 %v1156_v59, %v1156_v59  ;;  %v1227_v26 = vsel %vm1213_vm4, %v1183_v1, 0  ;;  %v7446_v59 = vpop.permute.xlu0 %1193  ;;  %v7454_v19 = vsel %vm1500_vm7, %v1501_v33, 0 }
 0x1e8   : > { %5683 = vmatprep.subr.msk.bf16.mxu1 %vm1213_vm4, %v1184_v49  ;;  %6249 = vmatmul.mubr.msk.bf16.vlgmr.msra.gmra.mxu0 %vm1206_vm5, %v7398_v10 }
 0x1e9   : > { %1350 = vmatpush1.bf16.msra.mxu1 %v1227_v26  ;;  %1599 = vmatprep.mubr.bf16.mxu0 %v8879_v2 }
 0x1ea   : > { %1351 = vmatprep.subr.bf16.mxu1 %v1177_v25  ;;  %v7456_v25 = vpop.permute.xlu1 %1188 }
 0x1ed   : > { %1352 = vmatpush1.bf16.msra.mxu1 %v1176_v3 }
 0x1ee   : > { %1353 = vmatprep.subr.bf16.mxu1 %v1170_v31 }
 0x1f1   : > { %1354 = vmatpush1.bf16.msra.mxu1 %v1169_v41 }
 0x1f2   : > { %1355 = vmatprep.subr.bf16.mxu1 %v1163_v43 }
 0x1f5   : > { %1356 = vmatpush1.bf16.msra.mxu1 %v1162_v37 }
 0x1f8   : > { %5684 = vmatmul.mubr.msk.bf16.vlgmr.msra.gmra.mxu1 %vm1206_vm5, %v7376_v23 }
 0x1f9   : > { %1383 = vmatprep.mubr.bf16.mxu1 %v8879_v2 }
 0x200   : > { %5685 = vmatmul.mubr.msk.bf16.gmra.mxu1 %vm1206_vm5, %v7398_v10 }
 0x201   : > { %1556 = vmatprep.mubr.bf16.mxu1 %v8879_v2 }
 0x298   : > { %v1269_v21 = vpop.f32.mrf.mxu1  ;;  %v1322_v40 = vpop.f32.mrf.mxu0 }
 0x29a   : > { %v1271_v45 = vpop.f32.mrf.mxu1  ;;  %v1324_v38 = vpop.f32.mrf.mxu0 }
 0x29b   : > { %v1272_v46 = vadd.f32 %v1271_v45, %v7456_v25  ;;  %v1325_v30 = vadd.f32 %v1324_v38, %v7456_v25  ;;  %v1270_v38 = vadd.f32 %v1269_v21, %v7456_v25 }
 0x29c   : > { %v1273_v9 = vpop.f32.mrf.mxu1  ;;  %v1326_v15 = vpop.f32.mrf.mxu0 }
 0x29d   : > { %v1274_v36 = vadd.f32 %v1273_v9, %v7446_v59  ;;  %v1327_v41 = vadd.f32 %v1326_v15, %v7446_v59  ;;  %v1446_v33 = vmax.f32 %v1325_v30, 0.0 }
 0x29e   : > { %v1275_v48 = vpop.f32.mrf.mxu1  ;;  %v1328_v50 = vpop.f32.mrf.mxu0 }
 0x29f   : > { %v1276_v49 = vadd.f32 %v1275_v48, %v7446_v59  ;;  %v1329_v53 = vadd.f32 %v1328_v50, %v7446_v59 }
 0x2a0   : > { %v1279_v7 = vpop.f32.mrf.mxu1  ;;  %v1332_v16 = vpop.f32.mrf.mxu0 }
 0x2a1   : > { %v1280_v62 = vadd.f32 %v1279_v7, %v7441_v54  ;;  %v1333_v63 = vadd.f32 %v1332_v16, %v7441_v54  ;;  %v1451_v48 = vmax.f32 %v1276_v49, 0.0  ;;  %v1453_v50 = vmax.f32 %v1329_v53, 0.0 }
 0x2a2   : > { %v1281_v56 = vpop.f32.mrf.mxu1  ;;  %v1334_v14 = vpop.f32.mrf.mxu0  ;;  %v1323_v16 = vadd.f32 %v1322_v40, %v7456_v25 }
 0x2a3   : > { %v1282_v5 = vadd.f32 %v1281_v56, %v7441_v54  ;;  %v1335_v11 = vadd.f32 %v1334_v14, %v7441_v54  ;;  %v1457_v35 = vmax.f32 %v1280_v62, 0.0  ;;  %v1459_v3 = vmax.f32 %v1333_v63, 0.0 }
 0x2a4   : > { %v1283_v4 = vpop.f32.mrf.mxu1  ;;  %v1336_v1 = vpop.f32.mrf.mxu0  ;;  %v1444_v56 = vmax.f32 %v1272_v46, 0.0  ;;  %v1450_v63 = vmax.f32 %v1274_v36, 0.0  ;;  %v1445_v49 = vmax.f32 %v1323_v16, 0.0  ;;  %v6724_v16 = vld [vmem:[%s8874_s2 + $0xa8] sm:$0xff]  }
 0x2a5   : > { %v1284_v12 = vadd.f32 %v1283_v4, %v7439_v6  ;;  %v1337_v20 = vadd.f32 %v1336_v1, %v7439_v6  ;;  %v1458_v31 = vmax.f32 %v1282_v5, 0.0  ;;  %v1460_v34 = vmax.f32 %v1335_v11, 0.0 }
 0x2a6   : > { %v1285_v24 = vpop.f32.mrf.mxu1  ;;  %v1338_v18 = vpop.f32.mrf.mxu0  ;;  %v1452_v4 = vmax.f32 %v1327_v41, 0.0  ;;  %v1472_v40 = vpack.c.bf16 %v1451_v48, %v1444_v56  ;;  %v6716_v41 = vld [vmem:[%s8874_s2 + $0xb8] sm:$0xff]   ;;  %v6720_v48 = vld [vmem:[%s8874_s2 + $0xb0] sm:$0xff]  }
 0x2a7   : > { %v1464_v26 = vmax.f32 %v1284_v12, 0.0  ;;  %v1466_v58 = vmax.f32 %v1337_v20, 0.0  ;;  %v1286_v29 = vadd.f32 %v1285_v24, %v7439_v6  ;;  %v1339_v17 = vadd.f32 %v1338_v18, %v7439_v6  ;;  %v216_v24 = vld [vmem:[%s8875_s3 + $0xb0] sm:$0xff]  ;;  %v217_v18 = vld [vmem:[%s8875_s3 + $0xb8] sm:$0xf] }
 0x2a8   : > { %v6250_v42 = vpop.f32.mrf.mxu0  ;;  %v1474_v12 = vpack.c.bf16 %v1453_v50, %v1446_v33  ;;  %v1443_v20 = vmax.f32 %v1270_v38, 0.0  ;;  %v7479_v46 = vpack.c.bf16 %v217_v18, %v216_v24  ;;  %v6722_v50 = vld [vmem:[%s8874_s2 + $0xe8] sm:$0xff]   ;;  %v6732_v24 = vld [vmem:[%s8874_s2 + $0x98] sm:$0xff]  }
 0x2a9   : > { %v1465_v61 = vmax.f32 %v1286_v29, 0.0  ;;  %v1467_v51 = vmax.f32 %v1339_v17, 0.0  ;;  %v1478_v43 = vpack.c.bf16 %v1464_v26, %v1457_v35  ;;  %v1480_v28 = vpack.c.bf16 %v1466_v58, %v1459_v3 }
 0x2aa   : > { %v1428_v37 = vpop.f32.mrf.mxu0  ;;  %v1437_v14 = vadd.f32 %v6250_v42, %v7441_v54  ;;  %v1471_v26 = vpack.c.bf16 %v1450_v63, %v1443_v20  ;;  %v1473_v58 = vpack.c.bf16 %v1452_v4, %v1445_v49  ;;  %v6728_v4 = vld [vmem:[%s8874_s2 + $0xa0] sm:$0xff]  }
 0x2ab   : > { %v1479_v7 = vpack.c.bf16 %v1465_v61, %v1458_v31  ;;  %v1481_v45 = vpack.c.bf16 %v1467_v51, %v1460_v34  ;;  %v1504_v1 = vand.u32 %v7454_v19, %v1478_v43  ;;  %v1510_v5 = vand.u32 %v7454_v19, %v1480_v28  ;;  %v6714_v34 = vld [vmem:[%s8874_s2 + $0xf8] sm:$0xff]   ;;  %v6718_v43 = vld [vmem:[%s8874_s2 + $0xf0] sm:$0xff]  }
 0x2ac   : > { %v6251_v57 = vpop.f32.mrf.mxu0  ;;  %v1463_v53 = vmax.f32 %v1437_v14, 0.0  ;;  %v1429_v30 = vadd.f32 %v1428_v37, %v7456_v25 }
 0x2ad   : > { %v1440_v9 = vadd.f32 %v6251_v57, %v7439_v6  ;;  %v1507_v15 = vand.u32 %v7454_v19, %v1479_v7  ;;  %v1513_v62 = vand.u32 %v7454_v19, %v1481_v45  ;;  %v6726_v57 = vld [vmem:[%s8874_s2 + $0xe0] sm:$0xff]  }
 0x2ae   : > { %v1431_v11 = vpop.f32.mrf.mxu0  ;;  %v1449_v42 = vmax.f32 %v1429_v30, 0.0 }
 0x2af   : > { %v1470_v21 = vmax.f32 %v1440_v9, 0.0  ;;  %1536 = vmatprep.subr.bf16.mxu1 %v1507_v15  ;;  %1579 = vmatprep.subr.bf16.mxu0 %v1513_v62  ;;  %v1432_v17 = vadd.f32 %v1431_v11, %v7446_v59  ;;  %v6730_v11 = vld [vmem:[%s8874_s2 + $0xd8] sm:$0xff]  }
 0x2b0   : > { %1537 = vmatpush1.bf16.msra.mxu1 %v1504_v1  ;;  %1580 = vmatpush1.bf16.msra.mxu0 %v1510_v5 }
 0x2b1   : > { %1538 = vmatprep.subr.bf16.mxu1 %v1472_v40  ;;  %1581 = vmatprep.subr.bf16.mxu0 %v1474_v12  ;;  %v1484_v29 = vpack.c.bf16 %v1470_v21, %v1463_v53  ;;  %v1456_v3 = vmax.f32 %v1432_v17, 0.0 }
 0x2b3   : > { %v1522_v35 = vand.u32 %v7454_v19, %v1484_v29  ;;  %v1477_v61 = vpack.c.bf16 %v1456_v3, %v1449_v42  ;;  %v6717_v42 = vld [vmem:[%s8874_s2 + $0x38] sm:$0xff]  }
 0x2b4   : > { %1539 = vmatpush1.bf16.msra.mxu1 %v1471_v26  ;;  %1582 = vmatpush1.bf16.msra.mxu0 %v1473_v58 }
 0x2b5   : > { %6252 = vmatprep.subr.bf16.mxu0 %v8877_v22 }
 0x2b7   : > { %5688 = vmatmul.mubr.msk.bf16.vlgmr.msra.gmra.mxu1 %vm1495_vm8, %v7479_v46  ;;  %5689 = vmatmul.mubr.msk.bf16.vlgmr.msra.gmra.mxu0 %vm1495_vm8, %v7479_v46 }
 0x2b8   : > { %v1375_v31 = vpop.f32.mrf.mxu1  ;;  %6253 = vmatpush3.bf16.msra.mxu0 %v1522_v35  ;;  %6256 = vmatprep.mubr.msk.bf16.mxu0 %vm6958_vm1, %v8877_v22  ;;  %v6715_v35 = vld [vmem:[%s8874_s2 + $0x78] sm:$0xff]  }
 0x2b9   : > { %6254 = vmatprep.subr.bf16.mxu0 %v8877_v22  ;;  %1642 = vmatprep.mubr.bf16.mxu1 %v8879_v2  ;;  %v1376_v53 = vadd.f32 %v1375_v31, %v7456_v25  ;;  %v6719_v31 = vld [vmem:[%s8874_s2 + $0x70] sm:$0xff]  }
 0x2ba   : > { %v1377_v51 = vpop.f32.mrf.mxu1 }
 0x2bb   : > { %v1378_v1 = vadd.f32 %v1377_v51, %v7456_v25  ;;  %v1447_v30 = vmax.f32 %v1376_v53, 0.0  ;;  %v6725_v51 = vld [vmem:[%s8874_s2 + $0x28] sm:$0xff]  }
 0x2bc   : > { %v1379_v36 = vpop.f32.mrf.mxu1  ;;  %6255 = vmatpush3.bf16.msra.mxu0 %v1477_v61  ;;  %v6723_v61 = vld [vmem:[%s8874_s2 + $0x68] sm:$0xff]  }
 0x2bd   : > { %5934 = vmatprep.subr.bf16.mxu0 %v6714_v34  ;;  %v1380_v40 = vadd.f32 %v1379_v36, %v7446_v59  ;;  %v1448_v18 = vmax.f32 %v1378_v1, 0.0  ;;  %v6721_v34 = vld [vmem:[%s8874_s2 + $0x30] sm:$0xff]   ;;  %v6727_v36 = vld [vmem:[%s8874_s2 + $0x60] sm:$0xff]  }
 0x2be   : > { %v1381_v28 = vpop.f32.mrf.mxu1 }
 0x2bf   : > { %6257 = vmatmul.mubr.msk.bf16.vlgmr.msra.gmra.mxu0 %vm1495_vm8, %v7479_v46  ;;  %v1382_v9 = vadd.f32 %v1381_v28, %v7446_v59  ;;  %v1454_v58 = vmax.f32 %v1380_v40, 0.0  ;;  %v6733_v28 = vld [vmem:[%s8874_s2 + $0x18] sm:$0xff]  }
 0x2c0   : > { %v1385_v37 = vpop.f32.mrf.mxu1  ;;  %5935 = vmatpush3.bf16.msra.mxu0 %v6716_v41  ;;  %v6729_v41 = vld [vmem:[%s8874_s2 + $0x20] sm:$0xff]  }
 0x2c1   : > { %5936 = vmatprep.subr.bf16.mxu0 %v6718_v43  ;;  %v1386_v45 = vadd.f32 %v1385_v37, %v7441_v54  ;;  %v1455_v20 = vmax.f32 %v1382_v9, 0.0  ;;  %v1475_v3 = vpack.c.bf16 %v1454_v58, %v1447_v30  ;;  %v6731_v43 = vld [vmem:[%s8874_s2 + $0x58] sm:$0xff]   ;;  %v6734_v37 = vld [vmem:[%s8874_s2 + $0xd0] sm:$0xff]   ;;  %v6745_v9 = vld [vmem:[%s8874_s2] sm:$0xff]  }
 0x2c2   : > { %v1387_v7 = vpop.f32.mrf.mxu1 }
 0x2c3   : > { %v1388_v56 = vadd.f32 %v1387_v7, %v7441_v54  ;;  %v1461_v63 = vmax.f32 %v1386_v45, 0.0  ;;  %v1476_v17 = vpack.c.bf16 %v1455_v20, %v1448_v18  ;;  %v6737_v7 = vld [vmem:[%s8874_s2 + $0x10] sm:$0xff]   ;;  %v6738_v45 = vld [vmem:[%s8874_s2 + $0xc8] sm:$0xff]  }
 0x2c4   : > { %v1389_v38 = vpop.f32.mrf.mxu1  ;;  %5937 = vmatpush3.bf16.msra.mxu0 %v6720_v48  ;;  %v6735_v48 = vld [vmem:[%s8874_s2 + $0x50] sm:$0xff]  }
 0x2c5   : > { %v1390_v14 = vadd.f32 %v1389_v38, %v7439_v6  ;;  %5938 = vmatprep.subr.bf16.mxu0 %v6722_v50  ;;  %v1462_v5 = vmax.f32 %v1388_v56, 0.0  ;;  %v6736_v50 = vld [vmem:[%s8874_s2 + $0x90] sm:$0xff]   ;;  %v6739_v38 = vld [vmem:[%s8874_s2 + $0x48] sm:$0xff]  }
 0x2c6   : > { %v1391_v33 = vpop.f32.mrf.mxu1  ;;  %v6741_v56 = vld [vmem:[%s8874_s2 + $0x8] sm:$0xff]  }
 0x2c7   : > { %v1468_v15 = vmax.f32 %v1390_v14, 0.0  ;;  %v1392_v62 = vadd.f32 %v1391_v33, %v7439_v6  ;;  %v6742_v14 = vld [vmem:[%s8874_s2 + $0xc0] sm:$0xff]  }
 0x2c8   : > { %5939 = vmatpush3.bf16.msra.mxu0 %v6724_v16  ;;  %v6740_v16 = vld [vmem:[%s8874_s2 + $0x88] sm:$0xff]   ;;  %v6744_v33 = vld [vmem:[%s8874_s2 + $0x80] sm:$0xff]  }
 0x2c9   : > { %v1469_v21 = vmax.f32 %v1392_v62, 0.0  ;;  %5940 = vmatprep.subr.bf16.mxu0 %v6726_v57  ;;  %v1482_v12 = vpack.c.bf16 %v1468_v15, %v1461_v63  ;;  %v6743_v57 = vld [vmem:[%s8874_s2 + $0x40] sm:$0xff]   ;;  %v6746_v15 = vld [vmem:[%s8874_s2 + $0x178] sm:$0xff]  }
 0x2cb   : > { %v1483_v49 = vpack.c.bf16 %v1469_v21, %v1462_v5  ;;  %v1516_v29 = vand.u32 %v7454_v19, %v1482_v12  ;;  %v7606_v5 = vpop.permute.xlu0 %1492  ;;  %v7608_v21 = vpop.permute.xlu1 %1487 }
 0x2cc   : > { %5941 = vmatpush3.bf16.msra.mxu0 %v6728_v4 }
 0x2cd   : > { %v1519_v26 = vand.u32 %v7454_v19, %v1483_v49  ;;  %5942 = vmatprep.subr.bf16.mxu0 %v6730_v11 }
 0x2cf   : > { %1622 = vmatprep.subr.bf16.mxu1 %v1519_v26 }
 0x2d0   : > { %1623 = vmatpush1.bf16.msra.mxu1 %v1516_v29  ;;  %5943 = vmatpush3.bf16.msra.mxu0 %v6732_v24 }
 0x2d1   : > { %1624 = vmatprep.subr.bf16.mxu1 %v1476_v17  ;;  %5944 = vmatprep.subr.bf16.mxu0 %v6734_v37 }
 0x2d4   : > { %1625 = vmatpush1.bf16.msra.mxu1 %v1475_v3  ;;  %5945 = vmatpush3.bf16.msra.mxu0 %v6736_v50 }
 0x2d5   : > { %5912 = vmatprep.subr.bf16.mxu1 %v6715_v35  ;;  %5946 = vmatprep.subr.bf16.mxu0 %v6738_v45 }
 0x2d7   : > { %5690 = vmatmul.mubr.msk.bf16.vlgmr.msra.gmra.mxu1 %vm1495_vm8, %v7479_v46 }
 0x2d8   : > { %5913 = vmatpush3.bf16.msra.mxu1 %v6717_v42  ;;  %5947 = vmatpush3.bf16.msra.mxu0 %v6740_v16  ;;  %v6747_v42 = vld [vmem:[%s8874_s2 + $0x1b0] ss:$0 sps:$4 sm:$0x77]  }
 0x2d9   : > { %5914 = vmatprep.subr.bf16.mxu1 %v6719_v31  ;;  %5948 = vmatprep.subr.bf16.mxu0 %v6742_v14  ;;  %v6749_v16 = vld [vmem:[%s8874_s2 + $0x170] sm:$0xff]   ;;  %v6750_v14 = vld [vmem:[%s8874_s2 + $0x1a8] sm:$0xff]  }
 0x2dc   : > { %5915 = vmatpush3.bf16.msra.mxu1 %v6721_v34  ;;  %5949 = vmatpush3.bf16.msra.mxu0 %v6744_v33  ;;  %v6752_v33 = vld [vmem:[%s8874_s2 + $0x168] sm:$0xff]  }
 0x2dd   : > { %5916 = vmatprep.subr.bf16.mxu1 %v6723_v61  ;;  %6260 = vmatprep.subr.bf16.mxu0 %v8877_v22 }
 0x2e0   : > { %5917 = vmatpush3.bf16.msra.mxu1 %v6725_v51 }
 0x2e1   : > { %5918 = vmatprep.subr.bf16.mxu1 %v6727_v36 }
 0x2e4   : > { %5919 = vmatpush3.bf16.msra.mxu1 %v6729_v41 }
 0x2e5   : > { %5920 = vmatprep.subr.bf16.mxu1 %v6731_v43 }
 0x2e8   : > { %5921 = vmatpush3.bf16.msra.mxu1 %v6733_v28 }
 0x2e9   : > { %5922 = vmatprep.subr.bf16.mxu1 %v6735_v48  ;;  %v6748_v48 = vld [vmem:[%s8874_s2 + $0x138] sm:$0xff]  }
 0x2ec   : > { %5923 = vmatpush3.bf16.msra.mxu1 %v6737_v7 }
 0x2ed   : > { %5924 = vmatprep.subr.bf16.mxu1 %v6739_v38  ;;  %v7625_v38 = vsel %vm810_vm2, %v6747_v42, 0 }
 0x2f0   : > { %5925 = vmatpush3.bf16.msra.mxu1 %v6741_v56 }
 0x2f1   : > { %5926 = vmatprep.subr.bf16.mxu1 %v6743_v57  ;;  %v6751_v57 = vld [vmem:[%s8874_s2 + $0x130] sm:$0xff]  }
 0x2f4   : > { %5927 = vmatpush3.bf16.msra.mxu1 %v6745_v9  ;;  %v6753_v9 = vld [vmem:[%s8874_s2 + $0x1a0] sm:$0xff]  }
 0x2f5   : > { %5956 = vmatprep.subr.bf16.mxu1 %v6746_v15  ;;  %v6754_v15 = vld [vmem:[%s8874_s2 + $0x128] sm:$0xff]  }
 0x377   : > { %v1558_v62 = vpop.f32.mrf.mxu1  ;;  %v1601_v63 = vpop.f32.mrf.mxu0 }
 0x378   : > { %v1559_v24 = vadd.f32 %v1558_v62, %v7608_v21  ;;  %v1602_v18 = vadd.f32 %v1601_v63, %v7608_v21  ;;  %v6755_v62 = vld [vmem:[%s8874_s2 + $0x160] sm:$0xff]   ;;  %v6756_v63 = vld [vmem:[%s8874_s2 + $0x198] sm:$0xff]  }
 0x379   : > { %v1560_v4 = vpop.f32.mrf.mxu1  ;;  %v1603_v1 = vpop.f32.mrf.mxu0 }
 0x37a   : > { %v1561_v12 = vadd.f32 %v1560_v4, %v7608_v21  ;;  %v1604_v20 = vadd.f32 %v1603_v1, %v7608_v21  ;;  %v1694_v36 = vmax.f32 %v1559_v24, 0.0  ;;  %v1696_v41 = vmax.f32 %v1602_v18, 0.0  ;;  %v6757_v4 = vld [vmem:[%s8874_s2 + $0x120] sm:$0xff]   ;;  %v6758_v1 = vld [vmem:[%s8874_s2 + $0x158] sm:$0xff]   ;;  %v6764_v18 = vld [vmem:[%s8874_s2 + $0x148] sm:$0xff]  }
 0x37b   : > { %v1562_v11 = vpop.f32.mrf.mxu1  ;;  %v1605_v40 = vpop.f32.mrf.mxu0 }
 0x37c   : > { %v1563_v49 = vadd.f32 %v1562_v11, %v7606_v5  ;;  %v1606_v53 = vadd.f32 %v1605_v40, %v7606_v5  ;;  %v1695_v31 = vmax.f32 %v1561_v12, 0.0  ;;  %v1697_v34 = vmax.f32 %v1604_v20, 0.0  ;;  %v6759_v11 = vld [vmem:[%s8874_s2 + $0x190] sm:$0xff]   ;;  %v6760_v40 = vld [vmem:[%s8874_s2 + $0x118] sm:$0xff]   ;;  %v6762_v20 = vld [vmem:[%s8874_s2 + $0x188] sm:$0xff]  }
 0x37d   : > { %v1564_v26 = vpop.f32.mrf.mxu1  ;;  %v1607_v58 = vpop.f32.mrf.mxu0  ;;  %v6761_v12 = vld [vmem:[%s8874_s2 + $0x150] sm:$0xff]  }
 0x37e   : > { %v1565_v29 = vadd.f32 %v1564_v26, %v7606_v5  ;;  %v1608_v17 = vadd.f32 %v1607_v58, %v7606_v5  ;;  %v1701_v30 = vmax.f32 %v1563_v49, 0.0  ;;  %v1703_v35 = vmax.f32 %v1606_v53, 0.0  ;;  %v6763_v49 = vld [vmem:[%s8874_s2 + $0x110] sm:$0xff]  }
 0x37f   : > { %v1687_v3 = vpop.f32.mrf.mxu0 }
 0x380   : > { %v1702_v61 = vmax.f32 %v1565_v29, 0.0  ;;  %v1704_v51 = vmax.f32 %v1608_v17, 0.0  ;;  %v1708_v50 = vpack.c.bf16 %v1701_v30, %v1694_v36  ;;  %v1710_v7 = vpack.c.bf16 %v1703_v35, %v1696_v41  ;;  %v6765_v29 = vld [vmem:[%s8874_s2 + $0x180] sm:$0xff]   ;;  %v6766_v17 = vld [vmem:[%s8874_s2 + $0x108] sm:$0xff]  }
 0x381   : > { %v6258_v43 = vpop.f32.mrf.mxu0  ;;  %v1688_v26 = vadd.f32 %v1687_v3, %v7608_v21  ;;  %v6767_v3 = vld [vmem:[%s8874_s2 + $0x140] sm:$0xff]  }
 0x382   : > { %v1709_v28 = vpack.c.bf16 %v1702_v61, %v1695_v31  ;;  %v1711_v37 = vpack.c.bf16 %v1704_v51, %v1697_v34  ;;  %v6768_v41 = vld [vmem:[%s8874_s2 + $0x100] sm:$0xff]  }
 0x383   : > { %v1690_v45 = vpop.f32.mrf.mxu0  ;;  %v1700_v34 = vmax.f32 %v1688_v26, 0.0 }
 0x384   : > { %2081 = vmatprep.mubr.bf16.mxu1 %v1709_v28  ;;  %2122 = vmatprep.mubr.bf16.mxu0 %v1711_v37  ;;  %v1691_v53 = vadd.f32 %v1690_v45, %v7606_v5  ;;  %v6821_v45 = vld [vmem:[%s7045_s25] sm:$0x3f] }
 0x385   : > { %2082 = vmatmul.mubr.bf16.vlgmr.msra.gmra.mxu1 %v1708_v50  ;;  %2123 = vmatmul.mubr.bf16.vlgmr.msra.gmra.mxu0 %v1710_v7  ;;  %v6259_v56 = vpop.f32.mrf.mxu0 }
 0x386   : > { %6261 = vmatpush3.bf16.msra.mxu0 %v7625_v38  ;;  %5957 = vmatpush3.bf16.msra.mxu1 %v6748_v48  ;;  %v1707_v30 = vmax.f32 %v1691_v53, 0.0  ;;  %v232_v56 = vld [vmem:[%s8875_s3 + $0xd0] sm:$0xff] }
 0x387   : > { %6262 = vmatprep.subr.bf16.mxu0 %v8877_v22  ;;  %5958 = vmatprep.subr.bf16.mxu1 %v6749_v16 }
 0x388   : > { %6274 = vmatprep.mubr.msk.bf16.mxu0 %vm6958_vm1, %v8877_v22  ;;  %v1714_v43 = vpack.c.bf16 %v1707_v30, %v1700_v34 }
 0x38a   : > { %6263 = vmatpush3.bf16.msra.mxu0 %v6750_v14  ;;  %5959 = vmatpush3.bf16.msra.mxu1 %v6751_v57  ;;  %v233_v14 = vld [vmem:[%s8875_s3 + $0xd8] sm:$0xff]  ;;  %v234_v57 = vld [vmem:[%s8875_s3 + $0xe0] sm:$0xff] }
 0x38b   : > { %6264 = vmatprep.subr.bf16.mxu0 %v8877_v22  ;;  %5960 = vmatprep.subr.bf16.mxu1 %v6752_v33  ;;  %v235_v33 = vld [vmem:[%s8875_s3 + $0xe8] sm:$0xff] }
 0x38e   : > { %6265 = vmatpush3.bf16.msra.mxu0 %v6753_v9  ;;  %5961 = vmatpush3.bf16.msra.mxu1 %v6754_v15  ;;  %v236_v9 = vld [vmem:[%s8875_s3 + $0xf0] sm:$0xff]  ;;  %v237_v15 = vld [vmem:[%s8875_s3 + $0xf8] sm:$0xff] }
 0x38f   : > { %6266 = vmatprep.subr.bf16.mxu0 %v8877_v22  ;;  %5962 = vmatprep.subr.bf16.mxu1 %v6755_v62  ;;  %v238_v62 = vld [vmem:[%s8875_s3 + $0x100] sm:$0x3] }
 0x392   : > { %6267 = vmatpush3.bf16.msra.mxu0 %v6756_v63  ;;  %5963 = vmatpush3.bf16.msra.mxu1 %v6757_v4 }
 0x393   : > { %6268 = vmatprep.subr.bf16.mxu0 %v8877_v22  ;;  %5964 = vmatprep.subr.bf16.mxu1 %v6758_v1 }
 0x396   : > { %6269 = vmatpush3.bf16.msra.mxu0 %v6759_v11  ;;  %5965 = vmatpush3.bf16.msra.mxu1 %v6760_v40 }
 0x397   : > { %v1644_v24 = vpop.f32.mrf.mxu1  ;;  %6270 = vmatprep.subr.bf16.mxu0 %v8877_v22  ;;  %5966 = vmatprep.subr.bf16.mxu1 %v6761_v12 }
 0x398   : > { %v1645_v61 = vadd.f32 %v1644_v24, %v7608_v21 }
 0x399   : > { %v1646_v58 = vpop.f32.mrf.mxu1 }
 0x39a   : > { %6271 = vmatpush3.bf16.msra.mxu0 %v6762_v20  ;;  %5967 = vmatpush3.bf16.msra.mxu1 %v6763_v49  ;;  %v1647_v42 = vadd.f32 %v1646_v58, %v7608_v21  ;;  %v1698_v50 = vmax.f32 %v1645_v61, 0.0 }
 0x39b   : > { %v1648_v35 = vpop.f32.mrf.mxu1  ;;  %6272 = vmatprep.subr.bf16.mxu0 %v8877_v22  ;;  %5968 = vmatprep.subr.bf16.mxu1 %v6764_v18 }
 0x39c   : > { %v1649_v31 = vadd.f32 %v1648_v35, %v7606_v5  ;;  %v1699_v37 = vmax.f32 %v1647_v42, 0.0 }
 0x39d   : > { %v1650_v51 = vpop.f32.mrf.mxu1 }
 0x39e   : > { %v1651_v36 = vadd.f32 %v1650_v51, %v7606_v5  ;;  %6273 = vmatpush3.bf16.msra.mxu0 %v6765_v29  ;;  %5969 = vmatpush3.bf16.msra.mxu1 %v6766_v17  ;;  %v1705_v28 = vmax.f32 %v1649_v31, 0.0 }
 0x39f   : > { %5970 = vmatprep.subr.bf16.mxu1 %v6767_v3  ;;  %6303 = vmatprep.subr.mxu0 %v8877_v22 }
 0x3a0   : > { %v1706_v48 = vmax.f32 %v1651_v36, 0.0  ;;  %v1712_v16 = vpack.c.bf16 %v1705_v28, %v1698_v50  ;;  %v240_v50 = vld [vmem:[%s8875_s3 + $0x110] sm:$0xff] }
 0x3a1   : > { %6275 = vmatmul.mubr.msk.bf16.vlgmr.msra.gmra.mxu0 %vm2042_vm9, %v1714_v43 }
 0x3a2   : > { %5971 = vmatpush3.bf16.msra.mxu1 %v6768_v41  ;;  %v1713_v7 = vpack.c.bf16 %v1706_v48, %v1699_v37  ;;  %6304 = vmatpush3.msk.msra.mxu0 %vm810_vm2, %v6821_v45  ;;  %v239_v48 = vld [vmem:[%s8875_s3 + $0x108] sm:$0xff]  ;;  %v242_v45 = vld [vmem:[%s8875_s3 + $0x120] sm:$0xff] }
 0x3a3   : > { %6278 = vmatprep.subr.mxu1 %v8877_v22  ;;  %6305 = vmatprep.mubr.msk.f32.mxu0 %vm6958_vm1, %v8877_v22 }
 0x3a4   : > { %2163 = vmatprep.mubr.bf16.mxu1 %v1713_v7  ;;  %6346 = vmatprep.subr.mxu0 %v8877_v22  ;;  %v241_v7 = vld [vmem:[%s8875_s3 + $0x118] sm:$0xff] }
 0x3a5   : > { %2164 = vmatmul.mubr.bf16.vlgmr.msra.gmra.mxu1 %v1712_v16  ;;  %v243_v16 = vld [vmem:[%s8875_s3 + $0x128] sm:$0xff] }
 0x3a6   : > { %6282 = vmatprep.mubr.msk.f32.mxu1 %vm6958_vm1, %v8877_v22 }
 0x3a9   : > { %6306 = vmatmul.mubr.msk.f32.vlgmr.msra.gmra.mxu0 %vm2338_vm10, %v232_v56  ;;  %v244_v56 = vld [vmem:[%s8875_s3 + $0x130] sm:$0xff] }
 0x3aa   : > { %6308 = vmatprep.mubr.msk.f32.mxu0 %vm6958_vm1, %v8877_v22 }
 0x3ad   : > { %6309 = vmatmul.mubr.msk.f32.gmra.mxu0 %vm2338_vm10, %v233_v14  ;;  %v245_v14 = vld [vmem:[%s8875_s3 + $0x138] sm:$0x3] }
 0x3ae   : > { %6311 = vmatprep.mubr.msk.f32.mxu0 %vm6958_vm1, %v8877_v22 }
 0x3b1   : > { %6312 = vmatmul.mubr.msk.f32.gmra.mxu0 %vm2338_vm10, %v234_v57 }
 0x3b2   : > { %6314 = vmatprep.mubr.msk.f32.mxu0 %vm6958_vm1, %v8877_v22 }
 0x3b5   : > { %6315 = vmatmul.mubr.msk.f32.gmra.mxu0 %vm2338_vm10, %v235_v33 }
 0x3b6   : > { %6317 = vmatprep.mubr.msk.f32.mxu0 %vm6958_vm1, %v8877_v22 }
 0x3b9   : > { %6318 = vmatmul.mubr.msk.f32.gmra.mxu0 %vm2338_vm10, %v236_v9 }
 0x3ba   : > { %6320 = vmatprep.mubr.msk.f32.mxu0 %vm6958_vm1, %v8877_v22 }
 0x3bd   : > { %6321 = vmatmul.mubr.msk.f32.gmra.mxu0 %vm2338_vm10, %v237_v15 }
 0x3be   : > { %6323 = vmatprep.mubr.msk.f32.mxu0 %vm6958_vm1, %v8877_v22 }
 0x3c1   : > { %6324 = vmatmul.mubr.msk.f32.gmra.mxu0 %vm2338_vm10, %v238_v62 }
 0x3c2   : > { %6354 = vmatprep.mubr.msk.f32.mxu0 %vm6958_vm1, %v8877_v22 }
 0x445   : > { %v5950_v63 = vpop.f32.mrf.mxu0  ;;  %v5928_v4 = vpop.f32.mrf.mxu1 }
 0x447   : > { %v5951_v1 = vpop.f32.mrf.mxu0  ;;  %v5929_v11 = vpop.f32.mrf.mxu1 }
 0x448   : > { %v5930_v17 = vadd.f32 %v5929_v11, %v5928_v4  ;;  %v5952_v30 = vadd.f32 %v5951_v1, %v5950_v63 }
 0x449   : > { %v5953_v40 = vpop.f32.mrf.mxu0  ;;  %v5931_v12 = vpop.f32.mrf.mxu1 }
 0x44a   : > { %v2125_v61 = vadd.f32 %v5952_v30, %v5930_v17 }
 0x44b   : > { %v5954_v20 = vpop.f32.mrf.mxu0  ;;  %v5932_v53 = vpop.f32.mrf.mxu1 }
 0x44c   : > { %v5933_v35 = vadd.f32 %v5932_v53, %v5931_v12  ;;  %v5955_v3 = vadd.f32 %v5954_v20, %v5953_v40 }
 0x44e   : > { %v2128_v51 = vadd.f32 %v5955_v3, %v5933_v35  ;;  %v7802_v35 = vpop.permute.xlu0 %2490 }
 0x44f   : > { %8892 = vst [vmem:[#allocation4_spill] sm:$0xff] %v7802_v35 }
 0x461   : > { %v2206_v49 = vpop.f32.mrf.mxu0 }
 0x463   : > { %v6276_v24 = vpop.f32.mrf.mxu0 }
 0x464   : > { %v253_v24 = vld [vmem:[%s8875_s3 + $0x178] sm:$0xff] }
 0x465   : > { %v2209_v18 = vpop.f32.mrf.mxu0  ;;  %v5972_v26 = vpop.f32.mrf.mxu1 }
 0x467   : > { %v6277_v58 = vpop.f32.mrf.mxu0  ;;  %v5973_v29 = vpop.f32.mrf.mxu1 }
 0x468   : > { %v5974_v31 = vadd.f32 %v5973_v29, %v5972_v26  ;;  %v7800_v29 = vpop.permute.xlu1 %2495 }
 0x469   : > { %v5975_v42 = vpop.f32.mrf.mxu1  ;;  %v2429_v57 = vpop.f32.mrf.mxu0  ;;  %8891 = vst [vmem:[#allocation3_spill] sm:$0xff] %v7800_v29 }
 0x46a   : > { %v2166_v41 = vadd.f32 %v5974_v31, %v2125_v61 }
 0x46b   : > { %v5976_v34 = vpop.f32.mrf.mxu1  ;;  %v6307_v33 = vpop.f32.mrf.mxu0 }
 0x46c   : > { %v5977_v36 = vadd.f32 %v5976_v34, %v5975_v42  ;;  %v2207_v37 = vadd.f32 %v2206_v49, %v2166_v41  ;;  %v7804_v42 = vpop.permute.xlu1 %2485 }
 0x46d   : > { %v2434_v9 = vpop.f32.mrf.mxu0 }
 0x46e   : > { %v2169_v43 = vadd.f32 %v5977_v36, %v2128_v51  ;;  %v7806_v51 = vpop.permute.xlu0 %2480 }
 0x46f   : > { %v6310_v15 = vpop.f32.mrf.mxu0 }
 0x470   : > { %v2210_v28 = vadd.f32 %v2209_v18, %v2169_v43 }
 0x471   : > { %v2439_v62 = vpop.f32.mrf.mxu0 }
 0x472   : > { %6279 = vmatpush3.msk.msra.mxu1 %vm1499_vm6, %v2210_v28  ;;  %v7808_v28 = vpop.permute.xlu1 %2475  ;;  %v7817_v15 = vpop.permute.xlu0 %2470 }
 0x473   : > { %6280 = vmatprep.subr.mxu1 %v8877_v22  ;;  %v6313_v63 = vpop.f32.mrf.mxu0  ;;  %8893 = vst [vmem:[#allocation5_spill] sm:$0xff] %v7808_v28  ;;  %8894 = vst [vmem:[#allocation6_spill] sm:$0xff] %v7817_v15 }
 0x474   : > { %6281 = vmatpush3.msra.mxu1 %v2207_v37 }
 0x475   : > { %6283 = vmatmul.mubr.msk.f32.vlgmr.msra.gmra.mxu1 %vm2213_vm11, %v239_v48  ;;  %v2444_v4 = vpop.f32.mrf.mxu0 }
 0x476   : > { %6285 = vmatprep.mubr.msk.f32.mxu1 %vm6958_vm1, %v8877_v22 }
 0x477   : > { %v6316_v1 = vpop.f32.mrf.mxu0 }
 0x478   : > { %v7824_v1 = vpop.permute.xlu1 %2465 }
 0x479   : > { %6286 = vmatmul.mubr.msk.f32.gmra.mxu1 %vm2213_vm11, %v240_v50  ;;  %v2449_v11 = vpop.f32.mrf.mxu0  ;;  %8895 = vst [vmem:[#allocation7_spill] sm:$0xff] %v7824_v1 }
 0x47a   : > { %6288 = vmatprep.mubr.msk.f32.mxu1 %vm6958_vm1, %v8877_v22 }
 0x47b   : > { %v6319_v40 = vpop.f32.mrf.mxu0 }
 0x47d   : > { %6289 = vmatmul.mubr.msk.f32.gmra.mxu1 %vm2213_vm11, %v241_v7  ;;  %v2454_v12 = vpop.f32.mrf.mxu0 }
 0x47e   : > { %6291 = vmatprep.mubr.msk.f32.mxu1 %vm6958_vm1, %v8877_v22 }
 0x47f   : > { %v6322_v20 = vpop.f32.mrf.mxu0 }
 0x481   : > { %6292 = vmatmul.mubr.msk.f32.gmra.mxu1 %vm2213_vm11, %v242_v45  ;;  %v2459_v49 = vpop.f32.mrf.mxu0 }
 0x482   : > { %6294 = vmatprep.mubr.msk.f32.mxu1 %vm6958_vm1, %v8877_v22 }
 0x483   : > { %v6325_v53 = vpop.f32.mrf.mxu0 }
 0x485   : > { %6295 = vmatmul.mubr.msk.f32.gmra.mxu1 %vm2213_vm11, %v243_v16 }
 0x486   : > { %6297 = vmatprep.mubr.msk.f32.mxu1 %vm6958_vm1, %v8877_v22 }
 0x489   : > { %6298 = vmatmul.mubr.msk.f32.gmra.mxu1 %vm2213_vm11, %v244_v56 }
 0x48a   : > { %6300 = vmatprep.mubr.msk.f32.mxu1 %vm6958_vm1, %v8877_v22 }
 0x48d   : > { %6301 = vmatmul.mubr.msk.f32.gmra.mxu1 %vm2213_vm11, %v245_v14 }
 0x48e   : > { %6340 = vmatprep.mubr.msk.f32.mxu1 %vm1206_vm5, %v253_v24 }
 0x535   : > { %v2304_v18 = vpop.f32.mrf.mxu1 }
 0x536   : > { %v2430_v56 = vadd.f32 %v2429_v57, %v2304_v18 }
 0x537   : > { %v6284_v26 = vpop.f32.mrf.mxu1 }
 0x538   : > { %v7828_v57 = vadd.f32 %v7824_v1, %v2430_v56 }
 0x539   : > { %v2309_v58 = vpop.f32.mrf.mxu1 }
 0x53a   : > { %v2435_v48 = vadd.f32 %v2434_v9, %v2309_v58 }
 0x53b   : > { %v6287_v17 = vpop.f32.mrf.mxu1 }
 0x53c   : > { %v7820_v63 = vadd.f32 %v7817_v15, %v2435_v48 }
 0x53d   : > { %v2314_v30 = vpop.f32.mrf.mxu1 }
 0x53e   : > { %v2440_v36 = vadd.f32 %v2439_v62, %v2314_v30  ;;  %v2513_v18 = vmin.f32 %v7820_v63, 0.0 }
 0x53f   : > { %v6290_v3 = vpop.f32.mrf.mxu1 }
 0x540   : > { %v7815_v45 = vadd.f32 %v7808_v28, %v2440_v36  ;;  %v2512_v3 = vmin.f32 %v7828_v57, 0.0 }
 0x541   : > { %v2319_v31 = vpop.f32.mrf.mxu1 }
 0x542   : > { %v2445_v61 = vadd.f32 %v2444_v4, %v2319_v31  ;;  %v2519_v36 = vmul.f32 1.442695, %v2512_v3 }
 0x543   : > { %v6293_v34 = vpop.f32.mrf.mxu1 }
 0x544   : > { %v7811_v50 = vadd.f32 %v7806_v51, %v2445_v61  ;;  %v2521_v34 = vmul.f32 1.442695, %v2513_v18 }
 0x545   : > { %v2324_v41 = vpop.f32.mrf.mxu1 }
 0x546   : > { %v2450_v43 = vadd.f32 %v2449_v11, %v2324_v41  ;;  %v2515_v9 = vmin.f32 %v7811_v50, 0.0  ;;  %v2514_v11 = vmin.f32 %v7815_v45, 0.0 }
 0x547   : > { %v6296_v37 = vpop.f32.mrf.mxu1 }
 0x548   : > { %v2502_v7 = vadd.f32 %v7804_v42, %v2450_v43  ;;  %v2525_v26 = vmul.f32 1.442695, %v2515_v9  ;;  %v2523_v30 = vmul.f32 1.442695, %v2514_v11 }
 0x549   : > { %v2329_v16 = vpop.f32.mrf.mxu1 }
 0x54a   : > { %v2516_v14 = vmin.f32 %v2502_v7, 0.0  ;;  %v2455_v33 = vadd.f32 %v2454_v12, %v2329_v16  ;;  %v2509_v18 = vmax.f32 %v2502_v7, 0.0  ;;  %v2506_v7 = vmax.f32 %v7820_v63, 0.0 }
 0x54b   : > { %v6299_v62 = vpop.f32.mrf.mxu1 }
 0x54c   : > { %v2503_v4 = vadd.f32 %v7802_v35, %v2455_v33  ;;  %v2527_v40 = vmul.f32 1.442695, %v2516_v14 }
 0x54d   : > { %v2334_v20 = vpop.f32.mrf.mxu1 }
 0x54e   : > { %v2517_v12 = vmin.f32 %v2503_v4, 0.0  ;;  %v2460_v53 = vadd.f32 %v2459_v49, %v2334_v20  ;;  %6769 = vpow2.f32 %v2527_v40  ;;  %v2510_v11 = vmax.f32 %v2503_v4, 0.0 }
 0x54f   : > { %v6302_v24 = vpop.f32.mrf.mxu1 }
 0x550   : > { %v2529_v58 = vmul.f32 1.442695, %v2517_v12  ;;  %v2504_v17 = vadd.f32 %v7800_v29, %v2460_v53 }
 0x552   : > { %6771 = vpow2.f32 %v2529_v58  ;;  %v2518_v31 = vmin.f32 %v2504_v17, 0.0  ;;  %v2511_v40 = vmax.f32 %v2504_v17, 0.0 }
 0x553   : > { %6773 = vpow2.f32 %v2525_v26 }
 0x554   : > { %v2531_v61 = vmul.f32 1.442695, %v2518_v31  ;;  %6775 = vpow2.f32 %v2523_v30  ;;  %v2508_v31 = vmax.f32 %v7811_v50, 0.0 }
 0x556   : > { %6777 = vpow2.f32 %v2531_v61 }
 0x557   : > { %6779 = vpow2.f32 %v2521_v34 }
 0x558   : > { %6781 = vpow2.f32 %v2519_v36 }
 0x55b   : > { %v6770_v49 = vpop.eup %6769 }
 0x55c   : > { %v5768_v16 = vadd.f32 -1.0, %v6770_v49 }
 0x55e   : > { %v2544_v12 = vmul.f32 1.6732632, %v5768_v16  ;;  %v2505_v16 = vmax.f32 %v7828_v57, 0.0  ;;  %v255_v57 = vld [vmem:[%s8875_s3 + $0x188] sm:$0xff] }
 0x55f   : > { %v6772_v41 = vpop.eup %6771 }
 0x560   : > { %v5769_v43 = vadd.f32 -1.0, %v6772_v41  ;;  %v6774_v37 = vpop.eup %6773  ;;  %v2551_v61 = vadd.f32 %v2544_v12, %v2509_v18  ;;  %v2507_v41 = vmax.f32 %v7815_v45, 0.0 }
 0x561   : > { %v6776_v48 = vpop.eup %6775  ;;  %v5767_v62 = vadd.f32 -1.0, %v6774_v37 }
 0x562   : > { %v2545_v33 = vmul.f32 1.6732632, %v5769_v43  ;;  %v5766_v53 = vadd.f32 -1.0, %v6776_v48  ;;  %v2558_v37 = vmul.f32 1.050701, %v2551_v61 }
 0x563   : > { %v6778_v56 = vpop.eup %6777  ;;  %v2543_v30 = vmul.f32 1.6732632, %v5767_v62 }
 0x564   : > { %v5770_v14 = vadd.f32 -1.0, %v6778_v56  ;;  %v6780_v9 = vpop.eup %6779  ;;  %v2552_v58 = vadd.f32 %v2545_v33, %v2510_v11  ;;  %v2542_v36 = vmul.f32 1.6732632, %v5766_v53  ;;  %v256_v11 = vld [vmem:[%s8875_s3 + $0x190] sm:$0x1] }
 0x565   : > { %v6782_v24 = vpop.eup %6781  ;;  %v5765_v3 = vadd.f32 -1.0, %v6780_v9  ;;  %v2550_v17 = vadd.f32 %v2543_v30, %v2508_v31  ;;  %v254_v9 = vld [vmem:[%s8875_s3 + $0x180] sm:$0xff] }
 0x566   : > { %v2546_v20 = vmul.f32 1.6732632, %v5770_v14  ;;  %v5764_v49 = vadd.f32 -1.0, %v6782_v24  ;;  %v2559_v4 = vmul.f32 1.050701, %v2552_v58  ;;  %v2549_v48 = vadd.f32 %v2542_v36, %v2507_v41 }
 0x567   : > { %v2541_v43 = vmul.f32 1.6732632, %v5765_v3  ;;  %v2557_v56 = vmul.f32 1.050701, %v2550_v17 }
 0x568   : > { %v2553_v26 = vadd.f32 %v2546_v20, %v2511_v40  ;;  %v2540_v50 = vmul.f32 1.6732632, %v5764_v49  ;;  %v2556_v45 = vmul.f32 1.050701, %v2549_v48  ;;  %v7854_v40 = vpop.permute.xlu0 %2578  ;;  %v7856_v20 = vpop.permute.xlu1 %2573 }
 0x569   : > { %v2548_v14 = vadd.f32 %v2541_v43, %v2506_v7  ;;  %8896 = vst [vmem:[#allocation8_spill] sm:$0xff] %v7854_v40  ;;  %8897 = vst [vmem:[#allocation9_spill] sm:$0xff] %v7856_v20 }
 0x56a   : > { %v2560_v34 = vmul.f32 1.050701, %v2553_v26  ;;  %v2547_v33 = vadd.f32 %v2540_v50, %v2505_v16 }
 0x56b   : > { %v2555_v62 = vmul.f32 1.050701, %v2548_v14 }
 0x56c   : > { %6326 = vmatprep.subr.msk.mxu1 %vm2593_vm12, %v2560_v34  ;;  %v2554_v63 = vmul.f32 1.050701, %v2547_v33  ;;  %v7858_v12 = vpop.permute.xlu0 %2568  ;;  %v7861_v18 = vpop.permute.xlu1 %2563 }
 0x56d   : > { %6327 = vmatpush3.msk.msra.mxu1 %vm2593_vm12, %v2560_v34  ;;  %8898 = vst [vmem:[#allocation10_spill] sm:$0xff] %v7858_v12  ;;  %8899 = vst [vmem:[#allocation11_spill] sm:$0xff] %v7861_v18 }
 0x56e   : > { %6328 = vmatprep.subr.mxu1 %v2559_v4 }
 0x56f   : > { %6329 = vmatpush3.msra.mxu1 %v2559_v4 }
 0x570   : > { %6330 = vmatprep.subr.mxu1 %v2558_v37 }
 0x571   : > { %6331 = vmatpush3.msra.mxu1 %v2558_v37 }
 0x572   : > { %6332 = vmatprep.subr.mxu1 %v2557_v56 }
 0x573   : > { %6333 = vmatpush3.msra.mxu1 %v2557_v56 }
 0x574   : > { %6334 = vmatprep.subr.mxu1 %v2556_v45 }
 0x575   : > { %6335 = vmatpush3.msra.mxu1 %v2556_v45 }
 0x576   : > { %6336 = vmatprep.subr.mxu1 %v2555_v62 }
 0x577   : > { %6337 = vmatpush3.msra.mxu1 %v2555_v62 }
 0x578   : > { %6338 = vmatprep.subr.mxu1 %v2554_v63 }
 0x579   : > { %6339 = vmatpush3.msra.mxu1 %v2554_v63 }
 0x57a   : > { %6341 = vmatmul.mubr.msk.f32.vlgmr.msra.gmra.mxu1 %vm1206_vm5, %v254_v9  ;;  %6357 = vmatprep.subr.mxu1 %v8877_v22 }
 0x57b   : > { %6343 = vmatprep.mubr.msk.f32.mxu1 %vm1206_vm5, %v255_v57 }
 0x57e   : > { %6344 = vmatmul.mubr.msk.f32.gmra.mxu1 %vm1206_vm5, %v256_v11 }
 0x57f   : > { %6365 = vmatprep.mubr.msk.f32.mxu1 %vm6958_vm1, %v8877_v22 }
 0x63a   : > { %v6342_v53 = vpop.f32.mrf.mxu1 }
 0x63b   : > { %v2669_v24 = vadd.f32 %v6342_v53, %v7858_v12 }
 0x63c   : > { %v2663_v26 = vpop.f32.mrf.mxu1 }
 0x63d   : > { %v2687_v58 = vmin.f32 %v2669_v24, 0.0  ;;  %v2664_v30 = vadd.f32 %v2663_v26, %v7861_v18  ;;  %v2683_v11 = vmax.f32 %v2669_v24, 0.0  ;;  %v261_v24 = vld [vmem:[%s8875_s3 + $0x1b8] sm:$0x3f] }
 0x63e   : > { %v6345_v3 = vpop.f32.mrf.mxu1 }
 0x63f   : > { %v2692_v31 = vmul.f32 1.442695, %v2687_v58  ;;  %v2686_v34 = vmin.f32 %v2664_v30, 0.0  ;;  %v2679_v61 = vadd.f32 %v6345_v3, %v7854_v40 }
 0x640   : > { %v2673_v36 = vpop.f32.mrf.mxu1 }
 0x641   : > { %v2690_v49 = vmul.f32 1.442695, %v2686_v34  ;;  %v2689_v41 = vmin.f32 %v2679_v61, 0.0  ;;  %6783 = vpow2.f32 %v2692_v31  ;;  %v2674_v4 = vadd.f32 %v2673_v36, %v7856_v20 }
 0x642   : > { %v2685_v33 = vmax.f32 %v2679_v61, 0.0  ;;  %v2682_v34 = vmax.f32 %v2664_v30, 0.0  ;;  %v280_v30 = vld [vmem:[%s8875_s3 + $0x250] sm:$0x3f] }
 0x643   : > { %v2696_v17 = vmul.f32 1.442695, %v2689_v41  ;;  %6785 = vpow2.f32 %v2690_v49  ;;  %v2688_v43 = vmin.f32 %v2674_v4, 0.0  ;;  %v2684_v26 = vmax.f32 %v2674_v4, 0.0  ;;  %v284_v4 = vld [vmem:[%s8875_s3 + $0x270] sm:$0x3f] }
 0x644   : > { %6358 = vmatpush3.msk.msra.mxu1 %vm2808_vm13, %v284_v4  ;;  %v300_v4 = vld [vmem:[%s8875_s3 + $0x2f0] sm:$0x3f] }
 0x645   : > { %6787 = vpow2.f32 %v2696_v17  ;;  %v2694_v7 = vmul.f32 1.442695, %v2688_v43  ;;  %v279_v43 = vld [vmem:[%s8875_s3 + $0x248] sm:$0xff]  ;;  %6359 = vmatprep.subr.mxu1 %v8877_v22 }
 0x647   : > { %6789 = vpow2.f32 %v2694_v7  ;;  %v283_v7 = vld [vmem:[%s8875_s3 + $0x268] sm:$0xff] }
 0x648   : > { %6360 = vmatpush3.msra.mxu1 %v283_v7  ;;  %v296_v7 = vld [vmem:[%s8875_s3 + $0x2d0] sm:$0x3f] }
 0x649   : > { %6361 = vmatprep.subr.mxu1 %v8877_v22 }
 0x64e   : > { %v6784_v37 = vpop.eup %6783 }
 0x64f   : > { %v5777_v16 = vadd.f32 -1.0, %v6784_v37  ;;  %v278_v37 = vld [vmem:[%s8875_s3 + $0x240] sm:$0xff] }
 0x650   : > { %v6786_v48 = vpop.eup %6785 }
 0x651   : > { %v5776_v14 = vadd.f32 -1.0, %v6786_v48  ;;  %v2703_v63 = vmul.f32 1.6732632, %v5777_v16  ;;  %v282_v48 = vld [vmem:[%s8875_s3 + $0x260] sm:$0xff]  ;;  %v281_v16 = vld [vmem:[%s8875_s3 + $0x258] sm:$0xff] }
 0x652   : > { %v6788_v50 = vpop.eup %6787  ;;  %6362 = vmatpush3.msra.mxu1 %v282_v48  ;;  %v295_v48 = vld [vmem:[%s8875_s3 + $0x2c8] sm:$0xff] }
 0x653   : > { %v5779_v56 = vadd.f32 -1.0, %v6788_v50  ;;  %v2702_v53 = vmul.f32 1.6732632, %v5776_v14  ;;  %v2707_v31 = vadd.f32 %v2703_v63, %v2683_v11  ;;  %v277_v50 = vld [vmem:[%s8875_s3 + $0x238] sm:$0xff]  ;;  %6363 = vmatprep.subr.mxu1 %v8877_v22 }
 0x654   : > { %v6790_v45 = vpop.eup %6789  ;;  %6364 = vmatpush3.msra.mxu1 %v281_v16  ;;  %v294_v16 = vld [vmem:[%s8875_s3 + $0x2c0] sm:$0xff] }
 0x655   : > { %v2705_v62 = vmul.f32 1.6732632, %v5779_v56  ;;  %v5778_v9 = vadd.f32 -1.0, %v6790_v45  ;;  %v2706_v49 = vadd.f32 %v2702_v53, %v2682_v34  ;;  %v2711_v17 = vmul.f32 1.050701, %v2707_v31  ;;  %6379 = vmatprep.subr.mxu1 %v8877_v22  ;;  %v7911_v56 = vpop.permute.xlu0 %2716 }
 0x656   : > { %8900 = vst [vmem:[#allocation12_spill] sm:$0xff] %v7911_v56  ;;  %v288_v34 = vld [vmem:[%s8875_s3 + $0x290] sm:$0x3f] }
 0x657   : > { %v2709_v57 = vadd.f32 %v2705_v62, %v2685_v33  ;;  %v2704_v58 = vmul.f32 1.6732632, %v5778_v9  ;;  %v2710_v61 = vmul.f32 1.050701, %v2706_v49  ;;  %v287_v49 = vld [vmem:[%s8875_s3 + $0x288] sm:$0xff] }
 0x659   : > { %v2713_v3 = vmul.f32 1.050701, %v2709_v57  ;;  %v2708_v36 = vadd.f32 %v2704_v58, %v2684_v26 }
 0x65b   : > { %6347 = vmatpush3.msk.msra.mxu0 %vm1213_vm4, %v2713_v3  ;;  %v2712_v41 = vmul.f32 1.050701, %v2708_v36  ;;  %v292_v3 = vld [vmem:[%s8875_s3 + $0x2b0] sm:$0x3f]  ;;  %v291_v36 = vld [vmem:[%s8875_s3 + $0x2a8] sm:$0xff] }
 0x65c   : > { %6348 = vmatprep.subr.mxu0 %v8877_v22 }
 0x65d   : > { %6349 = vmatpush3.msra.mxu0 %v2712_v41  ;;  %v290_v41 = vld [vmem:[%s8875_s3 + $0x2a0] sm:$0xff] }
 0x65e   : > { %6350 = vmatprep.subr.mxu0 %v8877_v22 }
 0x65f   : > { %6351 = vmatpush3.msra.mxu0 %v2711_v17  ;;  %v286_v17 = vld [vmem:[%s8875_s3 + $0x280] sm:$0xff] }
 0x660   : > { %6352 = vmatprep.subr.mxu0 %v8877_v22 }
 0x661   : > { %6353 = vmatpush3.msra.mxu0 %v2710_v61  ;;  %v289_v61 = vld [vmem:[%s8875_s3 + $0x298] sm:$0xff] }
 0x662   : > { %6355 = vmatmul.mubr.msk.f32.vlgmr.msra.gmra.mxu0 %vm1495_vm8, %v261_v24  ;;  %6368 = vmatprep.subr.mxu0 %v8877_v22 }
 0x663   : > { %6376 = vmatprep.mubr.msk.f32.mxu0 %vm6958_vm1, %v8877_v22  ;;  %6369 = vmatpush3.msk.msra.mxu0 %vm2808_vm13, %v280_v30  ;;  %v285_v30 = vld [vmem:[%s8875_s3 + $0x278] sm:$0xff] }
 0x664   : > { %6370 = vmatprep.subr.mxu0 %v8877_v22 }
 0x665   : > { %6371 = vmatpush3.msra.mxu0 %v279_v43 }
 0x666   : > { %6372 = vmatprep.subr.mxu0 %v8877_v22 }
 0x667   : > { %6373 = vmatpush3.msra.mxu0 %v278_v37  ;;  %v299_v37 = vld [vmem:[%s8875_s3 + $0x2e8] sm:$0xff] }
 0x668   : > { %6374 = vmatprep.subr.mxu0 %v8877_v22 }
 0x669   : > { %6375 = vmatpush3.msra.mxu0 %v277_v50  ;;  %v298_v50 = vld [vmem:[%s8875_s3 + $0x2e0] sm:$0xff] }
 0x66a   : > { %6390 = vmatprep.subr.mxu0 %v8877_v22 }
 0x722   : > { %v2791_v14 = vpop.f32.mrf.mxu0 }
 0x723   : > { %v2792_v45 = vadd.f32 %v2791_v14, %v7911_v56  ;;  %v297_v14 = vld [vmem:[%s8875_s3 + $0x2d8] sm:$0xff] }
 0x724   : > { %v6356_v33 = vpop.f32.mrf.mxu0 }
 0x725   : > { %v2796_v62 = vmin.f32 %v2792_v45, 0.0  ;;  %v2795_v11 = vmax.f32 %v2792_v45, 0.0  ;;  %v293_v33 = vld [vmem:[%s8875_s3 + $0x2b8] sm:$0xff] }
 0x727   : > { %v2797_v63 = vmul.f32 1.442695, %v2796_v62  ;;  %v6822_v62 = vld [vmem:[%s8873_s1 + $0xb4] ss:$28 sps:$4 sm:$0xff]  }
 0x729   : > { %6791 = vpow2.f32 %v2797_v63 }
 0x736   : > { %v6792_v9 = vpop.eup %6791 }
 0x737   : > { %v5782_v57 = vadd.f32 -1.0, %v6792_v9  ;;  %v6823_v9 = vld [vmem:[%s8873_s1 + $0xb0] ss:$28 sps:$4 sm:$0xff]  }
 0x739   : > { %v2800_v53 = vmul.f32 1.6732632, %v5782_v57  ;;  %v6824_v57 = vld [vmem:[%s8873_s1 + $0xac] ss:$28 sps:$4 sm:$0xff]  }
 0x73b   : > { %v2801_v26 = vadd.f32 %v2800_v53, %v2795_v11  ;;  %v6825_v11 = vld [vmem:[%s8873_s1 + $0xa8] ss:$28 sps:$4 sm:$0xff]   ;;  %v6826_v53 = vld [vmem:[%s8873_s1 + $0x7c] ss:$28 sps:$4 sm:$0xff]  }
 0x73d   : > { %v7914_v58 = vmul.f32 1.050701, %v2801_v26  ;;  %v6827_v26 = vld [vmem:[%s8873_s1 + $0x74] ss:$28 sps:$4 sm:$0xff]  }
 0x73f   : > { %6377 = vmatmul.mubr.msk.f32.vlgmr.msra.gmra.mxu0 %vm2805_vm14, %v7914_v58  ;;  %v2804_v31 = vrot.slane %v7914_v58, 1  ;;  %v3034_v24 = vrot.slane %v7914_v58, 3  ;;  %v2957_v43 = vrot.slane %v7914_v58, 2  ;;  %v3188_v45 = vrot.slane %v7914_v58, 5 }
 0x740   : > { %6391 = vmatpush3.msk.msra.mxu0 %vm2808_vm13, %v292_v3  ;;  %6398 = vmatprep.mubr.msk.f32.mxu0 %vm6958_vm1, %v8877_v22  ;;  %v3111_v63 = vrot.slane %v7914_v58, 4  ;;  %v6828_v58 = vld [vmem:[%s8873_s1 + $0x78] ss:$28 sps:$4 sm:$0xff]   ;;  %v6829_v3 = vld [vmem:[%s8873_s1 + $0x44] ss:$28 sps:$4 sm:$0xff]  }
 0x741   : > { %6392 = vmatprep.subr.mxu0 %v8877_v22  ;;  %6366 = vmatmul.mubr.msk.f32.vlgmr.msra.gmra.mxu1 %vm2805_vm14, %v2804_v31  ;;  %v6830_v31 = vld [vmem:[%s8873_s1 + $0x70] ss:$28 sps:$4 sm:$0xff]  }
 0x742   : > { %6380 = vmatpush3.msk.msra.mxu1 %vm2808_vm13, %v288_v34  ;;  %6393 = vmatpush3.msra.mxu0 %v291_v36  ;;  %v6831_v34 = vld [vmem:[%s8873_s1 + $0x3c] ss:$28 sps:$4 sm:$0xff]   ;;  %v5795_v36 = vld [vmem:[%s7045_s25 + $0x8] sm:$0x3f] }
 0x743   : > { %6381 = vmatprep.subr.mxu1 %v8877_v22  ;;  %6394 = vmatprep.subr.mxu0 %v8877_v22 }
 0x744   : > { %6382 = vmatpush3.msra.mxu1 %v287_v49  ;;  %6395 = vmatpush3.msra.mxu0 %v290_v41  ;;  %v6832_v49 = vld [vmem:[%s8873_s1 + $0x40] ss:$28 sps:$4 sm:$0xff]   ;;  %v6833_v41 = vld [vmem:[%s8873_s1 + $0xc] ss:$28 sps:$4 sm:$0xff]  }
 0x745   : > { %6383 = vmatprep.subr.mxu1 %v8877_v22  ;;  %6396 = vmatprep.subr.mxu0 %v8877_v22 }
 0x746   : > { %6384 = vmatpush3.msra.mxu1 %v286_v17  ;;  %6397 = vmatpush3.msra.mxu0 %v289_v61  ;;  %v6834_v17 = vld [vmem:[%s8873_s1 + $0x38] ss:$28 sps:$4 sm:$0xff]   ;;  %v3269_v61 = vpack.c.bf16 %v5795_v36, %v5795_v36 }
 0x747   : > { %6385 = vmatprep.subr.mxu1 %v8877_v22  ;;  %6399 = vmatmul.mubr.msk.f32.vlgmr.msra.gmra.mxu0 %vm2805_vm14, %v3034_v24  ;;  %v6835_v24 = vld [vmem:[%s8873_s1 + $0x4] ss:$28 sps:$4 sm:$0xff]  }
 0x748   : > { %6412 = vmatprep.subr.mxu0 %v8877_v22  ;;  %6386 = vmatpush3.msra.mxu1 %v285_v30  ;;  %v6836_v30 = vld [vmem:[%s8873_s1 + $0x8] ss:$28 sps:$4 sm:$0xff]  }
 0x749   : > { %6387 = vmatprep.mubr.msk.f32.mxu1 %vm6958_vm1, %v8877_v22  ;;  %6413 = vmatpush3.msk.msra.mxu0 %vm2808_vm13, %v300_v4  ;;  %v6837_v4 = vld [vmem:[%s8873_s1] ss:$28 sps:$4 sm:$0xff]  }
 0x74a   : > { %6388 = vmatmul.mubr.msk.f32.vlgmr.msra.gmra.mxu1 %vm2805_vm14, %v2957_v43  ;;  %6401 = vmatprep.subr.mxu1 %v8877_v22  ;;  %v6838_v43 = vld [vmem:[%s8873_s1 + $0xbc] ss:$28 sps:$4 sm:$0xff]  }
 0x74b   : > { %6414 = vmatprep.subr.mxu0 %v8877_v22  ;;  %6402 = vmatpush3.msk.msra.mxu1 %vm2808_vm13, %v296_v7  ;;  %v6839_v7 = vld [vmem:[%s8873_s1 + $0xc0] ss:$28 sps:$4 sm:$0xff]  }
 0x74c   : > { %6415 = vmatpush3.msra.mxu0 %v299_v37  ;;  %6403 = vmatprep.subr.mxu1 %v8877_v22  ;;  %v6840_v37 = vld [vmem:[%s8873_s1 + $0xb8] ss:$28 sps:$4 sm:$0xff]  }
 0x74d   : > { %6416 = vmatprep.subr.mxu0 %v8877_v22  ;;  %6404 = vmatpush3.msra.mxu1 %v295_v48  ;;  %v6841_v48 = vld [vmem:[%s8873_s1 + $0x84] ss:$28 sps:$4 sm:$0xff]  }
 0x74e   : > { %6417 = vmatpush3.msra.mxu0 %v298_v50  ;;  %6405 = vmatprep.subr.mxu1 %v8877_v22  ;;  %v6842_v50 = vld [vmem:[%s8873_s1 + $0x88] ss:$28 sps:$4 sm:$0xff]  }
 0x74f   : > { %6418 = vmatprep.subr.mxu0 %v8877_v22  ;;  %6406 = vmatpush3.msra.mxu1 %v294_v16  ;;  %v6843_v16 = vld [vmem:[%s8873_s1 + $0x80] ss:$28 sps:$4 sm:$0xff]  }
 0x750   : > { %6419 = vmatpush3.msra.mxu0 %v297_v14  ;;  %6420 = vmatprep.mubr.msk.f32.mxu0 %vm6958_vm1, %v8877_v22  ;;  %v6844_v14 = vld [vmem:[%s8873_s1 + $0x4c] ss:$28 sps:$4 sm:$0xff]  }
 0x751   : > { %6407 = vmatprep.subr.mxu1 %v8877_v22  ;;  %6421 = vmatmul.mubr.msk.f32.vlgmr.msra.gmra.mxu0 %vm2805_vm14, %v3188_v45  ;;  %v6845_v45 = vld [vmem:[%s8873_s1 + $0x50] ss:$28 sps:$4 sm:$0xff]  }
 0x752   : > { %3322 = vmatprep.subr.bf16.mxu0 %v6822_v62  ;;  %6408 = vmatpush3.msra.mxu1 %v293_v33  ;;  %v6846_v33 = vld [vmem:[%s8873_s1 + $0x48] ss:$28 sps:$4 sm:$0xff]   ;;  %v6847_v62 = vld [vmem:[%s8873_s1 + $0x14] ss:$28 sps:$4 sm:$0xff]  }
 0x753   : > { %6409 = vmatprep.mubr.msk.f32.mxu1 %vm6958_vm1, %v8877_v22  ;;  %3323 = vmatpush1.bf16.msra.mxu0 %v6823_v9  ;;  %v6849_v9 = vld [vmem:[%s8873_s1 + $0x10] ss:$28 sps:$4 sm:$0xff]  }
 0x754   : > { %6410 = vmatmul.mubr.msk.f32.vlgmr.msra.gmra.mxu1 %vm2805_vm14, %v3111_v63  ;;  %3281 = vmatprep.subr.bf16.mxu1 %v6824_v57  ;;  %v6848_v63 = vld [vmem:[%s8873_s1 + $0x18] ss:$28 sps:$4 sm:$0xff]  }
 0x755   : > { %3282 = vmatpush1.bf16.msra.mxu1 %v6825_v11  ;;  %3324 = vmatprep.subr.bf16.mxu0 %v6826_v53 }
 0x756   : > { %3283 = vmatprep.subr.bf16.mxu1 %v6827_v26  ;;  %3346 = vmatprep.mubr.bf16.mxu0 %v8879_v2 }
 0x757   : > { %3325 = vmatpush1.bf16.msra.mxu0 %v6828_v58  ;;  %3305 = vmatprep.mubr.bf16.mxu1 %v8879_v2 }
 0x758   : > { %3326 = vmatprep.subr.bf16.mxu0 %v6829_v3 }
 0x759   : > { %3284 = vmatpush1.bf16.msra.mxu1 %v6830_v31 }
 0x75a   : > { %3285 = vmatprep.subr.bf16.mxu1 %v6831_v34 }
 0x75b   : > { %3327 = vmatpush1.bf16.msra.mxu0 %v6832_v49 }
 0x75c   : > { %3328 = vmatprep.subr.bf16.mxu0 %v6833_v41 }
 0x75d   : > { %3286 = vmatpush1.bf16.msra.mxu1 %v6834_v17 }
 0x75e   : > { %3287 = vmatprep.subr.bf16.mxu1 %v6835_v24 }
 0x75f   : > { %3329 = vmatpush1.bf16.msra.mxu0 %v6836_v30 }
 0x760   : > { %6423 = vmatprep.subr.bf16.mxu0 %v8877_v22 }
 0x761   : > { %3288 = vmatpush1.bf16.msra.mxu1 %v6837_v4 }
 0x762   : > { %5797 = vmatmul.mubr.msk.bf16.vlgmr.msra.gmra.mxu0 %vm588_vm0, %v3269_v61  ;;  %3363 = vmatprep.subr.bf16.mxu1 %v6838_v43 }
 0x763   : > { %6424 = vmatpush3.bf16.msra.mxu0 %v6839_v7  ;;  %6431 = vmatprep.mubr.msk.bf16.mxu0 %vm6958_vm1, %v8877_v22 }
 0x764   : > { %5796 = vmatmul.mubr.msk.bf16.vlgmr.msra.gmra.mxu1 %vm588_vm0, %v3269_v61  ;;  %6425 = vmatprep.subr.bf16.mxu0 %v8877_v22 }
 0x765   : > { %3364 = vmatpush1.bf16.msra.mxu1 %v6840_v37  ;;  %3387 = vmatprep.mubr.bf16.mxu1 %v8879_v2 }
 0x766   : > { %3365 = vmatprep.subr.bf16.mxu1 %v6841_v48 }
 0x767   : > { %6426 = vmatpush3.bf16.msra.mxu0 %v6842_v50 }
 0x768   : > { %6427 = vmatprep.subr.bf16.mxu0 %v8877_v22 }
 0x769   : > { %3366 = vmatpush1.bf16.msra.mxu1 %v6843_v16 }
 0x76a   : > { %3367 = vmatprep.subr.bf16.mxu1 %v6844_v14 }
 0x76b   : > { %6428 = vmatpush3.bf16.msra.mxu0 %v6845_v45 }
 0x76c   : > { %6429 = vmatprep.subr.bf16.mxu0 %v8877_v22 }
 0x76d   : > { %3368 = vmatpush1.bf16.msra.mxu1 %v6846_v33 }
 0x76e   : > { %3369 = vmatprep.subr.bf16.mxu1 %v6847_v62 }
 0x76f   : > { %6430 = vmatpush3.bf16.msra.mxu0 %v6848_v63 }
 0x771   : > { %3370 = vmatpush1.bf16.msra.mxu1 %v6849_v9 }
 0x772   : > { %6432 = vmatmul.mubr.msk.bf16.vlgmr.msra.gmra.mxu0 %vm588_vm0, %v3269_v61 }
 0x773   : > { %3567 = vmatprep.mubr.bf16.mxu0 %v8879_v2 }
 0x774   : > { %5798 = vmatmul.mubr.msk.bf16.vlgmr.msra.gmra.mxu1 %vm588_vm0, %v3269_v61  ;;  %vm5563_vm0 = vcmask 33792  }
 0x775   : > { %3496 = vmatprep.mubr.bf16.mxu1 %v8879_v2 }
 0x7ff   : > { %v2953_v57 = vpop.f32.mrf.mxu0 }
 0x801   : > { %v2878_v11 = vpop.f32.mrf.mxu1  ;;  %v6378_v53 = vpop.f32.mrf.mxu0 }
 0x802   : > { %v2954_v36 = vadd.f32 %v2953_v57, %v2878_v11 }
 0x803   : > { %v6367_v26 = vpop.f32.mrf.mxu1 }
 0x807   : > { %v3106_v58 = vpop.f32.mrf.mxu0 }
 0x809   : > { %v6400_v3 = vpop.f32.mrf.mxu0 }
 0x80a   : > { %v3029_v31 = vpop.f32.mrf.mxu1 }
 0x80b   : > { %v3033_v49 = vadd.f32 %v3029_v31, %v2954_v36 }
 0x80c   : > { %v6389_v34 = vpop.f32.mrf.mxu1 }
 0x80d   : > { %v3110_v17 = vadd.f32 %v3106_v58, %v3033_v49 }
 0x811   : > { %v3260_v41 = vpop.f32.mrf.mxu0 }
 0x813   : > { %v6422_v24 = vpop.f32.mrf.mxu0 }
 0x814   : > { %v3183_v30 = vpop.f32.mrf.mxu1 }
 0x815   : > { %v3187_v4 = vadd.f32 %v3183_v30, %v3110_v17 }
 0x816   : > { %v6411_v43 = vpop.f32.mrf.mxu1 }
 0x817   : > { %v3264_v61 = vadd.f32 %v3260_v41, %v3187_v4 }
 0x819   : > { %3266 = vst.msk [vmem:[#allocation2] sm:$0x1] %vm3265_vm15, %v3264_v61 }
 0x822   : > { %v3348_v7 = vpop.f32.mrf.mxu0 }
 0x823   : > { %v3438_v37 = vpack.c.bf16 %v3348_v7, %v3348_v7 }
 0x824   : > { %v3307_v48 = vpop.f32.mrf.mxu1  ;;  %v3350_v50 = vpop.f32.mrf.mxu0 }
 0x825   : > { %v3450_v16 = vsel %vm810_vm2, %v3438_v37, 0  ;;  %v3436_v14 = vpack.c.bf16 %v3307_v48, %v3307_v48  ;;  %v3439_v45 = vpack.c.bf16 %v3350_v50, %v3350_v50 }
 0x826   : > { %v3309_v33 = vpop.f32.mrf.mxu1  ;;  %v3352_v62 = vpop.f32.mrf.mxu0 }
 0x827   : > { %v3437_v63 = vpack.c.bf16 %v3309_v33, %v3309_v33  ;;  %5805 = vmatprep.subr.msk.bf16.mxu0 %vm810_vm2, %v3439_v45  ;;  %v3444_v11 = vsel %vm810_vm2, %v3436_v14, 0 }
 0x828   : > { %v3311_v9 = vpop.f32.mrf.mxu1  ;;  %3550 = vmatpush1.bf16.msra.mxu0 %v3450_v16  ;;  %v3353_v57 = vpop.f32.mrf.mxu0 }
 0x829   : > { %5800 = vmatprep.subr.msk.bf16.mxu1 %vm810_vm2, %v3437_v63 }
 0x82a   : > { %v3312_v53 = vpop.f32.mrf.mxu1  ;;  %3479 = vmatpush1.bf16.msra.mxu1 %v3444_v11 }
 0x82b   : > { %5806 = vmatmul.mubr.msk.bf16.vlgmr.msra.gmra.mxu0 %vm797_vm3, %v7188_v8 }
 0x82c   : > { %3577 = vmatprep.mubr.bf16.mxu0 %v8879_v2 }
 0x82d   : > { %5801 = vmatmul.mubr.msk.bf16.vlgmr.msra.gmra.mxu1 %vm797_vm3, %v7188_v8 }
 0x82e   : > { %3506 = vmatprep.mubr.bf16.mxu1 %v8879_v2 }
 0x832   : > { %v3430_v26 = vpop.f32.mrf.mxu0 }
 0x833   : > { %5807 = vmatmul.mubr.msk.bf16.gmra.mxu0 %vm797_vm3, %v7202_v13  ;;  %v3442_v58 = vpack.c.bf16 %v3430_v26, %v3430_v26 }
 0x834   : > { %v3389_v3 = vpop.f32.mrf.mxu1  ;;  %3587 = vmatprep.mubr.bf16.mxu0 %v8879_v2  ;;  %v6433_v31 = vpop.f32.mrf.mxu0 }
 0x835   : > { %5802 = vmatmul.mubr.msk.bf16.gmra.mxu1 %vm797_vm3, %v7202_v13  ;;  %v3440_v34 = vpack.c.bf16 %v3389_v3, %v3389_v3  ;;  %v3462_v36 = vsel %vm810_vm2, %v3442_v58, 0  ;;  %6658 = vmatprep.subr.msk.bf16.mxu0 %vm810_vm2, %v3442_v58 }
 0x836   : > { %v3391_v49 = vpop.f32.mrf.mxu1  ;;  %3516 = vmatprep.mubr.bf16.mxu1 %v8879_v2  ;;  %6436 = vmatpush3.bf16.msra.mxu0 %v3462_v36  ;;  %v3433_v41 = vpop.f32.mrf.mxu0 }
 0x837   : > { %v3456_v17 = vsel %vm810_vm2, %v3440_v34, 0  ;;  %v3441_v24 = vpack.c.bf16 %v3391_v49, %v3391_v49 }
 0x838   : > { %v3393_v30 = vpop.f32.mrf.mxu1  ;;  %v6434_v4 = vpop.f32.mrf.mxu0 }
 0x839   : > { %5810 = vmatprep.subr.msk.bf16.mxu1 %vm810_vm2, %v3441_v24 }
 0x83a   : > { %v3394_v43 = vpop.f32.mrf.mxu1  ;;  %3621 = vmatpush1.bf16.msra.mxu1 %v3456_v17 }
 0x83b   : > { %5808 = vmatmul.mubr.msk.bf16.gmra.mxu0 %vm797_vm3, %v7219_v27 }
 0x83c   : > { %3597 = vmatprep.mubr.bf16.mxu0 %v8879_v2 }
 0x83d   : > { %5803 = vmatmul.mubr.msk.bf16.gmra.mxu1 %vm797_vm3, %v7219_v27 }
 0x83e   : > { %3526 = vmatprep.mubr.bf16.mxu1 %v8879_v2 }
 0x843   : > { %5809 = vmatmul.mubr.msk.bf16.gmra.mxu0 %vm797_vm3, %v7231_v32 }
 0x844   : > { %6437 = vmatprep.mubr.msk.bf16.mxu0 %vm797_vm3, %v7188_v8 }
 0x845   : > { %5804 = vmatmul.mubr.msk.bf16.gmra.mxu1 %vm797_vm3, %v7231_v32 }
 0x846   : > { %3638 = vmatprep.mubr.bf16.mxu1 %v8879_v2 }
 0x84b   : > { %6438 = vmatmul.mubr.msk.bf16.vlgmr.msra.gmra.mxu0 %vm797_vm3, %v7202_v13 }
 0x84c   : > { %6441 = vmatprep.mubr.msk.bf16.mxu0 %vm797_vm3, %v7219_v27 }
 0x84d   : > { %5811 = vmatmul.mubr.msk.bf16.vlgmr.msra.gmra.mxu1 %vm797_vm3, %v7188_v8 }
 0x84e   : > { %3648 = vmatprep.mubr.bf16.mxu1 %v8879_v2 }
 0x853   : > { %6442 = vmatmul.mubr.msk.bf16.gmra.mxu0 %vm797_vm3, %v7231_v32 }
 0x854   : > { %3871 = vmatprep.mubr.bf16.mxu0 %v8879_v2 }
 0x855   : > { %5812 = vmatmul.mubr.msk.bf16.gmra.mxu1 %vm797_vm3, %v7202_v13 }
 0x856   : > { %3658 = vmatprep.mubr.bf16.mxu1 %v8879_v2 }
 0x85d   : > { %5813 = vmatmul.mubr.msk.bf16.gmra.mxu1 %vm797_vm3, %v7219_v27 }
 0x85e   : > { %3668 = vmatprep.mubr.bf16.mxu1 %v8879_v2 }
 0x865   : > { %5814 = vmatmul.mubr.msk.bf16.gmra.mxu1 %vm797_vm3, %v7231_v32 }
 0x866   : > { %3924 = vmatprep.mubr.bf16.mxu1 %v8879_v2 }
 0x8eb   : > { %v8155_v8 = vpop.f32.mrf.mxu0 }
 0x8ed   : > { %v8157_v61 = vpop.f32.mrf.mxu1  ;;  %v3571_v7 = vpop.f32.mrf.mxu0 }
 0x8ee   : > { %v8166_v49 = vadd.f32 %v3571_v7, %v7279_v60 }
 0x8ef   : > { %v3500_v37 = vpop.f32.mrf.mxu1  ;;  %v8159_v48 = vpop.f32.mrf.mxu0 }
 0x8f0   : > { %v8169_v41 = vadd.f32 %v3500_v37, %v7279_v60 }
 0x8f1   : > { %v8161_v13 = vpop.f32.mrf.mxu1  ;;  %v3575_v50 = vpop.f32.mrf.mxu0 }
 0x8f2   : > { %v8172_v17 = vadd.f32 %v3575_v50, %v7284_v0 }
 0x8f3   : > { %v3504_v16 = vpop.f32.mrf.mxu1  ;;  %v3579_v27 = vpop.f32.mrf.mxu0 }
 0x8f4   : > { %v8175_v24 = vadd.f32 %v3504_v16, %v7284_v0  ;;  %v8178_v30 = vadd.f32 %v3579_v27, %v7275_v52 }
 0x8f5   : > { %v8163_v14 = vpop.f32.mrf.mxu1  ;;  %v3581_v45 = vpop.f32.mrf.mxu0 }
 0x8f6   : > { %v8181_v4 = vadd.f32 %v3581_v45, %v7275_v52 }
 0x8f7   : > { %v3510_v33 = vpop.f32.mrf.mxu1  ;;  %v3583_v32 = vpop.f32.mrf.mxu0 }
 0x8f8   : > { %v8186_v37 = vadd.f32 %v3510_v33, %v7275_v52 }
 0x8f9   : > { %v3512_v62 = vpop.f32.mrf.mxu1  ;;  %v3585_v63 = vpop.f32.mrf.mxu0 }
 0x8fa   : > { %v3586_v50 = vadd.f32 %v3585_v63, %v7277_v55 }
 0x8fb   : > { %v3514_v9 = vpop.f32.mrf.mxu1  ;;  %v3589_v57 = vpop.f32.mrf.mxu0 }
 0x8fc   : > { %v8192_v27 = vadd.f32 %v3514_v9, %v7277_v55 }
 0x8fd   : > { %v3518_v11 = vpop.f32.mrf.mxu1  ;;  %v3591_v53 = vpop.f32.mrf.mxu0 }
 0x8fe   : > { %v3592_v45 = vadd.f32 %v3591_v53, %v7273_v47  ;;  %v3590_v53 = vadd.f32 %v3589_v57, %v7273_v47 }
 0x8ff   : > { %v3520_v26 = vpop.f32.mrf.mxu1  ;;  %v3593_v58 = vpop.f32.mrf.mxu0 }
 0x900   : > { %v3521_v18 = vadd.f32 %v3520_v26, %v7273_v47  ;;  %v3594_v33 = vadd.f32 %v3593_v58, %v7271_v44  ;;  %v3519_v26 = vadd.f32 %v3518_v11, %v7273_v47  ;;  %v3772_v58 = vmax.f32 %v3592_v45, 0.0 }
 0x901   : > { %v3522_v3 = vpop.f32.mrf.mxu1  ;;  %v3595_v31 = vpop.f32.mrf.mxu0 }
 0x902   : > { %v3596_v43 = vadd.f32 %v3595_v31, %v7271_v44 }
 0x903   : > { %v3524_v34 = vpop.f32.mrf.mxu1  ;;  %v3599_v36 = vpop.f32.mrf.mxu0 }
 0x904   : > { %v3600_v7 = vadd.f32 %v3599_v36, %v7267_v39  ;;  %v3525_v16 = vadd.f32 %v3524_v34, %v7271_v44  ;;  %v3523_v34 = vadd.f32 %v3522_v3, %v7271_v44  ;;  %v3513_v3 = vadd.f32 %v3512_v62, %v7277_v55 }
 0x905   : > { %v3528_v22 = vpop.f32.mrf.mxu1  ;;  %v3601_v2 = vpop.f32.mrf.mxu0  ;;  %v3509_v62 = vadd.f32 %v8163_v14, %v7275_v52 }
 0x906   : > { %v3529_v56 = vadd.f32 %v3528_v22, %v7267_v39  ;;  %v3785_v20 = vmax.f32 %v3600_v7, 0.0  ;;  %v3602_v31 = vadd.f32 %v3601_v2, %v7267_v39  ;;  %v3779_v22 = vmax.f32 %v3596_v43, 0.0 }
 0x907   : > { %v3530_v36 = vpop.f32.mrf.mxu1  ;;  %v3603_v40 = vpop.f32.mrf.mxu0  ;;  %v3777_v7 = vmax.f32 %v3525_v16, 0.0  ;;  %v3778_v43 = vmax.f32 %v3594_v33, 0.0  ;;  %v3771_v16 = vmax.f32 %v3590_v53, 0.0  ;;  %v3769_v33 = vmax.f32 %v3519_v26, 0.0 }
 0x908   : > { %v3783_v12 = vmax.f32 %v3529_v56, 0.0  ;;  %v3531_v63 = vadd.f32 %v3530_v36, %v7267_v39  ;;  %v3813_v29 = vpack.c.bf16 %v3785_v20, %v3785_v20  ;;  %v3786_v9 = vmax.f32 %v3602_v31, 0.0 }
 0x909   : > { %v3532_v1 = vpop.f32.mrf.mxu1  ;;  %v3604_v35 = vpop.f32.mrf.mxu0  ;;  %v3584_v40 = vadd.f32 %v3583_v32, %v7277_v55  ;;  %v3770_v20 = vmax.f32 %v3521_v18, 0.0  ;;  %v3776_v31 = vmax.f32 %v3523_v34, 0.0  ;;  %v3807_v57 = vpack.c.bf16 %v3779_v22, %v3772_v58 }
 0x90a   : > { %v3811_v2 = vpack.c.bf16 %v3783_v12, %v3783_v12  ;;  %v3784_v15 = vmax.f32 %v3531_v63, 0.0  ;;  %v3814_v56 = vpack.c.bf16 %v3786_v9, %v3786_v9  ;;  %v3765_v35 = vmax.f32 %v3586_v50, 0.0 }
 0x90b   : > { %v3533_v28 = vpop.f32.mrf.mxu1  ;;  %v8203_v36 = vpop.f32.mrf.mxu0  ;;  %v3825_v11 = vsel %vm1213_vm4, %v3813_v29, 0  ;;  %v3805_v45 = vpack.c.bf16 %v3777_v7, %v3770_v20  ;;  %v3574_v18 = vadd.f32 %v8159_v48, %v7284_v0  ;;  %v3758_v50 = vmax.f32 %v8181_v4, 0.0 }
 0x90c   : > { %v3812_v1 = vpack.c.bf16 %v3784_v15, %v3784_v15  ;;  %5822 = vmatprep.subr.msk.bf16.mxu1 %vm1213_vm4, %v3814_v56  ;;  %v3763_v28 = vmax.f32 %v8192_v27, 0.0  ;;  %v3819_v15 = vsel %vm1213_vm4, %v3811_v2, 0  ;;  %v3503_v63 = vadd.f32 %v8161_v13, %v7284_v0 }
 0x90d   : > { %v8207_v12 = vpop.f32.mrf.mxu1  ;;  %v8209_v32 = vpop.f32.mrf.mxu0  ;;  %3901 = vmatpush1.bf16.msra.mxu1 %v3825_v11  ;;  %v3756_v34 = vmax.f32 %v8186_v37, 0.0  ;;  %v3764_v22 = vmax.f32 %v3584_v40, 0.0  ;;  %v3806_v9 = vpack.c.bf16 %v3778_v43, %v3771_v16  ;;  %v3751_v48 = vmax.f32 %v8172_v17, 0.0 }
 0x90e   : > { %5819 = vmatprep.subr.msk.bf16.mxu0 %vm1213_vm4, %v3812_v1  ;;  %3902 = vmatprep.subr.bf16.mxu1 %v3807_v57  ;;  %v3762_v53 = vmax.f32 %v3513_v3, 0.0  ;;  %v3800_v14 = vpack.c.bf16 %v3765_v35, %v3758_v50  ;;  %v3804_v7 = vpack.c.bf16 %v3776_v31, %v3769_v33  ;;  %v3570_v26 = vadd.f32 %v8155_v8, %v7279_v60 }
 0x90f   : > { %v8220_v29 = vpop.f32.mrf.mxu1  ;;  %v6440_v27 = vpop.f32.mrf.mxu0  ;;  %3848 = vmatpush1.bf16.msra.mxu0 %v3819_v15  ;;  %v3749_v58 = vmax.f32 %v8175_v24, 0.0  ;;  %v3757_v13 = vmax.f32 %v8178_v30, 0.0  ;;  %v3798_v56 = vpack.c.bf16 %v3763_v28, %v3756_v34  ;;  %v3499_v37 = vadd.f32 %v8157_v61, %v7279_v60 }
 0x910   : > { %3849 = vmatprep.subr.bf16.mxu0 %v3805_v45  ;;  %v3744_v17 = vmax.f32 %v8166_v49, 0.0  ;;  %v3755_v40 = vmax.f32 %v3509_v62, 0.0  ;;  %v3742_v43 = vmax.f32 %v8169_v41, 0.0  ;;  %v3750_v8 = vmax.f32 %v3574_v18, 0.0 }
 0x911   : > { %v8226_v4 = vpop.f32.mrf.mxu1  ;;  %v3714_v2 = vpop.f32.mrf.mxu0  ;;  %3903 = vmatpush1.bf16.msra.mxu1 %v3806_v9  ;;  %v3799_v1 = vpack.c.bf16 %v3764_v22, %v3757_v13  ;;  %v3748_v24 = vmax.f32 %v3503_v63, 0.0  ;;  %v3743_v49 = vmax.f32 %v3570_v26, 0.0  ;;  %v3741_v28 = vmax.f32 %v3499_v37, 0.0 }
 0x912   : > { %3904 = vmatprep.subr.bf16.mxu1 %v3800_v14  ;;  %v3793_v30 = vpack.c.bf16 %v3751_v48, %v3744_v17  ;;  %v3797_v35 = vpack.c.bf16 %v3762_v53, %v3755_v40  ;;  %v3791_v11 = vpack.c.bf16 %v3749_v58, %v3742_v43  ;;  %v3723_v50 = vadd.f32 %v6440_v27, %v7277_v55 }
 0x913   : > { %v8235_v3 = vpop.f32.mrf.mxu1  ;;  %v6443_v20 = vpop.f32.mrf.mxu0  ;;  %3850 = vmatpush1.bf16.msra.mxu0 %v3804_v7  ;;  %v3792_v15 = vpack.c.bf16 %v3750_v8, %v3743_v49  ;;  %v3790_v62 = vpack.c.bf16 %v3748_v24, %v3741_v28  ;;  %v3720_v9 = vadd.f32 %v8203_v36, %v7275_v52  ;;  %v3715_v26 = vadd.f32 %v3714_v2, %v7284_v0 }
 0x914   : > { %3851 = vmatprep.subr.bf16.mxu0 %v3798_v56  ;;  %v3736_v31 = vadd.f32 %v6443_v20, %v7267_v39  ;;  %v3768_v7 = vmax.f32 %v3723_v50, 0.0  ;;  %v3712_v56 = vadd.f32 %v8209_v32, %v7279_v60  ;;  %v8901_v17 = vmov 0  }
 0x915   : > { %v8239_v57 = vpop.f32.mrf.mxu1  ;;  %v3727_v61 = vpop.f32.mrf.mxu0  ;;  %3905 = vmatpush1.bf16.msra.mxu1 %v3799_v1  ;;  %v3761_v36 = vmax.f32 %v3720_v9, 0.0  ;;  %v3754_v40 = vmax.f32 %v3715_v26, 0.0 }
 0x916   : > { %v3789_v16 = vmax.f32 %v3736_v31, 0.0  ;;  %3906 = vmatprep.subr.bf16.mxu1 %v3793_v30  ;;  %v3728_v18 = vadd.f32 %v3727_v61, %v7273_v47  ;;  %v3747_v43 = vmax.f32 %v3712_v56, 0.0 }
 0x917   : > { %v8241_v45 = vpop.f32.mrf.mxu1  ;;  %v6444_v41 = vpop.f32.mrf.mxu0  ;;  %3852 = vmatpush1.bf16.msra.mxu0 %v3797_v35  ;;  %v3803_v2 = vpack.c.bf16 %v3768_v7, %v3761_v36 }
 0x918   : > { %3853 = vmatprep.subr.bf16.mxu0 %v3791_v11  ;;  %v3817_v33 = vpack.c.bf16 %v3789_v16, %v3789_v16  ;;  %v3775_v53 = vmax.f32 %v3728_v18, 0.0  ;;  %v3796_v1 = vpack.c.bf16 %v3754_v40, %v3747_v43 }
 0x919   : > { %v3654_v63 = vpop.f32.mrf.mxu1  ;;  %v3730_v34 = vpop.f32.mrf.mxu0  ;;  %3907 = vmatpush1.bf16.msra.mxu1 %v3792_v15 }
 0x91a   : > { %v3731_v22 = vadd.f32 %v3730_v34, %v7271_v44  ;;  %6659 = vmatprep.subr.msk.bf16.mxu1 %vm1213_vm4, %v3817_v33  ;;  %v3837_v58 = vsel %vm1213_vm4, %v3817_v33, 0  ;;  %v3653_v33 = vadd.f32 %v8241_v45, %v7275_v52  ;;  %v3651_v45 = vadd.f32 %v8239_v57, %v7275_v52 }
 0x91b   : > { %v3656_v48 = vpop.f32.mrf.mxu1  ;;  %3854 = vmatpush1.bf16.msra.mxu0 %v3790_v62 }
 0x91c   : > { %v3782_v14 = vmax.f32 %v3731_v22, 0.0  ;;  %5823 = vmatmul.mubr.msk.bf16.vlgmr.msra.gmra.mxu1 %vm1206_vm5, %v7376_v23  ;;  %v3657_v16 = vadd.f32 %v3656_v48, %v7277_v55  ;;  %v3759_v36 = vmax.f32 %v3651_v45, 0.0 }
 0x91d   : > { %v3660_v27 = vpop.f32.mrf.mxu1  ;;  %6446 = vmatpush3.bf16.msra.mxu1 %v3837_v58  ;;  %3934 = vmatprep.mubr.bf16.mxu1 %v8901_v17 }
 0x91e   : > { %v3810_v13 = vpack.c.bf16 %v3782_v14, %v3775_v53  ;;  %5820 = vmatmul.mubr.msk.bf16.vlgmr.msra.gmra.mxu0 %vm1206_vm5, %v7376_v23  ;;  %v3661_v62 = vadd.f32 %v3660_v27, %v7273_v47  ;;  %v3767_v48 = vmax.f32 %v3657_v16, 0.0 }
 0x91f   : > { %v3662_v37 = vpop.f32.mrf.mxu1  ;;  %3881 = vmatprep.mubr.bf16.mxu0 %v8901_v17 }
 0x920   : > { %6447 = vmatprep.subr.bf16.mxu1 %v3810_v13  ;;  %v3663_v31 = vadd.f32 %v3662_v37, %v7273_v47  ;;  %v3773_v14 = vmax.f32 %v3661_v62, 0.0 }
 0x921   : > { %v3664_v20 = vpop.f32.mrf.mxu1  ;;  %6448 = vmatpush3.bf16.msra.mxu1 %v3810_v13  ;;  %v3641_v13 = vadd.f32 %v8207_v12, %v7279_v60 }
 0x922   : > { %6449 = vmatprep.subr.bf16.mxu1 %v3803_v2  ;;  %v3665_v11 = vadd.f32 %v3664_v20, %v7271_v44  ;;  %v3774_v34 = vmax.f32 %v3663_v31, 0.0 }
 0x923   : > { %v3666_v8 = vpop.f32.mrf.mxu1 }
 0x924   : > { %5824 = vmatmul.mubr.msk.bf16.gmra.mxu1 %vm1206_vm5, %v7398_v10  ;;  %v3667_v32 = vadd.f32 %v3666_v8, %v7271_v44  ;;  %v3780_v9 = vmax.f32 %v3665_v11, 0.0  ;;  %v3647_v44 = vadd.f32 %v8235_v3, %v7284_v0  ;;  %v3645_v3 = vadd.f32 %v8226_v4, %v7284_v0 }
 0x925   : > { %v3670_v24 = vpop.f32.mrf.mxu1  ;;  %6450 = vmatpush3.bf16.msra.mxu1 %v3803_v2  ;;  %6453 = vmatprep.mubr.msk.bf16.mxu1 %vm1206_vm5, %v7376_v23 }
 0x926   : > { %v3671_v30 = vadd.f32 %v3670_v24, %v7267_v39  ;;  %5821 = vmatmul.mubr.msk.bf16.gmra.mxu0 %vm1206_vm5, %v7398_v10  ;;  %6451 = vmatprep.subr.bf16.mxu1 %v3796_v1  ;;  %v3781_v41 = vmax.f32 %v3667_v32, 0.0  ;;  %v3808_v26 = vpack.c.bf16 %v3780_v9, %v3773_v14  ;;  %v3753_v27 = vmax.f32 %v3647_v44, 0.0 }
 0x927   : > { %v3672_v35 = vpop.f32.mrf.mxu1  ;;  %3977 = vmatprep.mubr.bf16.mxu0 %v8901_v17  ;;  %v3752_v57 = vmax.f32 %v3645_v3, 0.0 }
 0x928   : > { %v3787_v61 = vmax.f32 %v3671_v30, 0.0  ;;  %v3673_v49 = vadd.f32 %v3672_v35, %v7267_v39  ;;  %v3655_v39 = vadd.f32 %v3654_v63, %v7277_v55  ;;  %v3809_v53 = vpack.c.bf16 %v3781_v41, %v3774_v34 }
 0x929   : > { %v3674_v28 = vpop.f32.mrf.mxu1  ;;  %6452 = vmatpush3.bf16.msra.mxu1 %v3796_v1  ;;  %v3643_v55 = vadd.f32 %v8220_v29, %v7279_v60  ;;  %v3760_v63 = vmax.f32 %v3653_v33, 0.0  ;;  %v3745_v29 = vmax.f32 %v3641_v13, 0.0 }
 0x92a   : > { %v3815_v15 = vpack.c.bf16 %v3787_v61, %v3787_v61  ;;  %v3788_v18 = vmax.f32 %v3673_v49, 0.0  ;;  %v3766_v7 = vmax.f32 %v3655_v39, 0.0 }
 0x92b   : > { %v3675_v50 = vpop.f32.mrf.mxu1  ;;  %v3802_v58 = vpack.c.bf16 %v3767_v48, %v3760_v63  ;;  %v3746_v52 = vmax.f32 %v3643_v55, 0.0  ;;  %v3794_v2 = vpack.c.bf16 %v3752_v57, %v3745_v29 }
 0x92c   : > { %v3816_v22 = vpack.c.bf16 %v3788_v18, %v3788_v18  ;;  %6454 = vmatmul.mubr.msk.bf16.vlgmr.msra.gmra.mxu1 %vm1206_vm5, %v7398_v10  ;;  %v3831_v47 = vsel %vm1213_vm4, %v3815_v15, 0  ;;  %v3801_v56 = vpack.c.bf16 %v3766_v7, %v3759_v36 }
 0x92d   : > { %4185 = vmatprep.mubr.bf16.mxu1 %v8901_v17  ;;  %v3795_v37 = vpack.c.bf16 %v3753_v27, %v3746_v52 }
 0x92e   : > { %5825 = vmatprep.subr.msk.bf16.mxu0 %vm1213_vm4, %v3816_v22 }
 0x92f   : > { %3954 = vmatpush1.bf16.msra.mxu0 %v3831_v47 }
 0x930   : > { %3955 = vmatprep.subr.bf16.mxu0 %v3809_v53 }
 0x933   : > { %3956 = vmatpush1.bf16.msra.mxu0 %v3808_v26 }
 0x934   : > { %3957 = vmatprep.subr.bf16.mxu0 %v3802_v58 }
 0x937   : > { %3958 = vmatpush1.bf16.msra.mxu0 %v3801_v56 }
 0x938   : > { %3959 = vmatprep.subr.bf16.mxu0 %v3795_v37 }
 0x93b   : > { %3960 = vmatpush1.bf16.msra.mxu0 %v3794_v2 }
 0x93e   : > { %5826 = vmatmul.mubr.msk.bf16.vlgmr.msra.gmra.mxu0 %vm1206_vm5, %v7376_v23 }
 0x93f   : > { %3987 = vmatprep.mubr.bf16.mxu0 %v8901_v17 }
 0x946   : > { %5827 = vmatmul.mubr.msk.bf16.gmra.mxu0 %vm1206_vm5, %v7398_v10 }
 0x947   : > { %4142 = vmatprep.mubr.bf16.mxu0 %v8901_v17 }
 0x9dc   : > { %v3926_v60 = vpop.f32.mrf.mxu1 }
 0x9dd   : > { %v3927_v13 = vadd.f32 %v3926_v60, %v7456_v25 }
 0x9de   : > { %v3873_v0 = vpop.f32.mrf.mxu0  ;;  %v3928_v12 = vpop.f32.mrf.mxu1 }
 0x9df   : > { %v3929_v41 = vadd.f32 %v3928_v12, %v7456_v25  ;;  %v3874_v37 = vadd.f32 %v3873_v0, %v7456_v25 }
 0x9e0   : > { %v3875_v4 = vpop.f32.mrf.mxu0  ;;  %v3930_v40 = vpop.f32.mrf.mxu1 }
 0x9e1   : > { %v3876_v44 = vadd.f32 %v3875_v4, %v7456_v25  ;;  %v3931_v45 = vadd.f32 %v3930_v40, %v7446_v59  ;;  %v4050_v29 = vmax.f32 %v3929_v41, 0.0 }
 0x9e2   : > { %v3877_v20 = vpop.f32.mrf.mxu0  ;;  %v3932_v43 = vpop.f32.mrf.mxu1 }
 0x9e3   : > { %v3933_v15 = vadd.f32 %v3932_v43, %v7446_v59  ;;  %v3878_v7 = vadd.f32 %v3877_v20, %v7446_v59  ;;  %v4048_v4 = vmax.f32 %v3876_v44, 0.0  ;;  %v4056_v40 = vmax.f32 %v3931_v45, 0.0  ;;  %v6854_v45 = vld [vmem:[%s8874_s2 + $0xe8] sm:$0xff]  }
 0x9e4   : > { %v3879_v8 = vpop.f32.mrf.mxu0  ;;  %v3936_v1 = vpop.f32.mrf.mxu1 }
 0x9e5   : > { %v3937_v23 = vadd.f32 %v3936_v1, %v7441_v54  ;;  %v3880_v33 = vadd.f32 %v3879_v8, %v7446_v59  ;;  %v4057_v26 = vmax.f32 %v3933_v15, 0.0  ;;  %v4054_v8 = vmax.f32 %v3878_v7, 0.0 }
 0x9e6   : > { %v3883_v24 = vpop.f32.mrf.mxu0  ;;  %v3938_v32 = vpop.f32.mrf.mxu1 }
 0x9e7   : > { %v3884_v31 = vadd.f32 %v3883_v24, %v7441_v54  ;;  %v3939_v10 = vadd.f32 %v3938_v32, %v7441_v54  ;;  %v4063_v34 = vmax.f32 %v3937_v23, 0.0  ;;  %v4055_v36 = vmax.f32 %v3880_v33, 0.0 }
 0x9e8   : > { %v3885_v30 = vpop.f32.mrf.mxu0  ;;  %v3940_v35 = vpop.f32.mrf.mxu1  ;;  %v4078_v60 = vpack.c.bf16 %v4057_v26, %v4050_v29  ;;  %v6857_v29 = vld [vmem:[%s8874_s2 + $0xa0] sm:$0xff]  }
 0x9e9   : > { %v3941_v61 = vadd.f32 %v3940_v35, %v7439_v6  ;;  %v3886_v11 = vadd.f32 %v3885_v30, %v7441_v54  ;;  %v4061_v48 = vmax.f32 %v3884_v31, 0.0  ;;  %v4064_v53 = vmax.f32 %v3939_v10, 0.0 }
 0x9ea   : > { %v3887_v49 = vpop.f32.mrf.mxu0  ;;  %v3942_v16 = vpop.f32.mrf.mxu1  ;;  %v4049_v30 = vmax.f32 %v3927_v13, 0.0  ;;  %v4076_v0 = vpack.c.bf16 %v4055_v36, %v4048_v4  ;;  %v4047_v35 = vmax.f32 %v3874_v37, 0.0  ;;  %v6856_v13 = vld [vmem:[%s8874_s2 + $0xe0] sm:$0xff]  }
 0x9eb   : > { %v3888_v28 = vadd.f32 %v3887_v49, %v7439_v6  ;;  %v4070_v18 = vmax.f32 %v3941_v61, 0.0  ;;  %v3943_v62 = vadd.f32 %v3942_v16, %v7439_v6  ;;  %v4062_v14 = vmax.f32 %v3886_v11, 0.0 }
 0x9ec   : > { %v3889_v50 = vpop.f32.mrf.mxu0  ;;  %v6455_v9 = vpop.f32.mrf.mxu1  ;;  %v4077_v31 = vpack.c.bf16 %v4056_v40, %v4049_v30  ;;  %v4075_v49 = vpack.c.bf16 %v4054_v8, %v4047_v35  ;;  %v6859_v8 = vld [vmem:[%s8874_s2 + $0x98] sm:$0xff]   ;;  %v6864_v30 = vld [vmem:[%s8874_s2 + $0x88] sm:$0xff]   ;;  %v6867_v35 = vld [vmem:[%s8874_s2 + $0x70] sm:$0xff]  }
 0x9ed   : > { %v4068_v22 = vmax.f32 %v3888_v28, 0.0  ;;  %v3890_v39 = vadd.f32 %v3889_v50, %v7439_v6  ;;  %v4071_v47 = vmax.f32 %v3943_v62, 0.0  ;;  %v4084_v55 = vpack.c.bf16 %v4070_v18, %v4063_v34  ;;  %v6850_v34 = vld [vmem:[%s8874_s2 + $0xf8] sm:$0xff]  }
 0x9ee   : > { %v4032_v3 = vpop.f32.mrf.mxu1  ;;  %v4041_v57 = vadd.f32 %v6455_v9, %v7441_v54  ;;  %v8902_v28 = vmov 0.0  }
 0x9ef   : > { %v4069_v63 = vmax.f32 %v3890_v39, 0.0  ;;  %v4082_v27 = vpack.c.bf16 %v4068_v22, %v4061_v48  ;;  %v4085_v58 = vpack.c.bf16 %v4071_v47, %v4064_v53  ;;  %v4096_v20 = vand.u32 %v4084_v55, %v7454_v19  ;;  %v6851_v39 = vld [vmem:[%s8874_s2 + $0xb8] sm:$0xff]   ;;  %v6853_v48 = vld [vmem:[%s8874_s2 + $0xb0] sm:$0xff]  }
 0x9f0   : > { %v6456_v56 = vpop.f32.mrf.mxu1  ;;  %v4067_v23 = vmax.f32 %v4041_v57, 0.0  ;;  %v4033_v11 = vadd.f32 %v4032_v3, %v7456_v25 }
 0x9f1   : > { %v4083_v52 = vpack.c.bf16 %v4069_v63, %v4062_v14  ;;  %v4044_v2 = vadd.f32 %v6456_v56, %v7439_v6  ;;  %v4099_v12 = vand.u32 %v4085_v58, %v7454_v19  ;;  %v4090_v1 = vand.u32 %v4082_v27, %v7454_v19  ;;  %v6855_v27 = vld [vmem:[%s8874_s2 + $0xa8] sm:$0xff]  }
 0x9f2   : > { %v4035_v32 = vpop.f32.mrf.mxu1  ;;  %v4053_v15 = vmax.f32 %v4033_v11, 0.0  ;;  %v6873_v11 = vld [vmem:[%s8874_s2 + $0x20] sm:$0xff]  }
 0x9f3   : > { %v4093_v43 = vand.u32 %v4083_v52, %v7454_v19  ;;  %v4074_v24 = vmax.f32 %v4044_v2, 0.0  ;;  %4165 = vmatprep.subr.bf16.mxu1 %v4099_v12  ;;  %v4036_v61 = vadd.f32 %v4035_v32, %v7446_v59  ;;  %v6858_v12 = vld [vmem:[%s8874_s2 + $0xd8] sm:$0xff]  }
 0x9f4   : > { %4166 = vmatpush1.bf16.msra.mxu1 %v4096_v20  ;;  %v6863_v32 = vld [vmem:[%s8874_s2 + $0x78] sm:$0xff]  }
 0x9f5   : > { %4122 = vmatprep.subr.bf16.mxu0 %v4093_v43  ;;  %4167 = vmatprep.subr.bf16.mxu1 %v4078_v60  ;;  %v4088_v10 = vpack.c.bf16 %v4074_v24, %v4067_v23  ;;  %v4060_v41 = vmax.f32 %v4036_v61, 0.0  ;;  %v6862_v24 = vld [vmem:[%s8874_s2 + $0xc8] sm:$0xff]   ;;  %v6866_v23 = vld [vmem:[%s8874_s2 + $0xc0] sm:$0xff]  }
 0x9f6   : > { %4123 = vmatpush1.bf16.msra.mxu0 %v4090_v1  ;;  %v6871_v61 = vld [vmem:[%s8874_s2 + $0x28] sm:$0xff]  }
 0x9f7   : > { %4124 = vmatprep.subr.bf16.mxu0 %v4076_v0  ;;  %v4108_v16 = vand.u32 %v4088_v10, %v7454_v19  ;;  %v4081_v62 = vpack.c.bf16 %v4060_v41, %v4053_v15  ;;  %v6865_v0 = vld [vmem:[%s8874_s2 + $0x38] sm:$0xff]   ;;  %v6870_v10 = vld [vmem:[%s8874_s2 + $0x68] sm:$0xff]   ;;  %v6876_v15 = vld [vmem:[%s8874_s2 + $0x50] sm:$0xff]  }
 0x9f8   : > { %4168 = vmatpush1.bf16.msra.mxu1 %v4077_v31  ;;  %v6869_v31 = vld [vmem:[%s8874_s2 + $0x30] sm:$0xff]   ;;  %v6875_v41 = vld [vmem:[%s8874_s2 + $0x18] sm:$0xff]  }
 0x9f9   : > { %6457 = vmatprep.subr.bf16.mxu1 %v8902_v28 }
 0x9fa   : > { %4125 = vmatpush1.bf16.msra.mxu0 %v4075_v49  ;;  %v6872_v49 = vld [vmem:[%s8874_s2 + $0x60] sm:$0xff]  }
 0x9fb   : > { %5831 = vmatmul.mubr.msk.bf16.vlgmr.msra.gmra.mxu1 %vm1495_vm8, %v7479_v46 }
 0x9fc   : > { %6458 = vmatpush3.bf16.msra.mxu1 %v4108_v16  ;;  %6461 = vmatprep.mubr.msk.bf16.mxu1 %vm6958_vm1, %v8902_v28  ;;  %v6874_v16 = vld [vmem:[%s8874_s2 + $0x58] sm:$0xff]  }
 0x9fd   : > { %5830 = vmatmul.mubr.msk.bf16.vlgmr.msra.gmra.mxu0 %vm1495_vm8, %v7479_v46  ;;  %6459 = vmatprep.subr.bf16.mxu1 %v8902_v28 }
 0x9fe   : > { %v3979_v18 = vpop.f32.mrf.mxu0  ;;  %4228 = vmatprep.mubr.bf16.mxu0 %v8901_v17  ;;  %v6852_v17 = vld [vmem:[%s8874_s2 + $0xf0] sm:$0xff]  }
 0x9ff   : > { %v3980_v2 = vadd.f32 %v3979_v18, %v7456_v25  ;;  %v6877_v18 = vld [vmem:[%s8874_s2 + $0x10] sm:$0xff]  }
 0xa00   : > { %v3981_v50 = vpop.f32.mrf.mxu0  ;;  %6460 = vmatpush3.bf16.msra.mxu1 %v4081_v62  ;;  %v6878_v62 = vld [vmem:[%s8874_s2 + $0x48] sm:$0xff]  }
 0xa01   : > { %6090 = vmatprep.subr.bf16.mxu1 %v6850_v34  ;;  %v4051_v60 = vmax.f32 %v3980_v2, 0.0  ;;  %v6881_v34 = vld [vmem:[%s8874_s2] sm:$0xff]  }
 0xa02   : > { %v3983_v33 = vpop.f32.mrf.mxu0 }
 0xa03   : > { %6462 = vmatmul.mubr.msk.bf16.vlgmr.msra.gmra.mxu1 %vm1495_vm8, %v7479_v46  ;;  %v3984_v57 = vadd.f32 %v3983_v33, %v7446_v59  ;;  %v6880_v33 = vld [vmem:[%s8874_s2 + $0x40] sm:$0xff]  }
 0xa04   : > { %v3985_v22 = vpop.f32.mrf.mxu0  ;;  %6091 = vmatpush3.bf16.msra.mxu1 %v6851_v39 }
 0xa05   : > { %6092 = vmatprep.subr.bf16.mxu1 %v6852_v17  ;;  %v3986_v3 = vadd.f32 %v3985_v22, %v7446_v59  ;;  %v4058_v20 = vmax.f32 %v3984_v57, 0.0  ;;  %v6882_v22 = vld [vmem:[%s8874_s2 + $0x178] sm:$0xff]  }
 0xa06   : > { %v3989_v9 = vpop.f32.mrf.mxu0 }
 0xa07   : > { %v3990_v53 = vadd.f32 %v3989_v9, %v7441_v54  ;;  %v4059_v37 = vmax.f32 %v3986_v3, 0.0  ;;  %v4079_v1 = vpack.c.bf16 %v4058_v20, %v4051_v60  ;;  %v6884_v60 = vld [vmem:[%s8874_s2 + $0x170] sm:$0xff]  }
 0xa08   : > { %v3991_v44 = vpop.f32.mrf.mxu0  ;;  %6093 = vmatpush3.bf16.msra.mxu1 %v6853_v48 }
 0xa09   : > { %6094 = vmatprep.subr.bf16.mxu1 %v6854_v45  ;;  %v3992_v14 = vadd.f32 %v3991_v44, %v7441_v54  ;;  %v4065_v58 = vmax.f32 %v3990_v53, 0.0  ;;  %v3982_v54 = vadd.f32 %v3981_v50, %v7456_v25  ;;  %v6860_v25 = vld [vmem:[%s8874_s2 + $0xd0] sm:$0xff]   ;;  %v6879_v50 = vld [vmem:[%s8874_s2 + $0x8] sm:$0xff]  }
 0xa0a   : > { %v3993_v47 = vpop.f32.mrf.mxu0 }
 0xa0b   : > { %v3994_v55 = vadd.f32 %v3993_v47, %v7439_v6  ;;  %v4066_v36 = vmax.f32 %v3992_v14, 0.0  ;;  %v4052_v4 = vmax.f32 %v3982_v54, 0.0 }
 0xa0c   : > { %v3995_v63 = vpop.f32.mrf.mxu0  ;;  %6095 = vmatpush3.bf16.msra.mxu1 %v6855_v27 }
 0xa0d   : > { %v4072_v7 = vmax.f32 %v3994_v55, 0.0  ;;  %v3996_v26 = vadd.f32 %v3995_v63, %v7439_v6  ;;  %6096 = vmatprep.subr.bf16.mxu1 %v6856_v13  ;;  %v4080_v43 = vpack.c.bf16 %v4059_v37, %v4052_v4 }
 0xa0f   : > { %v4073_v52 = vmax.f32 %v3996_v26, 0.0  ;;  %v4086_v56 = vpack.c.bf16 %v4072_v7, %v4065_v58 }
 0xa10   : > { %6097 = vmatpush3.bf16.msra.mxu1 %v6857_v29 }
 0xa11   : > { %v4087_v6 = vpack.c.bf16 %v4073_v52, %v4066_v36  ;;  %6098 = vmatprep.subr.bf16.mxu1 %v6858_v12  ;;  %v4102_v59 = vand.u32 %v4086_v56, %v7454_v19 }
 0xa13   : > { %v4105_v40 = vand.u32 %v4087_v6, %v7454_v19  ;;  %v6861_v19 = vld [vmem:[%s8874_s2 + $0x90] sm:$0xff]  }
 0xa14   : > { %6099 = vmatpush3.bf16.msra.mxu1 %v6859_v8  ;;  %v6883_v8 = vld [vmem:[%s8874_s2 + $0x138] sm:$0xff]  }
 0xa15   : > { %4208 = vmatprep.subr.bf16.mxu0 %v4105_v40  ;;  %6100 = vmatprep.subr.bf16.mxu1 %v6860_v25  ;;  %v6886_v25 = vld [vmem:[%s8874_s2 + $0x130] sm:$0xff]  }
 0xa16   : > { %4209 = vmatpush1.bf16.msra.mxu0 %v4102_v59 }
 0xa17   : > { %4210 = vmatprep.subr.bf16.mxu0 %v4080_v43 }
 0xa18   : > { %6101 = vmatpush3.bf16.msra.mxu1 %v6861_v19  ;;  %v6888_v19 = vld [vmem:[%s8874_s2 + $0x1a0] sm:$0xff]  }
 0xa19   : > { %6102 = vmatprep.subr.bf16.mxu1 %v6862_v24  ;;  %v6889_v24 = vld [vmem:[%s8874_s2 + $0x128] sm:$0xff]  }
 0xa1a   : > { %4211 = vmatpush1.bf16.msra.mxu0 %v4079_v1  ;;  %v6887_v1 = vld [vmem:[%s8874_s2 + $0x168] sm:$0xff]  }
 0xa1b   : > { %6068 = vmatprep.subr.bf16.mxu0 %v6863_v32  ;;  %v6890_v32 = vld [vmem:[%s8874_s2 + $0x160] sm:$0xff]  }
 0xa1c   : > { %6103 = vmatpush3.bf16.msra.mxu1 %v6864_v30  ;;  %v6891_v30 = vld [vmem:[%s8874_s2 + $0x198] sm:$0xff]  }
 0xa1d   : > { %5832 = vmatmul.mubr.msk.bf16.vlgmr.msra.gmra.mxu0 %vm1495_vm8, %v7479_v46  ;;  %6104 = vmatprep.subr.bf16.mxu1 %v6866_v23  ;;  %v6868_v46 = vld [vmem:[%s8874_s2 + $0x80] sm:$0xff]   ;;  %v6893_v23 = vld [vmem:[%s8874_s2 + $0x158] sm:$0xff]  }
 0xa1e   : > { %6069 = vmatpush3.bf16.msra.mxu0 %v6865_v0  ;;  %v6892_v0 = vld [vmem:[%s8874_s2 + $0x120] sm:$0xff]  }
 0xa1f   : > { %6070 = vmatprep.subr.bf16.mxu0 %v6867_v35  ;;  %v6894_v35 = vld [vmem:[%s8874_s2 + $0x190] sm:$0xff]  }
 0xa20   : > { %6105 = vmatpush3.bf16.msra.mxu1 %v6868_v46 }
 0xa21   : > { %6465 = vmatprep.subr.bf16.mxu1 %v8902_v28 }
 0xa22   : > { %6071 = vmatpush3.bf16.msra.mxu0 %v6869_v31  ;;  %v6895_v31 = vld [vmem:[%s8874_s2 + $0x118] sm:$0xff]  }
 0xa23   : > { %6072 = vmatprep.subr.bf16.mxu0 %v6870_v10 }
 0xa26   : > { %6073 = vmatpush3.bf16.msra.mxu0 %v6871_v61  ;;  %v6896_v61 = vld [vmem:[%s8874_s2 + $0x150] sm:$0xff]  }
 0xa27   : > { %6074 = vmatprep.subr.bf16.mxu0 %v6872_v49 }
 0xa2a   : > { %6075 = vmatpush3.bf16.msra.mxu0 %v6873_v11  ;;  %v6897_v11 = vld [vmem:[%s8874_s2 + $0x188] sm:$0xff]  }
 0xa2b   : > { %6076 = vmatprep.subr.bf16.mxu0 %v6874_v16 }
 0xa2e   : > { %6077 = vmatpush3.bf16.msra.mxu0 %v6875_v41 }
 0xa2f   : > { %6078 = vmatprep.subr.bf16.mxu0 %v6876_v15  ;;  %v6898_v15 = vld [vmem:[%s8874_s2 + $0x110] sm:$0xff]  }
 0xa32   : > { %6079 = vmatpush3.bf16.msra.mxu0 %v6877_v18 }
 0xa33   : > { %6080 = vmatprep.subr.bf16.mxu0 %v6878_v62  ;;  %v6899_v62 = vld [vmem:[%s8874_s2 + $0x148] sm:$0xff]  }
 0xa36   : > { %6081 = vmatpush3.bf16.msra.mxu0 %v6879_v50 }
 0xa37   : > { %6082 = vmatprep.subr.bf16.mxu0 %v6880_v33 }
 0xa3a   : > { %6083 = vmatpush3.bf16.msra.mxu0 %v6881_v34 }
 0xa3b   : > { %6112 = vmatprep.subr.bf16.mxu0 %v6882_v22 }
 0xabb   : > { %v4187_v39 = vpop.f32.mrf.mxu1 }
 0xabc   : > { %v4188_v14 = vadd.f32 %v4187_v39, %v7608_v21  ;;  %v6900_v39 = vld [vmem:[%s8874_s2 + $0x180] sm:$0xff]  }
 0xabd   : > { %v4144_v9 = vpop.f32.mrf.mxu0  ;;  %v4189_v17 = vpop.f32.mrf.mxu1 }
 0xabe   : > { %v4190_v53 = vadd.f32 %v4189_v17, %v7608_v21  ;;  %v4145_v7 = vadd.f32 %v4144_v9, %v7608_v21  ;;  %v4282_v56 = vmax.f32 %v4188_v14, 0.0 }
 0xabf   : > { %v4146_v44 = vpop.f32.mrf.mxu0  ;;  %v4191_v48 = vpop.f32.mrf.mxu1 }
 0xac0   : > { %v4192_v47 = vadd.f32 %v4191_v48, %v7606_v5  ;;  %v4147_v55 = vadd.f32 %v4146_v44, %v7608_v21  ;;  %v4283_v36 = vmax.f32 %v4190_v53, 0.0  ;;  %v4280_v2 = vmax.f32 %v4145_v7, 0.0  ;;  %v6901_v48 = vld [vmem:[%s8874_s2 + $0x108] sm:$0xff]   ;;  %v6905_v7 = vld [vmem:[%s8875_s3 + $0xd0] sm:$0xff] }
 0xac1   : > { %v4148_v45 = vpop.f32.mrf.mxu0  ;;  %v4193_v3 = vpop.f32.mrf.mxu1 }
 0xac2   : > { %v4149_v63 = vadd.f32 %v4148_v45, %v7606_v5  ;;  %v4194_v26 = vadd.f32 %v4193_v3, %v7606_v5  ;;  %v4289_v58 = vmax.f32 %v4192_v47, 0.0  ;;  %v4281_v37 = vmax.f32 %v4147_v55, 0.0  ;;  %v6903_v55 = vld [vmem:[%s7045_s25 + $0x8] sm:$0x3f] }
 0xac3   : > { %v4150_v27 = vpop.f32.mrf.mxu0  ;;  %v4273_v54 = vpop.f32.mrf.mxu1 }
 0xac4   : > { %v4151_v13 = vadd.f32 %v4150_v27, %v7606_v5  ;;  %v4287_v52 = vmax.f32 %v4149_v63, 0.0  ;;  %v4290_v57 = vmax.f32 %v4194_v26, 0.0  ;;  %v4296_v4 = vpack.c.bf16 %v4289_v58, %v4282_v56  ;;  %v6904_v63 = vld [vmem:[%s8874_s2 + $0x100] sm:$0xff]   ;;  %v6906_v26 = vld [vmem:[%s8875_s3 + $0xd8] sm:$0xff]  ;;  %v6908_v58 = vld [vmem:[%s8875_s3 + $0xe8] sm:$0xff] }
 0xac5   : > { %v6463_v29 = vpop.f32.mrf.mxu1  ;;  %v4274_v49 = vadd.f32 %v4273_v54, %v7608_v21  ;;  %v6907_v27 = vld [vmem:[%s8875_s3 + $0xe0] sm:$0xff]  ;;  %v6910_v54 = vld [vmem:[%s8875_s3 + $0xf8] sm:$0xff] }
 0xac6   : > { %v4288_v6 = vmax.f32 %v4151_v13, 0.0  ;;  %v4297_v12 = vpack.c.bf16 %v4290_v57, %v4283_v36  ;;  %v4294_v59 = vpack.c.bf16 %v4287_v52, %v4280_v2  ;;  %v6909_v13 = vld [vmem:[%s8875_s3 + $0xf0] sm:$0xff]  ;;  %v6911_v36 = vld [vmem:[%s8875_s3 + $0x100] sm:$0x3] }
 0xac7   : > { %v4276_v20 = vpop.f32.mrf.mxu1  ;;  %v4286_v50 = vmax.f32 %v4274_v49, 0.0 }
 0xac8   : > { %v4295_v40 = vpack.c.bf16 %v4288_v6, %v4281_v37  ;;  %4377 = vmatprep.mubr.bf16.mxu1 %v4297_v12  ;;  %v4277_v46 = vadd.f32 %v4276_v20, %v7606_v5 }
 0xac9   : > { %4378 = vmatmul.mubr.bf16.vlgmr.msra.gmra.mxu1 %v4296_v4  ;;  %v6464_v43 = vpop.f32.mrf.mxu1 }
 0xaca   : > { %4336 = vmatprep.mubr.bf16.mxu0 %v4295_v40  ;;  %6466 = vmatpush3.bf16.msra.mxu1 %v7625_v38  ;;  %v6885_v38 = vld [vmem:[%s8874_s2 + $0x1a8] sm:$0xff]   ;;  %v4293_v41 = vmax.f32 %v4277_v46, 0.0 }
 0xacb   : > { %4337 = vmatmul.mubr.bf16.vlgmr.msra.gmra.mxu0 %v4294_v59  ;;  %6467 = vmatprep.subr.bf16.mxu1 %v8902_v28 }
 0xacc   : > { %6113 = vmatpush3.bf16.msra.mxu0 %v6883_v8  ;;  %6479 = vmatprep.mubr.msk.bf16.mxu1 %vm6958_vm1, %v8902_v28  ;;  %v4300_v17 = vpack.c.bf16 %v4293_v41, %v4286_v50  ;;  %v6914_v41 = vld [vmem:[%s8875_s3 + $0x118] sm:$0xff] }
 0xacd   : > { %6114 = vmatprep.subr.bf16.mxu0 %v6884_v60  ;;  %v6918_v50 = vld [vmem:[%s8875_s3 + $0x138] sm:$0x3] }
 0xace   : > { %6468 = vmatpush3.bf16.msra.mxu1 %v6885_v38 }
 0xacf   : > { %6469 = vmatprep.subr.bf16.mxu1 %v8902_v28 }
 0xad0   : > { %6115 = vmatpush3.bf16.msra.mxu0 %v6886_v25 }
 0xad1   : > { %6116 = vmatprep.subr.bf16.mxu0 %v6887_v1 }
 0xad2   : > { %6470 = vmatpush3.bf16.msra.mxu1 %v6888_v19 }
 0xad3   : > { %6471 = vmatprep.subr.bf16.mxu1 %v8902_v28 }
 0xad4   : > { %6117 = vmatpush3.bf16.msra.mxu0 %v6889_v24 }
 0xad5   : > { %6118 = vmatprep.subr.bf16.mxu0 %v6890_v32 }
 0xad6   : > { %6472 = vmatpush3.bf16.msra.mxu1 %v6891_v30 }
 0xad7   : > { %6473 = vmatprep.subr.bf16.mxu1 %v8902_v28 }
 0xad8   : > { %6119 = vmatpush3.bf16.msra.mxu0 %v6892_v0 }
 0xad9   : > { %6120 = vmatprep.subr.bf16.mxu0 %v6893_v23 }
 0xada   : > { %6474 = vmatpush3.bf16.msra.mxu1 %v6894_v35 }
 0xadb   : > { %6475 = vmatprep.subr.bf16.mxu1 %v8902_v28 }
 0xadc   : > { %6121 = vmatpush3.bf16.msra.mxu0 %v6895_v31 }
 0xadd   : > { %v4230_v10 = vpop.f32.mrf.mxu0  ;;  %6122 = vmatprep.subr.bf16.mxu0 %v6896_v61 }
 0xade   : > { %6476 = vmatpush3.bf16.msra.mxu1 %v6897_v11  ;;  %v4231_v22 = vadd.f32 %v4230_v10, %v7608_v21  ;;  %v6912_v11 = vld [vmem:[%s8875_s3 + $0x108] sm:$0xff] }
 0xadf   : > { %v4232_v16 = vpop.f32.mrf.mxu0  ;;  %6477 = vmatprep.subr.bf16.mxu1 %v8902_v28 }
 0xae0   : > { %6123 = vmatpush3.bf16.msra.mxu0 %v6898_v15  ;;  %v4233_v33 = vadd.f32 %v4232_v16, %v7608_v21  ;;  %v6902_v21 = vld [vmem:[%s8874_s2 + $0x140] sm:$0xff]   ;;  %v4284_v14 = vmax.f32 %v4231_v22, 0.0  ;;  %v6913_v16 = vld [vmem:[%s8875_s3 + $0x110] sm:$0xff] }
 0xae1   : > { %v4234_v18 = vpop.f32.mrf.mxu0  ;;  %6124 = vmatprep.subr.bf16.mxu0 %v6899_v62  ;;  %v6915_v15 = vld [vmem:[%s8875_s3 + $0x120] sm:$0xff]  ;;  %v6917_v62 = vld [vmem:[%s8875_s3 + $0x130] sm:$0xff] }
 0xae2   : > { %v4235_v34 = vadd.f32 %v4234_v18, %v7606_v5  ;;  %6478 = vmatpush3.bf16.msra.mxu1 %v6900_v39  ;;  %v4285_v47 = vmax.f32 %v4233_v33, 0.0  ;;  %v6916_v18 = vld [vmem:[%s8875_s3 + $0x128] sm:$0xff]  ;;  %v6919_v33 = vld [vmem:[%s8875_s3 + $0x178] sm:$0xff] }
 0xae3   : > { %v4236_v9 = vpop.f32.mrf.mxu0  ;;  %6508 = vmatprep.subr.mxu1 %v8902_v28 }
 0xae4   : > { %v4237_v44 = vadd.f32 %v4236_v9, %v7606_v5  ;;  %6125 = vmatpush3.bf16.msra.mxu0 %v6901_v48  ;;  %v4291_v53 = vmax.f32 %v4235_v34, 0.0 }
 0xae5   : > { %6126 = vmatprep.subr.bf16.mxu0 %v6902_v21  ;;  %6480 = vmatmul.mubr.msk.bf16.vlgmr.msra.gmra.mxu1 %vm2042_vm9, %v4300_v17 }
 0xae6   : > { %v4292_v45 = vmax.f32 %v4237_v44, 0.0  ;;  %6509 = vmatpush3.msk.msra.mxu1 %vm810_vm2, %v6903_v55  ;;  %6510 = vmatprep.mubr.msk.f32.mxu1 %vm6958_vm1, %v8902_v28  ;;  %v4298_v3 = vpack.c.bf16 %v4291_v53, %v4284_v14 }
 0xae7   : > { %6551 = vmatprep.subr.mxu1 %v8902_v28 }
 0xae8   : > { %v4299_v5 = vpack.c.bf16 %v4292_v45, %v4285_v47  ;;  %6127 = vmatpush3.bf16.msra.mxu0 %v6904_v63 }
 0xae9   : > { %6483 = vmatprep.subr.mxu0 %v8902_v28 }
 0xaea   : > { %4418 = vmatprep.mubr.bf16.mxu0 %v4299_v5 }
 0xaeb   : > { %4419 = vmatmul.mubr.bf16.vlgmr.msra.gmra.mxu0 %v4298_v3 }
 0xaec   : > { %6487 = vmatprep.mubr.msk.f32.mxu0 %vm6958_vm1, %v8902_v28 }
 0xaed   : > { %6511 = vmatmul.mubr.msk.f32.vlgmr.msra.gmra.mxu1 %vm2338_vm10, %v6905_v7 }
 0xaee   : > { %6513 = vmatprep.mubr.msk.f32.mxu1 %vm6958_vm1, %v8902_v28 }
 0xaf1   : > { %6514 = vmatmul.mubr.msk.f32.gmra.mxu1 %vm2338_vm10, %v6906_v26 }
 0xaf2   : > { %6516 = vmatprep.mubr.msk.f32.mxu1 %vm6958_vm1, %v8902_v28 }
 0xaf5   : > { %6517 = vmatmul.mubr.msk.f32.gmra.mxu1 %vm2338_vm10, %v6907_v27 }
 0xaf6   : > { %6519 = vmatprep.mubr.msk.f32.mxu1 %vm6958_vm1, %v8902_v28 }
 0xaf9   : > { %6520 = vmatmul.mubr.msk.f32.gmra.mxu1 %vm2338_vm10, %v6908_v58 }
 0xafa   : > { %6522 = vmatprep.mubr.msk.f32.mxu1 %vm6958_vm1, %v8902_v28 }
 0xafd   : > { %6523 = vmatmul.mubr.msk.f32.gmra.mxu1 %vm2338_vm10, %v6909_v13 }
 0xafe   : > { %6525 = vmatprep.mubr.msk.f32.mxu1 %vm6958_vm1, %v8902_v28 }
 0xb01   : > { %6526 = vmatmul.mubr.msk.f32.gmra.mxu1 %vm2338_vm10, %v6910_v54 }
 0xb02   : > { %6528 = vmatprep.mubr.msk.f32.mxu1 %vm6958_vm1, %v8902_v28 }
 0xb05   : > { %6529 = vmatmul.mubr.msk.f32.gmra.mxu1 %vm2338_vm10, %v6911_v36 }
 0xb06   : > { %6559 = vmatprep.mubr.msk.f32.mxu1 %vm6958_vm1, %v8902_v28 }
 0xb89   : > { %v6106_v52 = vpop.f32.mrf.mxu1 }
 0xb8b   : > { %v6107_v57 = vpop.f32.mrf.mxu1  ;;  %v6084_v56 = vpop.f32.mrf.mxu0 }
 0xb8c   : > { %v6108_v19 = vadd.f32 %v6107_v57, %v6106_v52 }
 0xb8d   : > { %v6109_v37 = vpop.f32.mrf.mxu1  ;;  %v6085_v6 = vpop.f32.mrf.mxu0 }
 0xb8e   : > { %v6086_v60 = vadd.f32 %v6085_v6, %v6084_v56 }
 0xb8f   : > { %v6110_v29 = vpop.f32.mrf.mxu1  ;;  %v6087_v2 = vpop.f32.mrf.mxu0 }
 0xb90   : > { %v6111_v24 = vadd.f32 %v6110_v29, %v6109_v37  ;;  %v4380_v23 = vadd.f32 %v6108_v19, %v6086_v60  ;;  %v8903_v29 = vld [vmem:[#allocation5_spill] sm:$0xff] }
 0xb91   : > { %v6088_v40 = vpop.f32.mrf.mxu0 }
 0xb92   : > { %v6089_v38 = vadd.f32 %v6088_v40, %v6087_v2 }
 0xb94   : > { %v4383_v35 = vadd.f32 %v6111_v24, %v6089_v38  ;;  %v8905_v38 = vld [vmem:[#allocation4_spill] sm:$0xff]  ;;  %v8906_v24 = vld [vmem:[#allocation7_spill] sm:$0xff] }
 0xba5   : > { %v4461_v12 = vpop.f32.mrf.mxu1 }
 0xba7   : > { %v6481_v4 = vpop.f32.mrf.mxu1 }
 0xba9   : > { %v4464_v20 = vpop.f32.mrf.mxu1 }
 0xbab   : > { %v6128_v59 = vpop.f32.mrf.mxu0  ;;  %v6482_v43 = vpop.f32.mrf.mxu1 }
 0xbac   : > { %v8904_v43 = vld [vmem:[#allocation6_spill] sm:$0xff] }
 0xbad   : > { %v6129_v8 = vpop.f32.mrf.mxu0  ;;  %v8583_v25 = vpop.f32.mrf.mxu1 }
 0xbae   : > { %v6130_v32 = vadd.f32 %v6129_v8, %v6128_v59 }
 0xbaf   : > { %v6131_v1 = vpop.f32.mrf.mxu0  ;;  %v6512_v30 = vpop.f32.mrf.mxu1 }
 0xbb0   : > { %v4421_v31 = vadd.f32 %v6130_v32, %v4380_v23 }
 0xbb1   : > { %v6132_v0 = vpop.f32.mrf.mxu0  ;;  %v4645_v34 = vpop.f32.mrf.mxu1 }
 0xbb2   : > { %v6133_v46 = vadd.f32 %v6132_v0, %v6131_v1  ;;  %v4462_v49 = vadd.f32 %v4461_v12, %v4421_v31  ;;  %v8907_v31 = vld [vmem:[#allocation3_spill] sm:$0xff] }
 0xbb3   : > { %v6515_v22 = vpop.f32.mrf.mxu1 }
 0xbb4   : > { %v4424_v10 = vadd.f32 %v6133_v46, %v4383_v35 }
 0xbb5   : > { %v4650_v39 = vpop.f32.mrf.mxu1 }
 0xbb6   : > { %v4465_v61 = vadd.f32 %v4464_v20, %v4424_v10 }
 0xbb7   : > { %v6518_v9 = vpop.f32.mrf.mxu1 }
 0xbb8   : > { %6484 = vmatpush3.msk.msra.mxu0 %vm1499_vm6, %v4465_v61 }
 0xbb9   : > { %6485 = vmatprep.subr.mxu0 %v8902_v28  ;;  %v4655_v17 = vpop.f32.mrf.mxu1 }
 0xbba   : > { %6486 = vmatpush3.msra.mxu0 %v4462_v49 }
 0xbbb   : > { %6488 = vmatmul.mubr.msk.f32.vlgmr.msra.gmra.mxu0 %vm2213_vm11, %v6912_v11  ;;  %v6521_v44 = vpop.f32.mrf.mxu1 }
 0xbbc   : > { %6490 = vmatprep.mubr.msk.f32.mxu0 %vm6958_vm1, %v8902_v28 }
 0xbbd   : > { %v4660_v48 = vpop.f32.mrf.mxu1 }
 0xbbf   : > { %6491 = vmatmul.mubr.msk.f32.gmra.mxu0 %vm2213_vm11, %v6913_v16  ;;  %v6524_v53 = vpop.f32.mrf.mxu1 }
 0xbc0   : > { %6493 = vmatprep.mubr.msk.f32.mxu0 %vm6958_vm1, %v8902_v28 }
 0xbc1   : > { %v4665_v21 = vpop.f32.mrf.mxu1 }
 0xbc3   : > { %6494 = vmatmul.mubr.msk.f32.gmra.mxu0 %vm2213_vm11, %v6914_v41  ;;  %v6527_v47 = vpop.f32.mrf.mxu1 }
 0xbc4   : > { %6496 = vmatprep.mubr.msk.f32.mxu0 %vm6958_vm1, %v8902_v28 }
 0xbc5   : > { %v4670_v45 = vpop.f32.mrf.mxu1 }
 0xbc7   : > { %6497 = vmatmul.mubr.msk.f32.gmra.mxu0 %vm2213_vm11, %v6915_v15  ;;  %v6530_v14 = vpop.f32.mrf.mxu1 }
 0xbc8   : > { %6499 = vmatprep.mubr.msk.f32.mxu0 %vm6958_vm1, %v8902_v28 }
 0xbcb   : > { %6500 = vmatmul.mubr.msk.f32.gmra.mxu0 %vm2213_vm11, %v6916_v18 }
 0xbcc   : > { %6502 = vmatprep.mubr.msk.f32.mxu0 %vm6958_vm1, %v8902_v28 }
 0xbcf   : > { %6503 = vmatmul.mubr.msk.f32.gmra.mxu0 %vm2213_vm11, %v6917_v62 }
 0xbd0   : > { %6505 = vmatprep.mubr.msk.f32.mxu0 %vm6958_vm1, %v8902_v28 }
 0xbd3   : > { %6506 = vmatmul.mubr.msk.f32.gmra.mxu0 %vm2213_vm11, %v6918_v50 }
 0xbd4   : > { %6545 = vmatprep.mubr.msk.f32.mxu0 %vm1206_vm5, %v6919_v33 }
 0xc7b   : > { %v4537_v55 = vpop.f32.mrf.mxu0 }
 0xc7c   : > { %v4641_v4 = vadd.f32 %v8583_v25, %v4537_v55 }
 0xc7d   : > { %v6489_v5 = vpop.f32.mrf.mxu0 }
 0xc7e   : > { %v8646_v32 = vadd.f32 %v4641_v4, %v8906_v24  ;;  %v6925_v24 = vld [vmem:[%s8875_s3 + $0x260] sm:$0xff] }
 0xc7f   : > { %v4542_v63 = vpop.f32.mrf.mxu0 }
 0xc80   : > { %v4646_v56 = vadd.f32 %v4645_v34, %v4542_v63  ;;  %v4688_v49 = vmin.f32 %v8646_v32, 0.0 }
 0xc81   : > { %v6492_v3 = vpop.f32.mrf.mxu0 }
 0xc82   : > { %v8640_v8 = vadd.f32 %v4646_v56, %v8904_v43  ;;  %v4695_v15 = vmul.f32 1.442695, %v4688_v49 }
 0xc83   : > { %v4547_v7 = vpop.f32.mrf.mxu0 }
 0xc84   : > { %v4651_v54 = vadd.f32 %v4650_v39, %v4547_v7  ;;  %v4689_v23 = vmin.f32 %v8640_v8, 0.0 }
 0xc85   : > { %v6495_v26 = vpop.f32.mrf.mxu0 }
 0xc86   : > { %v8636_v2 = vadd.f32 %v4651_v54, %v8903_v29  ;;  %v4697_v16 = vmul.f32 1.442695, %v4689_v23 }
 0xc87   : > { %v4552_v27 = vpop.f32.mrf.mxu0 }
 0xc88   : > { %v4656_v13 = vadd.f32 %v4655_v17, %v4552_v27 }
 0xc89   : > { %v6498_v58 = vpop.f32.mrf.mxu0 }
 0xc8a   : > { %v8632_v37 = vadd.f32 %v4656_v13, %v7806_v51  ;;  %v4690_v51 = vmin.f32 %v8636_v2, 0.0 }
 0xc8b   : > { %v4557_v36 = vpop.f32.mrf.mxu0 }
 0xc8c   : > { %v4661_v52 = vadd.f32 %v4660_v48, %v4557_v36  ;;  %v4691_v60 = vmin.f32 %v8632_v37, 0.0  ;;  %v4699_v61 = vmul.f32 1.442695, %v4690_v51  ;;  %v4684_v27 = vmax.f32 %v8632_v37, 0.0  ;;  %v6922_v51 = vld [vmem:[%s8875_s3 + $0x270] sm:$0x3f] }
 0xc8d   : > { %v6501_v57 = vpop.f32.mrf.mxu0  ;;  %v4681_v37 = vmax.f32 %v8646_v32, 0.0  ;;  %v6926_v32 = vld [vmem:[%s8875_s3 + $0x258] sm:$0xff] }
 0xc8e   : > { %v4678_v6 = vadd.f32 %v4661_v52, %v7804_v42  ;;  %v4701_v35 = vmul.f32 1.442695, %v4691_v60  ;;  %v4683_v52 = vmax.f32 %v8636_v2, 0.0 }
 0xc8f   : > { %v4562_v12 = vpop.f32.mrf.mxu0 }
 0xc90   : > { %v4692_v40 = vmin.f32 %v4678_v6, 0.0  ;;  %v4666_v20 = vadd.f32 %v4665_v21, %v4562_v12  ;;  %v4685_v5 = vmax.f32 %v4678_v6, 0.0  ;;  %v4682_v6 = vmax.f32 %v8640_v8, 0.0 }
 0xc91   : > { %v6504_v59 = vpop.f32.mrf.mxu0 }
 0xc92   : > { %v4679_v1 = vadd.f32 %v4666_v20, %v8905_v38  ;;  %v4703_v19 = vmul.f32 1.442695, %v4692_v40  ;;  %v6920_v38 = vld [vmem:[%s8875_s3 + $0x180] sm:$0xff] }
 0xc93   : > { %v4567_v42 = vpop.f32.mrf.mxu0 }
 0xc94   : > { %v4693_v30 = vmin.f32 %v4679_v1, 0.0  ;;  %v4671_v0 = vadd.f32 %v4670_v45, %v4567_v42  ;;  %6793 = vpow2.f32 %v4703_v19  ;;  %v4686_v53 = vmax.f32 %v4679_v1, 0.0  ;;  %v6921_v1 = vld [vmem:[%s8875_s3 + $0x188] sm:$0xff]  ;;  %v6924_v42 = vld [vmem:[%s8875_s3 + $0x190] sm:$0x1] }
 0xc95   : > { %v6507_v25 = vpop.f32.mrf.mxu0  ;;  %v6923_v19 = vld [vmem:[%s8875_s3 + $0x268] sm:$0xff] }
 0xc96   : > { %v4705_v46 = vmul.f32 1.442695, %v4693_v30  ;;  %v4680_v10 = vadd.f32 %v4671_v0, %v8907_v31  ;;  %v8908_v0 = vld [vmem:[#allocation10_spill] sm:$0xff] }
 0xc98   : > { %6795 = vpow2.f32 %v4705_v46  ;;  %v4694_v11 = vmin.f32 %v4680_v10, 0.0  ;;  %v4687_v21 = vmax.f32 %v4680_v10, 0.0  ;;  %v8909_v46 = vld [vmem:[#allocation11_spill] sm:$0xff] }
 0xc99   : > { %6797 = vpow2.f32 %v4701_v35 }
 0xc9a   : > { %v4707_v41 = vmul.f32 1.442695, %v4694_v11  ;;  %6799 = vpow2.f32 %v4699_v61  ;;  %v8910_v11 = vld [vmem:[#allocation8_spill] sm:$0xff] }
 0xc9c   : > { %6801 = vpow2.f32 %v4707_v41 }
 0xc9d   : > { %6803 = vpow2.f32 %v4697_v16 }
 0xc9e   : > { %6805 = vpow2.f32 %v4695_v15 }
 0xca1   : > { %v6794_v18 = vpop.eup %6793 }
 0xca2   : > { %v5855_v22 = vadd.f32 -1.0, %v6794_v18 }
 0xca4   : > { %v4720_v45 = vmul.f32 1.6732632, %v5855_v22 }
 0xca5   : > { %v6796_v62 = vpop.eup %6795 }
 0xca6   : > { %v5856_v50 = vadd.f32 -1.0, %v6796_v62  ;;  %v6798_v33 = vpop.eup %6797  ;;  %v4727_v13 = vadd.f32 %v4720_v45, %v4685_v5  ;;  %v8911_v62 = vld [vmem:[#allocation9_spill] sm:$0xff] }
 0xca7   : > { %v6800_v34 = vpop.eup %6799  ;;  %v5854_v44 = vadd.f32 -1.0, %v6798_v33 }
 0xca8   : > { %v4721_v17 = vmul.f32 1.6732632, %v5856_v50  ;;  %v5853_v14 = vadd.f32 -1.0, %v6800_v34  ;;  %v4734_v12 = vmul.f32 1.050701, %v4727_v13 }
 0xca9   : > { %v6802_v39 = vpop.eup %6801  ;;  %v4719_v7 = vmul.f32 1.6732632, %v5854_v44 }
 0xcaa   : > { %v5857_v9 = vadd.f32 -1.0, %v6802_v39  ;;  %v6804_v48 = vpop.eup %6803  ;;  %v4728_v3 = vadd.f32 %v4721_v17, %v4686_v53  ;;  %v4718_v54 = vmul.f32 1.6732632, %v5853_v14 }
 0xcab   : > { %v6806_v55 = vpop.eup %6805  ;;  %v5852_v26 = vadd.f32 -1.0, %v6804_v48  ;;  %v4726_v56 = vadd.f32 %v4719_v7, %v4684_v27 }
 0xcac   : > { %v4722_v47 = vmul.f32 1.6732632, %v5857_v9  ;;  %v5851_v36 = vadd.f32 -1.0, %v6806_v55  ;;  %v4735_v57 = vmul.f32 1.050701, %v4728_v3  ;;  %v4725_v4 = vadd.f32 %v4718_v54, %v4683_v52 }
 0xcad   : > { %v4717_v29 = vmul.f32 1.6732632, %v5852_v26  ;;  %v4733_v20 = vmul.f32 1.050701, %v4726_v56 }
 0xcae   : > { %v4729_v63 = vadd.f32 %v4722_v47, %v4687_v21  ;;  %v4716_v40 = vmul.f32 1.6732632, %v5851_v36  ;;  %v4732_v2 = vmul.f32 1.050701, %v4725_v4  ;;  %v6930_v4 = vld [vmem:[%s8875_s3 + $0x240] sm:$0xff] }
 0xcaf   : > { %v4724_v59 = vadd.f32 %v4717_v29, %v4682_v6  ;;  %v6927_v29 = vld [vmem:[%s8875_s3 + $0x1b8] sm:$0x3f]  ;;  %v6928_v6 = vld [vmem:[%s8875_s3 + $0x250] sm:$0x3f] }
 0xcb0   : > { %v4736_v58 = vmul.f32 1.050701, %v4729_v63  ;;  %v4723_v43 = vadd.f32 %v4716_v40, %v4681_v37  ;;  %v6931_v40 = vld [vmem:[%s8875_s3 + $0x238] sm:$0xff] }
 0xcb1   : > { %v4731_v60 = vmul.f32 1.050701, %v4724_v59 }
 0xcb2   : > { %6531 = vmatprep.subr.msk.mxu0 %vm2593_vm12, %v4736_v58  ;;  %v4730_v8 = vmul.f32 1.050701, %v4723_v43 }
 0xcb3   : > { %6532 = vmatpush3.msk.msra.mxu0 %vm2593_vm12, %v4736_v58 }
 0xcb4   : > { %6533 = vmatprep.subr.mxu0 %v4735_v57 }
 0xcb5   : > { %6534 = vmatpush3.msra.mxu0 %v4735_v57 }
 0xcb6   : > { %6535 = vmatprep.subr.mxu0 %v4734_v12 }
 0xcb7   : > { %6536 = vmatpush3.msra.mxu0 %v4734_v12  ;;  %v6929_v12 = vld [vmem:[%s8875_s3 + $0x248] sm:$0xff] }
 0xcb8   : > { %6537 = vmatprep.subr.mxu0 %v4733_v20 }
 0xcb9   : > { %6538 = vmatpush3.msra.mxu0 %v4733_v20  ;;  %v8912_v20 = vld [vmem:[#allocation12_spill] sm:$0xff] }
 0xcba   : > { %6539 = vmatprep.subr.mxu0 %v4732_v2 }
 0xcbb   : > { %6540 = vmatpush3.msra.mxu0 %v4732_v2 }
 0xcbc   : > { %6541 = vmatprep.subr.mxu0 %v4731_v60 }
 0xcbd   : > { %6542 = vmatpush3.msra.mxu0 %v4731_v60 }
 0xcbe   : > { %6543 = vmatprep.subr.mxu0 %v4730_v8 }
 0xcbf   : > { %6544 = vmatpush3.msra.mxu0 %v4730_v8 }
 0xcc0   : > { %6546 = vmatmul.mubr.msk.f32.vlgmr.msra.gmra.mxu0 %vm1206_vm5, %v6920_v38  ;;  %6562 = vmatprep.subr.mxu0 %v8902_v28 }
 0xcc1   : > { %6548 = vmatprep.mubr.msk.f32.mxu0 %vm1206_vm5, %v6921_v1  ;;  %6563 = vmatpush3.msk.msra.mxu0 %vm2808_vm13, %v6922_v51 }
 0xcc2   : > { %6564 = vmatprep.subr.mxu0 %v8902_v28 }
 0xcc3   : > { %6565 = vmatpush3.msra.mxu0 %v6923_v19 }
 0xcc4   : > { %6549 = vmatmul.mubr.msk.f32.gmra.mxu0 %vm1206_vm5, %v6924_v42  ;;  %6566 = vmatprep.subr.mxu0 %v8902_v28 }
 0xcc5   : > { %6567 = vmatpush3.msra.mxu0 %v6925_v24  ;;  %6570 = vmatprep.mubr.msk.f32.mxu0 %vm6958_vm1, %v8902_v28 }
 0xcc6   : > { %6568 = vmatprep.subr.mxu0 %v8902_v28 }
 0xcc7   : > { %6569 = vmatpush3.msra.mxu0 %v6926_v32  ;;  %v6932_v32 = vld [vmem:[%s8875_s3 + $0x2b0] sm:$0x3f] }
 0xcc8   : > { %6584 = vmatprep.subr.mxu0 %v8902_v28 }
 0xd80   : > { %v6547_v30 = vpop.f32.mrf.mxu0 }
 0xd81   : > { %v4812_v25 = vadd.f32 %v6547_v30, %v8908_v0  ;;  %v6933_v30 = vld [vmem:[%s8875_s3 + $0x290] sm:$0x3f]  ;;  %v6934_v0 = vld [vmem:[%s8875_s3 + $0x2a8] sm:$0xff] }
 0xd82   : > { %v4806_v23 = vpop.f32.mrf.mxu0 }
 0xd83   : > { %v4830_v35 = vmin.f32 %v4812_v25, 0.0  ;;  %v4807_v31 = vadd.f32 %v4806_v23, %v8909_v46  ;;  %v4826_v63 = vmax.f32 %v4812_v25, 0.0  ;;  %v6935_v25 = vld [vmem:[%s8875_s3 + $0x288] sm:$0xff]  ;;  %v6936_v23 = vld [vmem:[%s8875_s3 + $0x2a0] sm:$0xff] }
 0xd84   : > { %v6550_v10 = vpop.f32.mrf.mxu0  ;;  %v6937_v46 = vld [vmem:[%s8875_s3 + $0x280] sm:$0xff] }
 0xd85   : > { %v4835_v61 = vmul.f32 1.442695, %v4830_v35  ;;  %v4829_v49 = vmin.f32 %v4807_v31, 0.0  ;;  %v4822_v16 = vadd.f32 %v6550_v10, %v8910_v11  ;;  %v4825_v13 = vmax.f32 %v4807_v31, 0.0  ;;  %v6938_v31 = vld [vmem:[%s8875_s3 + $0x298] sm:$0xff] }
 0xd86   : > { %v4816_v41 = vpop.f32.mrf.mxu0  ;;  %v6939_v10 = vld [vmem:[%s8875_s3 + $0x278] sm:$0xff]  ;;  %v6941_v11 = vld [vmem:[%s8875_s3 + $0x2d0] sm:$0x3f] }
 0xd87   : > { %v4833_v15 = vmul.f32 1.442695, %v4829_v49  ;;  %v4832_v18 = vmin.f32 %v4822_v16, 0.0  ;;  %6807 = vpow2.f32 %v4835_v61  ;;  %v4817_v50 = vadd.f32 %v4816_v41, %v8911_v62  ;;  %v6940_v49 = vld [vmem:[%s8875_s3 + $0x2f0] sm:$0x3f]  ;;  %v6943_v41 = vld [vmem:[%s8875_s3 + $0x2c8] sm:$0xff] }
 0xd88   : > { %v4828_v47 = vmax.f32 %v4822_v16, 0.0  ;;  %v6942_v16 = vld [vmem:[%s8875_s3 + $0x2e8] sm:$0xff] }
 0xd89   : > { %v4839_v33 = vmul.f32 1.442695, %v4832_v18  ;;  %6809 = vpow2.f32 %v4833_v15  ;;  %v4831_v34 = vmin.f32 %v4817_v50, 0.0  ;;  %v4827_v7 = vmax.f32 %v4817_v50, 0.0  ;;  %v6944_v15 = vld [vmem:[%s8875_s3 + $0x2e0] sm:$0xff]  ;;  %v6946_v50 = vld [vmem:[%s8875_s3 + $0x2d8] sm:$0xff] }
 0xd8a   : > { %v6945_v18 = vld [vmem:[%s8875_s3 + $0x2c0] sm:$0xff] }
 0xd8b   : > { %6811 = vpow2.f32 %v4839_v33  ;;  %v4837_v22 = vmul.f32 1.442695, %v4831_v34  ;;  %v6947_v34 = vld [vmem:[%s8875_s3 + $0x2b8] sm:$0xff] }
 0xd8d   : > { %6813 = vpow2.f32 %v4837_v22  ;;  %v270_v22 = vld [vmem:[%s8875_s3 + $0x200] sm:$0x3] }
 0xd94   : > { %v6808_v39 = vpop.eup %6807 }
 0xd95   : > { %v5864_v44 = vadd.f32 -1.0, %v6808_v39  ;;  %v269_v39 = vld [vmem:[%s8875_s3 + $0x1f8] sm:$0xff] }
 0xd96   : > { %v6810_v9 = vpop.eup %6809 }
 0xd97   : > { %v5863_v53 = vadd.f32 -1.0, %v6810_v9  ;;  %v4846_v14 = vmul.f32 1.6732632, %v5864_v44  ;;  %v268_v9 = vld [vmem:[%s8875_s3 + $0x1f0] sm:$0xff]  ;;  %v266_v44 = vld [vmem:[%s8875_s3 + $0x1e0] sm:$0xff] }
 0xd98   : > { %v6812_v17 = vpop.eup %6811 }
 0xd99   : > { %v5866_v48 = vadd.f32 -1.0, %v6812_v17  ;;  %v4845_v3 = vmul.f32 1.6732632, %v5863_v53  ;;  %v4850_v58 = vadd.f32 %v4846_v14, %v4826_v63  ;;  %v267_v17 = vld [vmem:[%s8875_s3 + $0x1e8] sm:$0xff]  ;;  %v264_v53 = vld [vmem:[%s8875_s3 + $0x1d0] sm:$0xff] }
 0xd9a   : > { %v6814_v21 = vpop.eup %6813 }
 0xd9b   : > { %v4848_v45 = vmul.f32 1.6732632, %v5866_v48  ;;  %v5865_v55 = vadd.f32 -1.0, %v6814_v21  ;;  %v4849_v36 = vadd.f32 %v4845_v3, %v4825_v13  ;;  %v4854_v57 = vmul.f32 1.050701, %v4850_v58  ;;  %v265_v48 = vld [vmem:[%s8875_s3 + $0x1d8] sm:$0xff] }
 0xd9d   : > { %v4852_v5 = vadd.f32 %v4848_v45, %v4828_v47  ;;  %v4847_v26 = vmul.f32 1.6732632, %v5865_v55  ;;  %v4853_v56 = vmul.f32 1.050701, %v4849_v36 }
 0xd9f   : > { %v4856_v27 = vmul.f32 1.050701, %v4852_v5  ;;  %v4851_v54 = vadd.f32 %v4847_v26, %v4827_v7 }
 0xda1   : > { %6552 = vmatpush3.msk.msra.mxu1 %vm1213_vm4, %v4856_v27  ;;  %v4855_v52 = vmul.f32 1.050701, %v4851_v54 }
 0xda2   : > { %6553 = vmatprep.subr.mxu1 %v8902_v28 }
 0xda3   : > { %6554 = vmatpush3.msra.mxu1 %v4855_v52 }
 0xda4   : > { %6555 = vmatprep.subr.mxu1 %v8902_v28 }
 0xda5   : > { %6556 = vmatpush3.msra.mxu1 %v4854_v57 }
 0xda6   : > { %6557 = vmatprep.subr.mxu1 %v8902_v28 }
 0xda7   : > { %6558 = vmatpush3.msra.mxu1 %v4853_v56  ;;  %v5882_v56 = vld [vmem:[%s8875_s3 + $0x1c8] ss:$0 sm:$0xff] }
 0xda8   : > { %6560 = vmatmul.mubr.msk.f32.vlgmr.msra.gmra.mxu1 %vm1495_vm8, %v6927_v29  ;;  %6573 = vmatprep.subr.mxu1 %v8902_v28 }
 0xda9   : > { %6574 = vmatpush3.msk.msra.mxu1 %vm2808_vm13, %v6928_v6  ;;  %6581 = vmatprep.mubr.msk.f32.mxu1 %vm6958_vm1, %v8902_v28 }
 0xdaa   : > { %6575 = vmatprep.subr.mxu1 %v8902_v28 }
 0xdab   : > { %6576 = vmatpush3.msra.mxu1 %v6929_v12 }
 0xdac   : > { %6577 = vmatprep.subr.mxu1 %v8902_v28 }
 0xdad   : > { %6578 = vmatpush3.msra.mxu1 %v6930_v4 }
 0xdae   : > { %6579 = vmatprep.subr.mxu1 %v8902_v28 }
 0xdaf   : > { %6580 = vmatpush3.msra.mxu1 %v6931_v40 }
 0xdb0   : > { %6595 = vmatprep.subr.mxu1 %v8902_v28 }
 0xe68   : > { %v4926_v37 = vpop.f32.mrf.mxu1 }
 0xe69   : > { %v4927_v59 = vadd.f32 %v4926_v37, %v8912_v20 }
 0xe6a   : > { %v6561_v2 = vpop.f32.mrf.mxu1 }
 0xe6b   : > { %v4931_v43 = vmin.f32 %v4927_v59, 0.0  ;;  %v4930_v1 = vmax.f32 %v4927_v59, 0.0 }
 0xe6d   : > { %v4932_v60 = vmul.f32 1.442695, %v4931_v43 }
 0xe6f   : > { %6815 = vpow2.f32 %v4932_v60  ;;  %v275_v60 = vld [vmem:[%s8875_s3 + $0x228] sm:$0x1] }
 0xe7c   : > { %v6816_v8 = vpop.eup %6815 }
 0xe7d   : > { %v5869_v38 = vadd.f32 -1.0, %v6816_v8  ;;  %v274_v8 = vld [vmem:[%s8875_s3 + $0x220] sm:$0xff] }
 0xe7f   : > { %v4935_v51 = vmul.f32 1.6732632, %v5869_v38  ;;  %v273_v38 = vld [vmem:[%s8875_s3 + $0x218] sm:$0xff] }
 0xe81   : > { %v4936_v19 = vadd.f32 %v4935_v51, %v4930_v1  ;;  %v272_v1 = vld [vmem:[%s8875_s3 + $0x210] sm:$0xff]  ;;  %v5884_v51 = vld [vmem:[%s8875_s3 + $0x208] ss:$0 sm:$0xff] }
 0xe83   : > { %v4937_v42 = vmul.f32 1.050701, %v4936_v19 }
 0xe85   : > { %v4939_v24 = vrot.slane %v4937_v42, 1  ;;  %6582 = vmatmul.mubr.msk.f32.vlgmr.msra.gmra.mxu1 %vm2805_vm14, %v4937_v42  ;;  %v5158_v35 = vrot.slane %v4937_v42, 3  ;;  %v5084_v61 = vrot.slane %v4937_v42, 2  ;;  %v5306_v62 = vrot.slane %v4937_v42, 5 }
 0xe86   : > { %6596 = vmatpush3.msk.msra.mxu1 %vm2808_vm13, %v6932_v32  ;;  %6603 = vmatprep.mubr.msk.f32.mxu1 %vm6958_vm1, %v8902_v28  ;;  %v5232_v33 = vrot.slane %v4937_v42, 4 }
 0xe87   : > { %6597 = vmatprep.subr.mxu1 %v8902_v28  ;;  %6571 = vmatmul.mubr.msk.f32.vlgmr.msra.gmra.mxu0 %vm2805_vm14, %v4939_v24 }
 0xe88   : > { %6585 = vmatpush3.msk.msra.mxu0 %vm2808_vm13, %v6933_v30  ;;  %6598 = vmatpush3.msra.mxu1 %v6934_v0 }
 0xe89   : > { %6586 = vmatprep.subr.mxu0 %v8902_v28  ;;  %6599 = vmatprep.subr.mxu1 %v8902_v28 }
 0xe8a   : > { %6587 = vmatpush3.msra.mxu0 %v6935_v25  ;;  %6600 = vmatpush3.msra.mxu1 %v6936_v23 }
 0xe8b   : > { %6588 = vmatprep.subr.mxu0 %v8902_v28  ;;  %6601 = vmatprep.subr.mxu1 %v8902_v28 }
 0xe8c   : > { %6589 = vmatpush3.msra.mxu0 %v6937_v46  ;;  %6602 = vmatpush3.msra.mxu1 %v6938_v31  ;;  %v5888_v31 = vld [vmem:[%s8875_s3 + $0x230] ss:$0 sm:$0xff] }
 0xe8d   : > { %6590 = vmatprep.subr.mxu0 %v8902_v28  ;;  %6604 = vmatmul.mubr.msk.f32.vlgmr.msra.gmra.mxu1 %vm2805_vm14, %v5158_v35 }
 0xe8e   : > { %6617 = vmatprep.subr.mxu1 %v8902_v28  ;;  %6591 = vmatpush3.msra.mxu0 %v6939_v10 }
 0xe8f   : > { %6592 = vmatprep.mubr.msk.f32.mxu0 %vm6958_vm1, %v8902_v28  ;;  %6618 = vmatpush3.msk.msra.mxu1 %vm2808_vm13, %v6940_v49 }
 0xe90   : > { %6593 = vmatmul.mubr.msk.f32.vlgmr.msra.gmra.mxu0 %vm2805_vm14, %v5084_v61  ;;  %6606 = vmatprep.subr.mxu0 %v8902_v28 }
 0xe91   : > { %6619 = vmatprep.subr.mxu1 %v8902_v28  ;;  %6607 = vmatpush3.msk.msra.mxu0 %vm2808_vm13, %v6941_v11 }
 0xe92   : > { %6620 = vmatpush3.msra.mxu1 %v6942_v16  ;;  %6608 = vmatprep.subr.mxu0 %v8902_v28 }
 0xe93   : > { %6621 = vmatprep.subr.mxu1 %v8902_v28  ;;  %6609 = vmatpush3.msra.mxu0 %v6943_v41 }
 0xe94   : > { %6622 = vmatpush3.msra.mxu1 %v6944_v15  ;;  %6610 = vmatprep.subr.mxu0 %v8902_v28 }
 0xe95   : > { %6623 = vmatprep.subr.mxu1 %v8902_v28  ;;  %6611 = vmatpush3.msra.mxu0 %v6945_v18 }
 0xe96   : > { %6624 = vmatpush3.msra.mxu1 %v6946_v50  ;;  %6625 = vmatprep.mubr.msk.f32.mxu1 %vm6958_vm1, %v8902_v28 }
 0xe97   : > { %6612 = vmatprep.subr.mxu0 %v8902_v28  ;;  %6626 = vmatmul.mubr.msk.f32.vlgmr.msra.gmra.mxu1 %vm2805_vm14, %v5306_v62 }
 0xe98   : > { %6613 = vmatpush3.msra.mxu0 %v6947_v34  ;;  %6614 = vmatprep.mubr.msk.f32.mxu0 %vm6958_vm1, %v8902_v28 }
 0xe99   : > { %6615 = vmatmul.mubr.msk.f32.vlgmr.msra.gmra.mxu0 %vm2805_vm14, %v5232_v33  ;;  %6628 = vmatprep.subr.mxu0 %v8902_v28 }
 0xe9a   : > { %6642 = vmatprep.mubr.msk.f32.mxu0 %vm6958_vm1, %v8902_v28  ;;  %6645 = vmatprep.subr.mxu1 %v8902_v28 }
 0xe9b   : > { %6653 = vmatprep.mubr.msk.f32.mxu1 %vm6958_vm1, %v8902_v28  ;;  %6629 = vmatpush3.msk.msra.mxu0 %vm2593_vm12, %v270_v22 }
 0xe9c   : > { %6630 = vmatprep.subr.mxu0 %v8902_v28  ;;  %6646 = vmatpush3.msk.msra.mxu1 %vm1213_vm4, %v275_v60 }
 0xe9d   : > { %6631 = vmatpush3.msra.mxu0 %v269_v39  ;;  %6647 = vmatprep.subr.mxu1 %v8902_v28 }
 0xe9e   : > { %6632 = vmatprep.subr.mxu0 %v8902_v28  ;;  %6648 = vmatpush3.msra.mxu1 %v274_v8 }
 0xe9f   : > { %6633 = vmatpush3.msra.mxu0 %v268_v9  ;;  %6649 = vmatprep.subr.mxu1 %v8902_v28 }
 0xea0   : > { %6634 = vmatprep.subr.mxu0 %v8902_v28  ;;  %6650 = vmatpush3.msra.mxu1 %v273_v38 }
 0xea1   : > { %6635 = vmatpush3.msra.mxu0 %v267_v17  ;;  %6651 = vmatprep.subr.mxu1 %v8902_v28 }
 0xea2   : > { %6636 = vmatprep.subr.mxu0 %v8902_v28  ;;  %6652 = vmatpush3.msra.mxu1 %v272_v1 }
 0xea3   : > { %6637 = vmatpush3.msra.mxu0 %v266_v44 }
 0xea4   : > { %6638 = vmatprep.subr.mxu0 %v8902_v28 }
 0xea5   : > { %6639 = vmatpush3.msra.mxu0 %v265_v48 }
 0xea6   : > { %6640 = vmatprep.subr.mxu0 %v8902_v28 }
 0xea7   : > { %6641 = vmatpush3.msra.mxu0 %v264_v53 }
 0xf45   : > { %v5080_v21 = vpop.f32.mrf.mxu1 }
 0xf47   : > { %v5008_v47 = vpop.f32.mrf.mxu0  ;;  %v6583_v45 = vpop.f32.mrf.mxu1 }
 0xf48   : > { %v5081_v3 = vadd.f32 %v5080_v21, %v5008_v47 }
 0xf49   : > { %v6572_v14 = vpop.f32.mrf.mxu0 }
 0xf4d   : > { %v5227_v55 = vpop.f32.mrf.mxu1 }
 0xf4f   : > { %v6605_v5 = vpop.f32.mrf.mxu1 }
 0xf50   : > { %v5153_v63 = vpop.f32.mrf.mxu0 }
 0xf51   : > { %v5157_v26 = vadd.f32 %v5153_v63, %v5081_v3 }
 0xf52   : > { %v6594_v7 = vpop.f32.mrf.mxu0 }
 0xf53   : > { %v5231_v58 = vadd.f32 %v5227_v55, %v5157_v26 }
 0xf57   : > { %v5375_v27 = vpop.f32.mrf.mxu1 }
 0xf59   : > { %v5301_v13 = vpop.f32.mrf.mxu0  ;;  %v6627_v54 = vpop.f32.mrf.mxu1 }
 0xf5a   : > { %v5305_v36 = vadd.f32 %v5301_v13, %v5231_v58 }
 0xf5b   : > { %v6616_v52 = vpop.f32.mrf.mxu0 }
 0xf5c   : > { %v5379_v57 = vadd.f32 %v5375_v27, %v5305_v36 }
 0xf5e   : > { %5380 = vst.msk [vmem:[#allocation2 + $0x1] sm:$0x1] %vm3265_vm15, %v5379_v57 }
 0xf65   : > { %v5381_v29 = vld [vmem:[#allocation2] sm:$0x3] }
 0xf66   : > { %v5386_v6 = vadd.f32 %v5882_v56, %v5381_v29 }
 0xf68   : > { %v5388_v12 = vmin.f32 %v5386_v6, 0.0  ;;  %v5387_v20 = vmax.f32 %v5386_v6, 0.0 }
 0xf6a   : > { %v5389_v4 = vmul.f32 1.442695, %v5388_v12 }
 0xf6c   : > { %6817 = vpow2.f32 %v5389_v4 }
 0xf79   : > { %v6818_v40 = vpop.eup %6817 }
 0xf7a   : > { %v5883_v37 = vadd.f32 -1.0, %v6818_v40 }
 0xf7c   : > { %v5392_v59 = vmul.f32 1.6732632, %v5883_v37 }
 0xf7e   : > { %v5393_v2 = vadd.f32 %v5392_v59, %v5387_v20 }
 0xf80   : > { %v5394_v43 = vmul.f32 1.050701, %v5393_v2 }
 0xf82   : > { %6643 = vmatmul.mubr.msk.f32.vlgmr.msra.gmra.mxu0 %vm1206_vm5, %v5394_v43 }
0x1042   : > { %v5471_v19 = vpop.f32.mrf.mxu0 }
0x1043   : > { %v5472_v42 = vadd.f32 %v5884_v51, %v5471_v19 }
0x1044   : > { %v6644_v24 = vpop.f32.mrf.mxu0 }
0x1045   : > { %v5476_v32 = vmin.f32 %v5472_v42, 0.0  ;;  %v5475_v28 = vmax.f32 %v5472_v42, 0.0 }
0x1047   : > { %v5477_v30 = vmul.f32 1.442695, %v5476_v32 }
0x1049   : > { %6819 = vpow2.f32 %v5477_v30 }
0x1056   : > { %v6820_v0 = vpop.eup %6819 }
0x1057   : > { %v5887_v25 = vadd.f32 -1.0, %v6820_v0 }
0x1059   : > { %v5480_v23 = vmul.f32 1.6732632, %v5887_v25 }
0x105b   : > { %v5481_v35 = vadd.f32 %v5480_v23, %v5475_v28 }
0x105d   : > { %v5482_v46 = vmul.f32 1.050701, %v5481_v35 }
0x105f   : > { %6654 = vmatmul.mubr.msk.f32.vlgmr.msra.gmra.mxu1 %vm1495_vm8, %v5482_v46 }
0x111f   : > { %v5559_v10 = vpop.f32.mrf.mxu1 }
0x1120   : > { %v5560_v61 = vadd.f32 %v5888_v31, %v5559_v10 }
0x1121   : > { %v6655_v49 = vpop.f32.mrf.mxu1 }
0x1122   : > { %5564 = vst.msk [vmem:[%s197_s27] sm:$0x3] %vm5563_vm0, %v5560_v61 }
0x1123 PF: > { %s14_s15 = sadd.s32 1, %s6954_s15  }
0x1124   : > { %p11_p5 = scmp.ge.s32.totalorder %s14_s15, 8  }
0x1126   :  { %13 = sbr.rel (!%p11_p5) target bundleno = 1 (0x1), region = 67 }

</bundles_post_ra>
